<compile_context>
chip_gen: v7x
topology: tpu7x:2x2x1
jax: 0.10.0
libtpu: 0.0.40
codegen_flags: <defaults>
</compile_context>

<pallas_src>
import math
import functools

import jax
import jax.numpy as jnp
from jax.experimental import pallas as pl
from jax.experimental.pallas import tpu as pltpu


# ---------------------------------------------------------------------------
# In-kernel LayerNorm (torch-style: unbiased std, (std + eps) denominator)
# ---------------------------------------------------------------------------
def _layernorm(x, gamma, beta, eps=1e-6):
    d = x.shape[-1]
    s1 = jnp.sum(x, axis=-1, keepdims=True)
    s2 = jnp.sum(x * x, axis=-1, keepdims=True)
    mean = s1 * (1.0 / d)
    var = jnp.maximum((s2 - s1 * mean) * (1.0 / (d - 1)), 0.0)   # unbiased (ddof=1)
    inv = pl.reciprocal(jnp.sqrt(var) + eps, approx=True)         # EUP
    return gamma * (x - mean) * inv + beta


# ---------------------------------------------------------------------------
# Fused EncoderLayer kernel (one query tile of one batch element per grid step)
# ---------------------------------------------------------------------------
def encoder_layer_kernel(x_ref, y_ref,
                         wq_ref, wk_ref, wv_ref, wo_ref,
                         g1_ref, b1_ref,
                         w1_ref, c1_ref, w2_ref, c2_ref,
                         g2_ref, b2_ref,
                         o_ref,
                         *, n_heads, d_model):
    f32 = jnp.float32
    x = x_ref[0]                       # (tq, D)  query tile, native dtype
    y = y_ref[0]                       # (S,  D)  key/value source, native dtype
    tq = x.shape[0]
    s_kv = y.shape[0]
    d_head = d_model // n_heads

    # --- projections: MXU consumes the native dtype, f32 accumulation.
    q = jnp.dot(x, wq_ref[...], preferred_element_type=f32)       # (tq, D)
    k = jnp.dot(y, wk_ref[...], preferred_element_type=f32)       # (S,  D)
    v = jnp.dot(y, wv_ref[...], preferred_element_type=f32)       # (S,  D)

    # --- heads-leading layout (matches torch chunk(n_heads, -1) head split):
    #     one batched contraction per step instead of per-head slices + concat.
    qh = q.reshape(tq, n_heads, d_head).transpose(1, 0, 2)        # (H, tq, dh)
    kh = k.reshape(s_kv, n_heads, d_head).transpose(1, 0, 2)      # (H, S,  dh)
    vh = v.reshape(s_kv, n_heads, d_head).transpose(1, 0, 2)      # (H, S,  dh)

    inv_scale = 1.0 / math.sqrt(d_model)                          # Attention(d_key=d_model)
    s = jnp.einsum('hqd,hkd->hqk', qh, kh, preferred_element_type=f32) * inv_scale
    s = s - jnp.max(s, axis=-1, keepdims=True)
    p = jnp.exp(s)
    p = p * pl.reciprocal(jnp.sum(p, axis=-1, keepdims=True), approx=True)
    ctx = jnp.einsum('hqk,hkd->hqd', p, vh, preferred_element_type=f32)   # (H, tq, dh)
    attn = ctx.transpose(1, 0, 2).reshape(tq, d_model)                    # (tq, D)
    attn = jnp.dot(attn.astype(wo_ref.dtype), wo_ref[...], preferred_element_type=f32)

    # --- residual + LayerNorm 1 (f32 elementwise math)
    h1 = _layernorm(x.astype(f32) + attn,
                    g1_ref[...].astype(f32), b1_ref[...].astype(f32))

    # --- FeedForward: linear2(relu(linear1(h1)))
    ff = jnp.dot(h1.astype(w1_ref.dtype), w1_ref[...], preferred_element_type=f32)
    ff = jnp.maximum(ff + c1_ref[...].astype(f32), 0.0)
    ff = jnp.dot(ff.astype(w2_ref.dtype), w2_ref[...], preferred_element_type=f32)
    ff = ff + c2_ref[...].astype(f32)

    # --- residual + LayerNorm 2
    out = _layernorm(h1 + ff, g2_ref[...].astype(f32), b2_ref[...].astype(f32))
    o_ref[0] = out.astype(o_ref.dtype)


def encoder_layer(x, y, params, n_heads):
    B, S, D = x.shape
    d_hidden = params['w1'].shape[1]
    assert D % n_heads == 0, "d_model must be divisible by n_heads"

    # query tile: whole sequence at small S, otherwise 128-row tiles
    tq = S if S <= 128 else 128
    assert S % tq == 0, "S must be divisible by the query tile"
    n_qt = S // tq

    def full(shp):
        return pl.BlockSpec(shp, lambda b, i: (0,) * len(shp))

    kernel = functools.partial(encoder_layer_kernel, n_heads=n_heads, d_model=D)
    return pl.pallas_call(
        kernel,
        out_shape=jax.ShapeDtypeStruct((B, S, D), x.dtype),
        grid=(B, n_qt),
        in_specs=[
            pl.BlockSpec((1, tq, D), lambda b, i: (b, i, 0)),   # x: query tile
            pl.BlockSpec((1, S, D), lambda b, i: (b, 0, 0)),    # y: full K/V source
            full((D, D)), full((D, D)), full((D, D)), full((D, D)),   # wq wk wv wo
            full((1, D)), full((1, D)),                               # ln1 gamma/beta
            full((D, d_hidden)), full((1, d_hidden)),                 # ffn linear1
            full((d_hidden, D)), full((1, D)),                        # ffn linear2
            full((1, D)), full((1, D)),                               # ln2 gamma/beta
        ],
        out_specs=pl.BlockSpec((1, tq, D), lambda b, i: (b, i, 0)),
        compiler_params=pltpu.CompilerParams(
            # both axes fully independent -> megacore sharding on v7x
            dimension_semantics=("parallel", "parallel"),
            vmem_limit_bytes=64 * 1024 * 1024,
        ),
    )(x, y,
      params['wq'], params['wk'], params['wv'], params['wo'],
      params['g1'], params['b1'],
      params['w1'], params['c1'], params['w2'], params['c2'],
      params['g2'], params['b2'])


# ---------------------------------------------------------------------------
# Encoder wrapper: positional encodings (plain JAX, trivially elementwise) and
# a stack of n_layers fused EncoderLayer kernels — matches Encoder.forward.
# ---------------------------------------------------------------------------
def positional_encoding(S, D, dtype=jnp.float32):
    pos = jnp.arange(S, dtype=jnp.float32)[:, None]                    # (S, 1)
    ch = jnp.arange(D)
    exponent = jnp.where(ch % 2 == 0, ch, ch - 1).astype(jnp.float32) / float(D)
    ang = pos / (10000.0 ** exponent)[None, :]                         # (S, D)
    enc = jnp.where((ch % 2 == 0)[None, :], jnp.sin(ang), jnp.cos(ang))
    return enc.astype(dtype)


def transformer_encoder(x, y, layer_params, n_heads):
    B, S, D = x.shape
    h = x + positional_encoding(S, D, x.dtype)[None]
    for p in layer_params:
        h = encoder_layer(h, y, p, n_heads)
    return h


# ---------------------------------------------------------------------------
# Pure-JAX reference for validation
# ---------------------------------------------------------------------------
def _layernorm_ref(x, gamma, beta, eps=1e-6):
    d = x.shape[-1]
    mean = jnp.mean(x, axis=-1, keepdims=True)
    var = jnp.sum((x - mean) ** 2, axis=-1, keepdims=True) / (d - 1)
    return gamma * (x - mean) / (jnp.sqrt(var) + eps) + beta


def reference_layer(x, y, p, n_heads):
    D = x.shape[-1]
    q, k, v = x @ p['wq'], y @ p['wk'], y @ p['wv']
    dh = D // n_heads
    outs = []
    for h in range(n_heads):
        sl = slice(h * dh, (h + 1) * dh)
        s = (q[..., sl] @ jnp.swapaxes(k[..., sl], 1, 2)) / math.sqrt(D)
        outs.append(jax.nn.softmax(s, axis=-1) @ v[..., sl])
    attn = jnp.concatenate(outs, -1) @ p['wo']
    h1 = _layernorm_ref(x + attn, p['g1'], p['b1'])
    ff = jax.nn.relu(h1 @ p['w1'] + p['c1']) @ p['w2'] + p['c2']
    return _layernorm_ref(h1 + ff, p['g2'], p['b2'])


def reference_encoder(x, y, layer_params, n_heads):
    B, S, D = x.shape
    h = x + positional_encoding(S, D, x.dtype)[None]
    for p in layer_params:
        h = reference_layer(h, y, p, n_heads)
    return h


def make_params(key, d_model, d_hidden):
    ks = jax.random.split(key, 8)
    n = lambda k, shp: (0.1 * jax.random.normal(k, shp)).astype(jnp.float32)
    return {
        'wq': n(ks[0], (d_model, d_model)),
        'wk': n(ks[1], (d_model, d_model)),
        'wv': n(ks[2], (d_model, d_model)),
        'wo': n(ks[3], (d_model, d_model)),
        'g1': jnp.ones((1, d_model), jnp.float32),
        'b1': jnp.zeros((1, d_model), jnp.float32),
        'w1': n(ks[4], (d_model, d_hidden)),
        'c1': n(ks[5], (1, d_hidden)),
        'w2': n(ks[6], (d_hidden, d_model)),
        'c2': n(ks[7], (1, d_model)),
        'g2': jnp.ones((1, d_model), jnp.float32),
        'b2': jnp.zeros((1, d_model), jnp.float32),
    }


if __name__ == "__main__":
    # Small, lane-dense config: d_model=256 (2x128), n_heads=2 -> d_head=128.
    B, S, d_model, d_hidden, n_heads, n_layers = 2, 16, 256, 512, 2, 2
    key = jax.random.PRNGKey(0)
    kx, ky, kp = jax.random.split(key, 3)
    x = jax.random.normal(kx, (B, S, d_model), dtype=jnp.float32)
    y = jax.random.normal(ky, (B, S, d_model), dtype=jnp.float32)
    layer_params = [make_params(k, d_model, d_hidden)
                    for k in jax.random.split(kp, n_layers)]

    out = transformer_encoder(x, y, layer_params, n_heads)
    out = jax.block_until_ready(out)

    ref = reference_encoder(x, y, layer_params, n_heads)
    assert out.shape == (B, S, d_model)
    err = float(jnp.max(jnp.abs(out - ref)))
    # tolerance accounts for the EUP approximate reciprocals (softmax + LN)
    assert jnp.allclose(out, ref, atol=1e-2, rtol=1e-2), f"max abs err {err}"
    print("KERNEL_OK")
</pallas_src>

<mosaic_0001>
module attributes {stable_mosaic.version = 11 : i64} {
  func.func @encoder_layer_kernel(%arg0: i32, %arg1: i32, %arg2: memref<1x16x256xf32, #tpu.memory_space<vmem>>, %arg3: memref<1x16x256xf32, #tpu.memory_space<vmem>>, %arg4: memref<256x256xf32, #tpu.memory_space<vmem>>, %arg5: memref<256x256xf32, #tpu.memory_space<vmem>>, %arg6: memref<256x256xf32, #tpu.memory_space<vmem>>, %arg7: memref<256x256xf32, #tpu.memory_space<vmem>>, %arg8: memref<1x256xf32, #tpu.memory_space<vmem>>, %arg9: memref<1x256xf32, #tpu.memory_space<vmem>>, %arg10: memref<256x512xf32, #tpu.memory_space<vmem>>, %arg11: memref<1x512xf32, #tpu.memory_space<vmem>>, %arg12: memref<512x256xf32, #tpu.memory_space<vmem>>, %arg13: memref<1x256xf32, #tpu.memory_space<vmem>>, %arg14: memref<1x256xf32, #tpu.memory_space<vmem>>, %arg15: memref<1x256xf32, #tpu.memory_space<vmem>>, %arg16: memref<1x16x256xf32, #tpu.memory_space<vmem>>) attributes {dimension_semantics = [#tpu.dimension_semantics<parallel>, #tpu.dimension_semantics<parallel>], iteration_bounds = array<i64: 2, 1>, scalar_prefetch = 0 : i64, scratch_operands = 0 : i64, tpu.core_type = #tpu.core_type<tc>, window_params = [{transform_indices = @transform_0, window_bounds = array<i64: 1, 16, 256>}, {transform_indices = @transform_1, window_bounds = array<i64: 1, 16, 256>}, {pipeline_mode = #tpu.pipeline_mode<synchronous>, transform_indices = @transform_2, window_bounds = array<i64: 256, 256>}, {pipeline_mode = #tpu.pipeline_mode<synchronous>, transform_indices = @transform_3, window_bounds = array<i64: 256, 256>}, {pipeline_mode = #tpu.pipeline_mode<synchronous>, transform_indices = @transform_4, window_bounds = array<i64: 256, 256>}, {pipeline_mode = #tpu.pipeline_mode<synchronous>, transform_indices = @transform_5, window_bounds = array<i64: 256, 256>}, {pipeline_mode = #tpu.pipeline_mode<synchronous>, transform_indices = @transform_6, window_bounds = array<i64: 1, 256>}, {pipeline_mode = #tpu.pipeline_mode<synchronous>, transform_indices = @transform_7, window_bounds = array<i64: 1, 256>}, {pipeline_mode = #tpu.pipeline_mode<synchronous>, transform_indices = @transform_8, window_bounds = array<i64: 256, 512>}, {pipeline_mode = #tpu.pipeline_mode<synchronous>, transform_indices = @transform_9, window_bounds = array<i64: 1, 512>}, {pipeline_mode = #tpu.pipeline_mode<synchronous>, transform_indices = @transform_10, window_bounds = array<i64: 512, 256>}, {pipeline_mode = #tpu.pipeline_mode<synchronous>, transform_indices = @transform_11, window_bounds = array<i64: 1, 256>}, {pipeline_mode = #tpu.pipeline_mode<synchronous>, transform_indices = @transform_12, window_bounds = array<i64: 1, 256>}, {pipeline_mode = #tpu.pipeline_mode<synchronous>, transform_indices = @transform_13, window_bounds = array<i64: 1, 256>}, {transform_indices = @transform_14, window_bounds = array<i64: 1, 16, 256>}]} {
    %c0 = arith.constant 0 : index
    %c0_0 = arith.constant 0 : index
    %c0_1 = arith.constant 0 : index
    %0 = vector.load %arg2[%c0, %c0_0, %c0_1] : memref<1x16x256xf32, #tpu.memory_space<vmem>>, vector<1x16x256xf32>
    %1 = vector.shape_cast %0 : vector<1x16x256xf32> to vector<16x256xf32>
    %c0_2 = arith.constant 0 : index
    %c0_3 = arith.constant 0 : index
    %c0_4 = arith.constant 0 : index
    %2 = vector.load %arg3[%c0_2, %c0_3, %c0_4] : memref<1x16x256xf32, #tpu.memory_space<vmem>>, vector<1x16x256xf32>
    %3 = vector.shape_cast %2 : vector<1x16x256xf32> to vector<16x256xf32>
    %c0_5 = arith.constant 0 : index
    %c0_6 = arith.constant 0 : index
    %4 = vector.load %arg4[%c0_5, %c0_6] : memref<256x256xf32, #tpu.memory_space<vmem>>, vector<256x256xf32>
    %cst = arith.constant dense<0.000000e+00> : vector<16x256xf32>
    %5 = tpu.matmul %1, %4, %cst {dimension_numbers = #tpu.dot_dimension_numbers<[1], [0], [0], [1], [0, 0, 1, 1], [], []>} : vector<16x256xf32>, vector<256x256xf32>, vector<16x256xf32> -> vector<16x256xf32>
    %c0_7 = arith.constant 0 : index
    %c0_8 = arith.constant 0 : index
    %6 = vector.load %arg5[%c0_7, %c0_8] : memref<256x256xf32, #tpu.memory_space<vmem>>, vector<256x256xf32>
    %cst_9 = arith.constant dense<0.000000e+00> : vector<16x256xf32>
    %7 = tpu.matmul %3, %6, %cst_9 {dimension_numbers = #tpu.dot_dimension_numbers<[1], [0], [0], [1], [0, 0, 1, 1], [], []>} : vector<16x256xf32>, vector<256x256xf32>, vector<16x256xf32> -> vector<16x256xf32>
    %c0_10 = arith.constant 0 : index
    %c0_11 = arith.constant 0 : index
    %8 = vector.load %arg6[%c0_10, %c0_11] : memref<256x256xf32, #tpu.memory_space<vmem>>, vector<256x256xf32>
    %cst_12 = arith.constant dense<0.000000e+00> : vector<16x256xf32>
    %9 = tpu.matmul %3, %8, %cst_12 {dimension_numbers = #tpu.dot_dimension_numbers<[1], [0], [0], [1], [0, 0, 1, 1], [], []>} : vector<16x256xf32>, vector<256x256xf32>, vector<16x256xf32> -> vector<16x256xf32>
    %10 = vector.shape_cast %5 : vector<16x256xf32> to vector<16x2x128xf32>
    %11 = tpu.transpose %10, [1, 0, 2] : vector<16x2x128xf32> -> vector<2x16x128xf32>
    %12 = vector.shape_cast %7 : vector<16x256xf32> to vector<16x2x128xf32>
    %13 = tpu.transpose %12, [1, 0, 2] : vector<16x2x128xf32> -> vector<2x16x128xf32>
    %14 = vector.shape_cast %9 : vector<16x256xf32> to vector<16x2x128xf32>
    %15 = tpu.transpose %14, [1, 0, 2] : vector<16x2x128xf32> -> vector<2x16x128xf32>
    "tpu.trace_start"() <{level = 10 : i32, message = "hqd,hkd->hqk"}> : () -> ()
    %cst_13 = arith.constant dense<0.000000e+00> : vector<2x16x16xf32>
    %16 = tpu.matmul %11, %13, %cst_13 {dimension_numbers = #tpu.dot_dimension_numbers<[2], [2], [1], [1], [0, 0, 0, 1, 1, 1], [0], [0]>} : vector<2x16x128xf32>, vector<2x16x128xf32>, vector<2x16x16xf32> -> vector<2x16x16xf32>
    "tpu.trace_stop"() : () -> ()
    %cst_14 = arith.constant 6.250000e-02 : f32
    %17 = vector.broadcast %cst_14 : f32 to vector<2x16x16xf32>
    %18 = arith.mulf %16, %17 : vector<2x16x16xf32>
    %cst_15 = arith.constant dense<0xFF800000> : vector<2x16xf32>
    %19 = vector.multi_reduction <maximumf>, %18, %cst_15 [2] : vector<2x16x16xf32> to vector<2x16xf32>
    %20 = vector.shape_cast %19 : vector<2x16xf32> to vector<2x16x1xf32>
    %21 = vector.broadcast %20 : vector<2x16x1xf32> to vector<2x16x16xf32>
    %22 = arith.subf %18, %21 : vector<2x16x16xf32>
    %23 = math.exp %22 : vector<2x16x16xf32>
    %cst_16 = arith.constant dense<0.000000e+00> : vector<2x16xf32>
    %24 = vector.multi_reduction <add>, %23, %cst_16 [2] : vector<2x16x16xf32> to vector<2x16xf32>
    %25 = vector.shape_cast %24 : vector<2x16xf32> to vector<2x16x1xf32>
    %26 = tpu.reciprocal %25 {approx = true} : vector<2x16x1xf32> -> vector<2x16x1xf32>
    %27 = vector.broadcast %26 : vector<2x16x1xf32> to vector<2x16x16xf32>
    %28 = arith.mulf %23, %27 : vector<2x16x16xf32>
    "tpu.trace_start"() <{level = 10 : i32, message = "hqk,hkd->hqd"}> : () -> ()
    %cst_17 = arith.constant dense<0.000000e+00> : vector<2x16x128xf32>
    %29 = tpu.matmul %28, %15, %cst_17 {dimension_numbers = #tpu.dot_dimension_numbers<[2], [1], [1], [2], [0, 0, 0, 1, 1, 2], [0], [0]>} : vector<2x16x16xf32>, vector<2x16x128xf32>, vector<2x16x128xf32> -> vector<2x16x128xf32>
    "tpu.trace_stop"() : () -> ()
    %30 = tpu.transpose %29, [1, 0, 2] : vector<2x16x128xf32> -> vector<16x2x128xf32>
    %31 = vector.shape_cast %30 : vector<16x2x128xf32> to vector<16x256xf32>
    %c0_18 = arith.constant 0 : index
    %c0_19 = arith.constant 0 : index
    %32 = vector.load %arg7[%c0_18, %c0_19] : memref<256x256xf32, #tpu.memory_space<vmem>>, vector<256x256xf32>
    %cst_20 = arith.constant dense<0.000000e+00> : vector<16x256xf32>
    %33 = tpu.matmul %31, %32, %cst_20 {dimension_numbers = #tpu.dot_dimension_numbers<[1], [0], [0], [1], [0, 0, 1, 1], [], []>} : vector<16x256xf32>, vector<256x256xf32>, vector<16x256xf32> -> vector<16x256xf32>
    %34 = arith.addf %1, %33 : vector<16x256xf32>
    %c0_21 = arith.constant 0 : index
    %c0_22 = arith.constant 0 : index
    %35 = vector.load %arg8[%c0_21, %c0_22] : memref<1x256xf32, #tpu.memory_space<vmem>>, vector<1x256xf32>
    %c0_23 = arith.constant 0 : index
    %c0_24 = arith.constant 0 : index
    %36 = vector.load %arg9[%c0_23, %c0_24] : memref<1x256xf32, #tpu.memory_space<vmem>>, vector<1x256xf32>
    %cst_25 = arith.constant dense<0.000000e+00> : vector<16xf32>
    %37 = vector.multi_reduction <add>, %34, %cst_25 [1] : vector<16x256xf32> to vector<16xf32>
    %38 = vector.shape_cast %37 : vector<16xf32> to vector<16x1xf32>
    %39 = arith.mulf %34, %34 : vector<16x256xf32>
    %cst_26 = arith.constant dense<0.000000e+00> : vector<16xf32>
    %40 = vector.multi_reduction <add>, %39, %cst_26 [1] : vector<16x256xf32> to vector<16xf32>
    %41 = vector.shape_cast %40 : vector<16xf32> to vector<16x1xf32>
    %cst_27 = arith.constant 3.906250e-03 : f32
    %42 = vector.broadcast %cst_27 : f32 to vector<16x1xf32>
    %43 = arith.mulf %38, %42 : vector<16x1xf32>
    %44 = arith.mulf %38, %43 : vector<16x1xf32>
    %45 = arith.subf %41, %44 : vector<16x1xf32>
    %cst_28 = arith.constant 0.00392156886 : f32
    %46 = vector.broadcast %cst_28 : f32 to vector<16x1xf32>
    %47 = arith.mulf %45, %46 : vector<16x1xf32>
    %cst_29 = arith.constant 0.000000e+00 : f32
    %48 = vector.broadcast %cst_29 : f32 to vector<16x1xf32>
    %49 = arith.maximumf %47, %48 : vector<16x1xf32>
    %50 = math.sqrt %49 : vector<16x1xf32>
    %cst_30 = arith.constant 9.99999997E-7 : f32
    %51 = vector.broadcast %cst_30 : f32 to vector<16x1xf32>
    %52 = arith.addf %50, %51 : vector<16x1xf32>
    %53 = tpu.reciprocal %52 {approx = true} : vector<16x1xf32> -> vector<16x1xf32>
    %54 = vector.broadcast %43 : vector<16x1xf32> to vector<16x256xf32>
    %55 = arith.subf %34, %54 : vector<16x256xf32>
    %56 = vector.broadcast %35 : vector<1x256xf32> to vector<16x256xf32>
    %57 = arith.mulf %56, %55 : vector<16x256xf32>
    %58 = vector.broadcast %53 : vector<16x1xf32> to vector<16x256xf32>
    %59 = arith.mulf %57, %58 : vector<16x256xf32>
    %60 = vector.broadcast %36 : vector<1x256xf32> to vector<16x256xf32>
    %61 = arith.addf %59, %60 : vector<16x256xf32>
    %c0_31 = arith.constant 0 : index
    %c0_32 = arith.constant 0 : index
    %62 = vector.load %arg10[%c0_31, %c0_32] : memref<256x512xf32, #tpu.memory_space<vmem>>, vector<256x512xf32>
    %cst_33 = arith.constant dense<0.000000e+00> : vector<16x512xf32>
    %63 = tpu.matmul %61, %62, %cst_33 {dimension_numbers = #tpu.dot_dimension_numbers<[1], [0], [0], [1], [0, 0, 1, 1], [], []>} : vector<16x256xf32>, vector<256x512xf32>, vector<16x512xf32> -> vector<16x512xf32>
    %c0_34 = arith.constant 0 : index
    %c0_35 = arith.constant 0 : index
    %64 = vector.load %arg11[%c0_34, %c0_35] : memref<1x512xf32, #tpu.memory_space<vmem>>, vector<1x512xf32>
    %65 = vector.broadcast %64 : vector<1x512xf32> to vector<16x512xf32>
    %66 = arith.addf %63, %65 : vector<16x512xf32>
    %cst_36 = arith.constant 0.000000e+00 : f32
    %67 = vector.broadcast %cst_36 : f32 to vector<16x512xf32>
    %68 = arith.maximumf %66, %67 : vector<16x512xf32>
    %c0_37 = arith.constant 0 : index
    %c0_38 = arith.constant 0 : index
    %69 = vector.load %arg12[%c0_37, %c0_38] : memref<512x256xf32, #tpu.memory_space<vmem>>, vector<512x256xf32>
    %cst_39 = arith.constant dense<0.000000e+00> : vector<16x256xf32>
    %70 = tpu.matmul %68, %69, %cst_39 {dimension_numbers = #tpu.dot_dimension_numbers<[1], [0], [0], [1], [0, 0, 1, 1], [], []>} : vector<16x512xf32>, vector<512x256xf32>, vector<16x256xf32> -> vector<16x256xf32>
    %c0_40 = arith.constant 0 : index
    %c0_41 = arith.constant 0 : index
    %71 = vector.load %arg13[%c0_40, %c0_41] : memref<1x256xf32, #tpu.memory_space<vmem>>, vector<1x256xf32>
    %72 = vector.broadcast %71 : vector<1x256xf32> to vector<16x256xf32>
    %73 = arith.addf %70, %72 : vector<16x256xf32>
    %74 = arith.addf %61, %73 : vector<16x256xf32>
    %c0_42 = arith.constant 0 : index
    %c0_43 = arith.constant 0 : index
    %75 = vector.load %arg14[%c0_42, %c0_43] : memref<1x256xf32, #tpu.memory_space<vmem>>, vector<1x256xf32>
    %c0_44 = arith.constant 0 : index
    %c0_45 = arith.constant 0 : index
    %76 = vector.load %arg15[%c0_44, %c0_45] : memref<1x256xf32, #tpu.memory_space<vmem>>, vector<1x256xf32>
    %cst_46 = arith.constant dense<0.000000e+00> : vector<16xf32>
    %77 = vector.multi_reduction <add>, %74, %cst_46 [1] : vector<16x256xf32> to vector<16xf32>
    %78 = vector.shape_cast %77 : vector<16xf32> to vector<16x1xf32>
    %79 = arith.mulf %74, %74 : vector<16x256xf32>
    %cst_47 = arith.constant dense<0.000000e+00> : vector<16xf32>
    %80 = vector.multi_reduction <add>, %79, %cst_47 [1] : vector<16x256xf32> to vector<16xf32>
    %81 = vector.shape_cast %80 : vector<16xf32> to vector<16x1xf32>
    %cst_48 = arith.constant 3.906250e-03 : f32
    %82 = vector.broadcast %cst_48 : f32 to vector<16x1xf32>
    %83 = arith.mulf %78, %82 : vector<16x1xf32>
    %84 = arith.mulf %78, %83 : vector<16x1xf32>
    %85 = arith.subf %81, %84 : vector<16x1xf32>
    %cst_49 = arith.constant 0.00392156886 : f32
    %86 = vector.broadcast %cst_49 : f32 to vector<16x1xf32>
    %87 = arith.mulf %85, %86 : vector<16x1xf32>
    %cst_50 = arith.constant 0.000000e+00 : f32
    %88 = vector.broadcast %cst_50 : f32 to vector<16x1xf32>
    %89 = arith.maximumf %87, %88 : vector<16x1xf32>
    %90 = math.sqrt %89 : vector<16x1xf32>
    %cst_51 = arith.constant 9.99999997E-7 : f32
    %91 = vector.broadcast %cst_51 : f32 to vector<16x1xf32>
    %92 = arith.addf %90, %91 : vector<16x1xf32>
    %93 = tpu.reciprocal %92 {approx = true} : vector<16x1xf32> -> vector<16x1xf32>
    %94 = vector.broadcast %83 : vector<16x1xf32> to vector<16x256xf32>
    %95 = arith.subf %74, %94 : vector<16x256xf32>
    %96 = vector.broadcast %75 : vector<1x256xf32> to vector<16x256xf32>
    %97 = arith.mulf %96, %95 : vector<16x256xf32>
    %98 = vector.broadcast %93 : vector<16x1xf32> to vector<16x256xf32>
    %99 = arith.mulf %97, %98 : vector<16x256xf32>
    %100 = vector.broadcast %76 : vector<1x256xf32> to vector<16x256xf32>
    %101 = arith.addf %99, %100 : vector<16x256xf32>
    %c0_52 = arith.constant 0 : index
    %c0_53 = arith.constant 0 : index
    %c0_54 = arith.constant 0 : index
    %102 = vector.load %arg16[%c0_52, %c0_53, %c0_54] : memref<1x16x256xf32, #tpu.memory_space<vmem>>, vector<1x16x256xf32>
    %103 = vector.shape_cast %102 : vector<1x16x256xf32> to vector<16x256xf32>
    %104 = vector.shape_cast %101 : vector<16x256xf32> to vector<1x16x256xf32>
    tpu.vector_store %arg16[%c0_52, %c0_53, %c0_54], %104 {strides = array<i32>} : memref<1x16x256xf32, #tpu.memory_space<vmem>>, vector<1x16x256xf32>,
    return
  }
  func.func @transform_0(%arg0: i32, %arg1: i32) -> (i32, i32, i32) {
    %c0_i32 = arith.constant 0 : i32
    %c0_i32_0 = arith.constant 0 : i32
    return %arg0, %arg1, %c0_i32 : i32, i32, i32
  }
  func.func @transform_1(%arg0: i32, %arg1: i32) -> (i32, i32, i32) {
    %c0_i32 = arith.constant 0 : i32
    %c0_i32_0 = arith.constant 0 : i32
    %c0_i32_1 = arith.constant 0 : i32
    return %arg0, %c0_i32, %c0_i32_0 : i32, i32, i32
  }
  func.func @transform_2(%arg0: i32, %arg1: i32) -> (i32, i32) {
    %c0_i32 = arith.constant 0 : i32
    %c0_i32_0 = arith.constant 0 : i32
    %c0_i32_1 = arith.constant 0 : i32
    return %c0_i32, %c0_i32_0 : i32, i32
  }
  func.func @transform_3(%arg0: i32, %arg1: i32) -> (i32, i32) {
    %c0_i32 = arith.constant 0 : i32
    %c0_i32_0 = arith.constant 0 : i32
    %c0_i32_1 = arith.constant 0 : i32
    return %c0_i32, %c0_i32_0 : i32, i32
  }
  func.func @transform_4(%arg0: i32, %arg1: i32) -> (i32, i32) {
    %c0_i32 = arith.constant 0 : i32
    %c0_i32_0 = arith.constant 0 : i32
    %c0_i32_1 = arith.constant 0 : i32
    return %c0_i32, %c0_i32_0 : i32, i32
  }
  func.func @transform_5(%arg0: i32, %arg1: i32) -> (i32, i32) {
    %c0_i32 = arith.constant 0 : i32
    %c0_i32_0 = arith.constant 0 : i32
    %c0_i32_1 = arith.constant 0 : i32
    return %c0_i32, %c0_i32_0 : i32, i32
  }
  func.func @transform_6(%arg0: i32, %arg1: i32) -> (i32, i32) {
    %c0_i32 = arith.constant 0 : i32
    %c0_i32_0 = arith.constant 0 : i32
    %c0_i32_1 = arith.constant 0 : i32
    return %c0_i32, %c0_i32_0 : i32, i32
  }
  func.func @transform_7(%arg0: i32, %arg1: i32) -> (i32, i32) {
    %c0_i32 = arith.constant 0 : i32
    %c0_i32_0 = arith.constant 0 : i32
    %c0_i32_1 = arith.constant 0 : i32
    return %c0_i32, %c0_i32_0 : i32, i32
  }
  func.func @transform_8(%arg0: i32, %arg1: i32) -> (i32, i32) {
    %c0_i32 = arith.constant 0 : i32
    %c0_i32_0 = arith.constant 0 : i32
    %c0_i32_1 = arith.constant 0 : i32
    return %c0_i32, %c0_i32_0 : i32, i32
  }
  func.func @transform_9(%arg0: i32, %arg1: i32) -> (i32, i32) {
    %c0_i32 = arith.constant 0 : i32
    %c0_i32_0 = arith.constant 0 : i32
    %c0_i32_1 = arith.constant 0 : i32
    return %c0_i32, %c0_i32_0 : i32, i32
  }
  func.func @transform_10(%arg0: i32, %arg1: i32) -> (i32, i32) {
    %c0_i32 = arith.constant 0 : i32
    %c0_i32_0 = arith.constant 0 : i32
    %c0_i32_1 = arith.constant 0 : i32
    return %c0_i32, %c0_i32_0 : i32, i32
  }
  func.func @transform_11(%arg0: i32, %arg1: i32) -> (i32, i32) {
    %c0_i32 = arith.constant 0 : i32
    %c0_i32_0 = arith.constant 0 : i32
    %c0_i32_1 = arith.constant 0 : i32
    return %c0_i32, %c0_i32_0 : i32, i32
  }
  func.func @transform_12(%arg0: i32, %arg1: i32) -> (i32, i32) {
    %c0_i32 = arith.constant 0 : i32
    %c0_i32_0 = arith.constant 0 : i32
    %c0_i32_1 = arith.constant 0 : i32
    return %c0_i32, %c0_i32_0 : i32, i32
  }
  func.func @transform_13(%arg0: i32, %arg1: i32) -> (i32, i32) {
    %c0_i32 = arith.constant 0 : i32
    %c0_i32_0 = arith.constant 0 : i32
    %c0_i32_1 = arith.constant 0 : i32
    return %c0_i32, %c0_i32_0 : i32, i32
  }
  func.func @transform_14(%arg0: i32, %arg1: i32) -> (i32, i32, i32) {
    %c0_i32 = arith.constant 0 : i32
    %c0_i32_0 = arith.constant 0 : i32
    return %arg0, %arg1, %c0_i32 : i32, i32, i32
  }
}

</mosaic_0001>

<bundles_post_ra>
// kernel: tpu_custom_call.1
= control target key start
LH: loop header
LB: loop body
LE: loop exit
PB: predicated region body
PF: predicated region fallthrough
CT: control target
= control target key end

     0   :  { %s5893_s0 = inlined_call_operand.hbm [shape: f32[2,16,256], index: 0, kind: input, shape index: {}]   ;;  %s5894_s1 = inlined_call_operand.hbm [shape: f32[2,16,256], index: 1, kind: input, shape index: {}]   ;;  %s5895_s2 = inlined_call_operand.hbm [shape: f32[256,256], index: 2, kind: input, shape index: {}]   ;;  %s5896_s3 = inlined_call_operand.hbm [shape: f32[256,256], index: 3, kind: input, shape index: {}]   ;;  %s5897_s4 = inlined_call_operand.hbm [shape: f32[256,256], index: 4, kind: input, shape index: {}]   ;;  %s5898_s5 = inlined_call_operand.hbm [shape: f32[256,256], index: 5, kind: input, shape index: {}]   ;;  %s5899_s6 = inlined_call_operand.hbm [shape: f32[1,256], index: 6, kind: input, shape index: {}]   ;;  %s5900_s7 = inlined_call_operand.hbm [shape: f32[1,256], index: 7, kind: input, shape index: {}]   ;;  %s5901_s8 = inlined_call_operand.hbm [shape: f32[256,512], index: 8, kind: input, shape index: {}]   ;;  %s5902_s9 = inlined_call_operand.hbm [shape: f32[1,512], index: 9, kind: input, shape index: {}]   ;;  %s5903_s10 = inlined_call_operand.hbm [shape: f32[512,256], index: 10, kind: input, shape index: {}]   ;;  %s5904_s11 = inlined_call_operand.hbm [shape: f32[1,256], index: 11, kind: input, shape index: {}]   ;;  %s5905_s12 = inlined_call_operand.hbm [shape: f32[1,256], index: 12, kind: input, shape index: {}]   ;;  %s5906_s13 = inlined_call_operand.hbm [shape: f32[1,256], index: 13, kind: input, shape index: {}]   ;;  %s5907_s14 = inlined_call_operand.hbm [shape: f32[2,16,256], index: 14, kind: output, shape index: {}]  }
   0x1   :  { %5923 = sst [smem:[#allocation41_spill]] %s5893_s0 }
   0x2   :  { %5924 = sst [smem:[#allocation42_spill]] %s5894_s1 }
   0x3   :  { %5925 = sst [smem:[#allocation43_spill]] %s5895_s2 }
   0x4   :  { %5926 = sst [smem:[#allocation44_spill]] %s5896_s3 }
   0x5   :  { %5927 = sst [smem:[#allocation45_spill]] %s5897_s4 }
   0x6   :  { %5928 = sst [smem:[#allocation46_spill]] %s5898_s5 }
   0x7   :  { %5929 = sst [smem:[#allocation47_spill]] %s5899_s6 }
   0x8   :  { %5930 = sst [smem:[#allocation48_spill]] %s5900_s7 }
   0x9   :  { %5931 = sst [smem:[#allocation49_spill]] %s5901_s8 }
   0xa   :  { %5932 = sst [smem:[#allocation50_spill]] %s5902_s9 }
   0xb   :  { %5933 = sst [smem:[#allocation51_spill]] %s5903_s10 }
   0xc   :  { %5934 = sst [smem:[#allocation52_spill]] %s5907_s14 }
   0xd   :  { %19 = vsyncpa [#allocation3], 0 }
   0xe   :  { %21 = vsyncpa [#allocation3 + $0x1], 0 }
   0xf   :  { %22 = vsyncpa [#allocation6], 0 }
  0x10   :  { %24 = vsyncpa [#allocation6 + $0x1], 0 }
  0x11   :  { %25 = vsyncpa [#allocation9], 0 }
  0x12   :  { %26 = vsyncpa [#allocation12], 0 }
  0x13   :  { %27 = vsyncpa [#allocation15], 0 }
  0x14   :  { %28 = vsyncpa [#allocation18], 0 }
  0x15   :  { %29 = vsyncpa [#allocation21], 0 }
  0x16   :  { %30 = vsyncpa [#allocation24], 0 }
  0x17   :  { %31 = vsyncpa [#allocation4], 0 }
  0x18   :  { %33 = vsyncpa [#allocation4 + $0x1], 0  ;;  %s5087_s29 = smov 0   ;;  %s5089_s30 = smov 0  }
  0x19   :  { %s5091_s15 = smov 0   ;;  %s5093_s16 = smov 0  }
  0x1a   :  { %s5095_s17 = smov 0   ;;  %s5097_s18 = smov 0  }
  0x1b LB: > { %5935 = sst [smem:[#allocation36_spill]] %s4966_s29  ;;  %s5118_s19 = sadd.s32 4294967295, %s4986_s18   ;;  %s4986_s18 = sphi %s5097_s18, %s39_s18   ;;  %s4982_s17 = sphi %s5095_s17, %s5994_s17   ;;  %s4978_s16 = sphi %s5093_s16, %s5993_s16   ;;  %s4974_s15 = sphi %s5091_s15, %s5992_s15   ;;  %s4970_s30 = sphi %s5089_s30, %s5991_s30   ;;  %s4966_s29 = sphi %s5087_s29, %s5990_s29  }
  0x1c   : > { %5936 = sst [smem:[#allocation37_spill]] %s4970_s30  ;;  %p3599_p0 = scmp.ge.s32.totalorder %s4986_s18, 1 }
  0x1d   : > { %5937 = sst [smem:[#allocation38_spill]] %s4978_s16  ;;  %p5916_p1 = scmp.eq.s32.totalorder %s5118_s19, 0 }
  0x1e   : > { %5938 = sst [smem:[#allocation39_spill]] %s5118_s19  ;;  %p390_p2 = scmp.lt.s32.totalorder %s4986_s18, 3 }
  0x1f   : > { %s4988_s21 = smov [#allocation7]   ;;  %s4989_s24 = smov [#allocation8]  }
  0x20   : > { %p5123_p3 = pnand %p3599_p0, %p390_p2  ;;  %s402_s22 = sshll.u32 %s4988_s21, 4  ;;  %s5127_s22 = int_to_ptr.vmem [resolvable:$true] %s402_s22 }
  0x21   : > { %s415_s25 = sshll.u32 %s4989_s24, 4  ;;  %s4990_s26 = smov [#allocation11]   ;;  %s5138_s25 = int_to_ptr.vmem [resolvable:$true] %s415_s25 }
  0x22   : > { %s5939_s20 = scalar_select %p5123_p3, 1, 0 }
  0x23   : > { %p4297_p4 = pneg %p5123_p3  ;;  %s5140_s27 = sshll.u32 %s4990_s26, 4  ;;  %s442_s27 = int_to_ptr.vmem [resolvable:$true] %s5140_s27 }
  0x24   : > { %5940 = sst [smem:[#allocation40_spill]] %s5939_s20  ;;  %s5942_s2 = sld [smem:[#allocation43_spill]] }
  0x25   : > { %p5134_p6 = pnand %p4297_p4, %p5916_p1 }
  0x27   : > { %p5150_p8 = pneg %p5134_p6 }
  0x2a   : > { %s4476_s14 = scalar_lea.hbm %s5942_s2, 8192 }
  0x2b   : > { %p4477_p7 = scmp.ne.s32.totalorder %s5942_s2, %s4476_s14  ;;  %p4483_p11 = scmp.lt.u32.totalorder %s4476_s14, %s5942_s2 }
  0x2d   : > { %p4479_p9 = pnand %p5150_p8, %p4477_p7 }
  0x2f   : > { %p4480_p10 = pneg %p4479_p9 }
  0x31   : > { %p4485_p12 = pnand %p4483_p11, %p4480_p10 }
  0x33   : > { %4488 = shalt.err (!%p4485_p12)
}
  0x34   : > { %s4489_s16 = scalar_lea.vmem %s5127_s22, 8192  ;;  %p4497_p4 = scmp.lt.s32.totalorder %s5127_s22, %s5127_s22 }
  0x35   : > { %p4490_p13 = scmp.ne.s32.totalorder %s5127_s22, %s4489_s16  ;;  %p4498_p5 = scmp.lt.s32.totalorder %s4489_s16, %s4489_s16 }
  0x37   : > { %p4492_p0 = pnand %p4490_p13, %p5150_p8  ;;  %p4499_p7 = por %p4498_p5, %p4497_p4 }
  0x39   : > { %p4493_p2 = pneg %p4492_p0 }
  0x3b   : > { %p4500_p9 = pnand %p4499_p7, %p4493_p2 }
  0x3d   : > { %4503 = shalt.err (!%p4500_p9)
}
  0x3e   : > { %s5918_s20 = smov 256   ;;  %s5920_s14 = smov 16  }
  0x3f   : > { %4300 = dma.hbm_to_vmem [thread:$0]  (!%p5134_p6), %s5942_s2, 8192, %s5127_s22, [#allocation6], %s5918_s20, %s5918_s20, %s5920_s14  }
  0x40   : > { %s5944_s3 = sld [smem:[#allocation44_spill]] }
  0x46   : > { %s4504_s16 = scalar_lea.hbm %s5944_s3, 8192 }
  0x47   : > { %p4505_p5 = scmp.ne.s32.totalorder %s5944_s3, %s4504_s16  ;;  %p4511_p12 = scmp.lt.u32.totalorder %s4504_s16, %s5944_s3 }
  0x49   : > { %p4507_p10 = pnand %p4505_p5, %p5150_p8 }
  0x4b   : > { %p4508_p11 = pneg %p4507_p10 }
  0x4d   : > { %p4513_p13 = pnand %p4511_p12, %p4508_p11 }
  0x4f   : > { %4516 = shalt.err (!%p4513_p13)
}
  0x50   : > { %s4517_s22 = scalar_lea.vmem %s5138_s25, 8192  ;;  %p4525_p7 = scmp.lt.s32.totalorder %s5138_s25, %s5138_s25 }
  0x51   : > { %p4518_p0 = scmp.ne.s32.totalorder %s5138_s25, %s4517_s22  ;;  %p4526_p9 = scmp.lt.s32.totalorder %s4517_s22, %s4517_s22 }
  0x53   : > { %p4520_p2 = pnand %p4518_p0, %p5150_p8  ;;  %p4527_p5 = por %p4526_p9, %p4525_p7 }
  0x55   : > { %p4521_p4 = pneg %p4520_p2 }
  0x57   : > { %p4528_p10 = pnand %p4527_p5, %p4521_p4 }
  0x59   : > { %4531 = shalt.err (!%p4528_p10)
}
  0x5a   : > { %4303 = dma.hbm_to_vmem [thread:$0]  (!%p5134_p6), %s5944_s3, 8192, %s5138_s25, [#allocation9], %s5918_s20, %s5918_s20, %s5920_s14  }
  0x5b   : > { %s5945_s5 = sld [smem:[#allocation46_spill]] }
  0x61   : > { %s4532_s28 = scalar_lea.hbm %s5945_s5, 8192 }
  0x62   : > { %p4533_p11 = scmp.ne.s32.totalorder %s5945_s5, %s4532_s28  ;;  %p4539_p0 = scmp.lt.u32.totalorder %s4532_s28, %s5945_s5 }
  0x64   : > { %p4535_p12 = pnand %p4533_p11, %p5150_p8 }
  0x66   : > { %p4536_p13 = pneg %p4535_p12 }
  0x68   : > { %p4541_p2 = pnand %p4539_p0, %p4536_p13 }
  0x6a   : > { %4544 = shalt.err (!%p4541_p2)
}
  0x6b   : > { %s4545_s22 = scalar_lea.vmem %s442_s27, 8192  ;;  %p4553_p5 = scmp.lt.s32.totalorder %s442_s27, %s442_s27 }
  0x6c   : > { %p4546_p4 = scmp.ne.s32.totalorder %s442_s27, %s4545_s22  ;;  %p4554_p10 = scmp.lt.s32.totalorder %s4545_s22, %s4545_s22 }
  0x6e   : > { %p4548_p7 = pnand %p4546_p4, %p5150_p8  ;;  %p4555_p1 = por %p4554_p10, %p4553_p5 }
  0x70   : > { %p4549_p9 = pneg %p4548_p7 }
  0x72   : > { %p4556_p3 = pnand %p4555_p1, %p4549_p9 }
  0x74   : > { %4559 = shalt.err (!%p4556_p3)
}
  0x75   : > { %4309 = dma.hbm_to_vmem [thread:$0]  (!%p5134_p6), %s5945_s5, 8192, %s442_s27, [#allocation12], %s5918_s20, %s5918_s20, %s5920_s14  }
  0x76   : > { %s4993_s29 = smov [#allocation14]   ;;  %s4994_s19 = smov [#allocation17]  }
  0x77   : > { %s466_s30 = sshll.u32 %s4993_s29, 4  ;;  %s490_s28 = sshll.u32 %s4994_s19, 4  ;;  %s467_s30 = int_to_ptr.vmem [resolvable:$true] %s466_s30  ;;  %s491_s28 = int_to_ptr.vmem [resolvable:$true] %s490_s28 }
  0x78   : > { %s5946_s7 = sld [smem:[#allocation48_spill]] }
  0x7e   : > { %s4560_s26 = scalar_lea.hbm %s5946_s7, 32 }
  0x7f   : > { %p4561_p1 = scmp.ne.s32.totalorder %s5946_s7, %s4560_s26  ;;  %p4567_p12 = scmp.lt.u32.totalorder %s4560_s26, %s5946_s7 }
  0x81   : > { %p4563_p3 = pnand %p4561_p1, %p5150_p8 }
  0x83   : > { %p4564_p11 = pneg %p4563_p3 }
  0x85   : > { %p4569_p13 = pnand %p4567_p12, %p4564_p11 }
  0x87   : > { %4572 = shalt.err (!%p4569_p13)
}
  0x88   : > { %s4573_s27 = scalar_lea.vmem %s467_s30, 32  ;;  %p4581_p7 = scmp.lt.s32.totalorder %s467_s30, %s467_s30 }
  0x89   : > { %p4574_p0 = scmp.ne.s32.totalorder %s467_s30, %s4573_s27  ;;  %p4582_p9 = scmp.lt.s32.totalorder %s4573_s27, %s4573_s27 }
  0x8b   : > { %p4576_p2 = pnand %p4574_p0, %p5150_p8  ;;  %p4583_p5 = por %p4582_p9, %p4581_p7 }
  0x8d   : > { %p4577_p4 = pneg %p4576_p2 }
  0x8f   : > { %p4584_p10 = pnand %p4583_p5, %p4577_p4 }
  0x91   : > { %4587 = shalt.err (!%p4584_p10)
}
  0x92   : > { %4315 = dma.hbm_to_vmem [thread:$0]  (!%p5134_p6), %s5946_s7, 32, %s467_s30, [#allocation15]  }
  0x93   : > { %s5947_s9 = sld [smem:[#allocation50_spill]] }
  0x99   : > { %s4588_s21 = scalar_lea.hbm %s5947_s9, 64 }
  0x9a   : > { %p4589_p1 = scmp.ne.s32.totalorder %s5947_s9, %s4588_s21  ;;  %p4595_p12 = scmp.lt.u32.totalorder %s4588_s21, %s5947_s9 }
  0x9c   : > { %p4591_p3 = pnand %p4589_p1, %p5150_p8 }
  0x9e   : > { %p4592_p11 = pneg %p4591_p3 }
  0xa0   : > { %p4597_p13 = pnand %p4595_p12, %p4592_p11 }
  0xa2   : > { %4600 = shalt.err (!%p4597_p13)
}
  0xa3   : > { %s4601_s25 = scalar_lea.vmem %s491_s28, 64  ;;  %p4609_p7 = scmp.lt.s32.totalorder %s491_s28, %s491_s28 }
  0xa4   : > { %p4602_p0 = scmp.ne.s32.totalorder %s491_s28, %s4601_s25  ;;  %p4610_p9 = scmp.lt.s32.totalorder %s4601_s25, %s4601_s25 }
  0xa6   : > { %p4604_p2 = pnand %p4602_p0, %p5150_p8  ;;  %p4611_p5 = por %p4610_p9, %p4609_p7 }
  0xa8   : > { %p4605_p4 = pneg %p4604_p2 }
  0xaa   : > { %p4612_p10 = pnand %p4611_p5, %p4605_p4 }
  0xac   : > { %4615 = shalt.err (!%p4612_p10)
}
  0xad   : > { %4321 = dma.hbm_to_vmem [thread:$0]  (!%p5134_p6), %s5947_s9, 64, %s491_s28, [#allocation18]  }
  0xae   : > { %s4995_s0 = smov [#allocation20]   ;;  %s4996_s2 = smov [#allocation10]  }
  0xaf   : > { %s514_s29 = sshll.u32 %s4995_s0, 4  ;;  %s428_s19 = sshll.u32 %s4996_s2, 4  ;;  %s515_s29 = int_to_ptr.vmem [resolvable:$true] %s514_s29  ;;  %s429_s19 = int_to_ptr.vmem [resolvable:$true] %s428_s19 }
  0xb0   : > { %s4616_s26 = scalar_lea.hbm %s5904_s11, 32 }
  0xb1   : > { %p4617_p1 = scmp.ne.s32.totalorder %s5904_s11, %s4616_s26  ;;  %p4623_p12 = scmp.lt.u32.totalorder %s4616_s26, %s5904_s11 }
  0xb3   : > { %p4619_p3 = pnand %p4617_p1, %p5150_p8 }
  0xb5   : > { %p4620_p11 = pneg %p4619_p3 }
  0xb7   : > { %p4625_p13 = pnand %p4623_p12, %p4620_p11 }
  0xb9   : > { %4628 = shalt.err (!%p4625_p13)
}
  0xba   : > { %s4629_s28 = scalar_lea.vmem %s515_s29, 32  ;;  %p4637_p7 = scmp.lt.s32.totalorder %s515_s29, %s515_s29 }
  0xbb   : > { %p4630_p0 = scmp.ne.s32.totalorder %s515_s29, %s4629_s28  ;;  %p4638_p9 = scmp.lt.s32.totalorder %s4629_s28, %s4629_s28 }
  0xbd   : > { %p4632_p2 = pnand %p4630_p0, %p5150_p8  ;;  %p4639_p5 = por %p4638_p9, %p4637_p7 }
  0xbf   : > { %p4633_p4 = pneg %p4632_p2 }
  0xc1   : > { %p4640_p10 = pnand %p4639_p5, %p4633_p4 }
  0xc3   : > { %4643 = shalt.err (!%p4640_p10)
}
  0xc4   : > { %4327 = dma.hbm_to_vmem [thread:$0]  (!%p5134_p6), %s5904_s11, 32, %s515_s29, [#allocation21]  }
  0xc5   : > { %s5948_s4 = sld [smem:[#allocation45_spill]] }
  0xcb   : > { %s4644_s24 = scalar_lea.hbm %s5948_s4, 8192 }
  0xcc   : > { %p4645_p1 = scmp.ne.s32.totalorder %s5948_s4, %s4644_s24  ;;  %p4651_p12 = scmp.lt.u32.totalorder %s4644_s24, %s5948_s4 }
  0xce   : > { %p4647_p3 = pnand %p4645_p1, %p5150_p8 }
  0xd0   : > { %p4648_p11 = pneg %p4647_p3 }
  0xd2   : > { %p4653_p13 = pnand %p4651_p12, %p4648_p11 }
  0xd4   : > { %4656 = shalt.err (!%p4653_p13)
}
  0xd5   : > { %s4657_s30 = scalar_lea.vmem %s429_s19, 8192  ;;  %p4665_p7 = scmp.lt.s32.totalorder %s429_s19, %s429_s19 }
  0xd6   : > { %p4658_p0 = scmp.ne.s32.totalorder %s429_s19, %s4657_s30  ;;  %p4666_p9 = scmp.lt.s32.totalorder %s4657_s30, %s4657_s30 }
  0xd8   : > { %p4660_p2 = pnand %p4658_p0, %p5150_p8  ;;  %p4667_p5 = por %p4666_p9, %p4665_p7 }
  0xda   : > { %p4661_p4 = pneg %p4660_p2 }
  0xdc   : > { %p4668_p10 = pnand %p4667_p5, %p4661_p4 }
  0xde   : > { %4671 = shalt.err (!%p4668_p10)
}
  0xdf   : > { %4306 = dma.hbm_to_vmem [thread:$0]  (!%p5134_p6), %s5948_s4, 8192, %s429_s19, [#allocation9], %s5918_s20, %s5918_s20, %s5920_s14  }
  0xe0   : > { %s4997_s27 = smov [#allocation13]   ;;  %s4998_s2 = smov [#allocation16]  }
  0xe1   : > { %s455_s0 = sshll.u32 %s4997_s27, 4  ;;  %s476_s21 = sshll.u32 %s4998_s2, 4  ;;  %s456_s0 = int_to_ptr.vmem [resolvable:$true] %s455_s0  ;;  %s477_s21 = int_to_ptr.vmem [resolvable:$true] %s476_s21 }
  0xe2   : > { %s5949_s6 = sld [smem:[#allocation47_spill]] }
  0xe8   : > { %s4672_s16 = scalar_lea.hbm %s5949_s6, 32 }
  0xe9   : > { %p4673_p1 = scmp.ne.s32.totalorder %s5949_s6, %s4672_s16  ;;  %p4679_p12 = scmp.lt.u32.totalorder %s4672_s16, %s5949_s6 }
  0xeb   : > { %p4675_p3 = pnand %p4673_p1, %p5150_p8 }
  0xed   : > { %p4676_p11 = pneg %p4675_p3 }
  0xef   : > { %p4681_p13 = pnand %p4679_p12, %p4676_p11 }
  0xf1   : > { %4684 = shalt.err (!%p4681_p13)
}
  0xf2   : > { %s4685_s19 = scalar_lea.vmem %s456_s0, 32  ;;  %p4693_p7 = scmp.lt.s32.totalorder %s456_s0, %s456_s0 }
  0xf3   : > { %p4686_p0 = scmp.ne.s32.totalorder %s456_s0, %s4685_s19  ;;  %p4694_p9 = scmp.lt.s32.totalorder %s4685_s19, %s4685_s19 }
  0xf5   : > { %p4688_p2 = pnand %p4686_p0, %p5150_p8  ;;  %p4695_p5 = por %p4694_p9, %p4693_p7 }
  0xf7   : > { %p4689_p4 = pneg %p4688_p2 }
  0xf9   : > { %p4696_p10 = pnand %p4695_p5, %p4689_p4 }
  0xfb   : > { %4699 = shalt.err (!%p4696_p10)
}
  0xfc   : > { %4312 = dma.hbm_to_vmem [thread:$0]  (!%p5134_p6), %s5949_s6, 32, %s456_s0, [#allocation12]  }
  0xfd   : > { %s5950_s8 = sld [smem:[#allocation49_spill]] }
 0x103   : > { %s4700_s26 = scalar_lea.hbm %s5950_s8, 16384 }
 0x104   : > { %p4701_p1 = scmp.ne.s32.totalorder %s5950_s8, %s4700_s26  ;;  %p4707_p12 = scmp.lt.u32.totalorder %s4700_s26, %s5950_s8 }
 0x106   : > { %p4703_p3 = pnand %p4701_p1, %p5150_p8 }
 0x108   : > { %p4704_p11 = pneg %p4703_p3 }
 0x10a   : > { %p4709_p13 = pnand %p4707_p12, %p4704_p11 }
 0x10c   : > { %4712 = shalt.err (!%p4709_p13)
}
 0x10d   : > { %s4713_s29 = scalar_lea.vmem %s477_s21, 16384  ;;  %p4721_p7 = scmp.lt.s32.totalorder %s477_s21, %s477_s21 }
 0x10e   : > { %p4714_p0 = scmp.ne.s32.totalorder %s477_s21, %s4713_s29  ;;  %p4722_p9 = scmp.lt.s32.totalorder %s4713_s29, %s4713_s29 }
 0x110   : > { %p4716_p2 = pnand %p4714_p0, %p5150_p8  ;;  %p4723_p5 = por %p4722_p9, %p4721_p7 }
 0x112   : > { %p4717_p4 = pneg %p4716_p2 }
 0x114   : > { %p4724_p10 = pnand %p4723_p5, %p4717_p4 }
 0x116   : > { %4727 = shalt.err (!%p4724_p10)
}
 0x117   : > { %s4999_s0 = smov 512   ;;  %s5000_s19 = smov 32  }
 0x118   : > { %4318 = dma.hbm_to_vmem [thread:$0]  (!%p5134_p6), %s5950_s8, 16384, %s477_s21, [#allocation15], %s4999_s0, %s4999_s0, %s5000_s19  }
 0x119   : > { %s5001_s2 = smov [#allocation19]   ;;  %s5002_s26 = smov [#allocation22]  }
 0x11a   : > { %s500_s24 = sshll.u32 %s5001_s2, 4  ;;  %s525_s16 = sshll.u32 %s5002_s26, 4  ;;  %s501_s24 = int_to_ptr.vmem [resolvable:$true] %s500_s24  ;;  %s526_s16 = int_to_ptr.vmem [resolvable:$true] %s525_s16 }
 0x11b   : > { %s5951_s10 = sld [smem:[#allocation51_spill]] }
 0x121   : > { %s4728_s30 = scalar_lea.hbm %s5951_s10, 16384 }
 0x122   : > { %p4729_p1 = scmp.ne.s32.totalorder %s5951_s10, %s4728_s30  ;;  %p4735_p12 = scmp.lt.u32.totalorder %s4728_s30, %s5951_s10 }
 0x124   : > { %p4731_p3 = pnand %p4729_p1, %p5150_p8 }
 0x126   : > { %p4732_p11 = pneg %p4731_p3 }
 0x128   : > { %p4737_p13 = pnand %p4735_p12, %p4732_p11 }
 0x12a   : > { %4740 = shalt.err (!%p4737_p13)
}
 0x12b   : > { %s4741_s21 = scalar_lea.vmem %s501_s24, 16384  ;;  %p4749_p7 = scmp.lt.s32.totalorder %s501_s24, %s501_s24 }
 0x12c   : > { %p4742_p0 = scmp.ne.s32.totalorder %s501_s24, %s4741_s21  ;;  %p4750_p9 = scmp.lt.s32.totalorder %s4741_s21, %s4741_s21 }
 0x12e   : > { %p4744_p2 = pnand %p4742_p0, %p5150_p8  ;;  %p4751_p5 = por %p4750_p9, %p4749_p7 }
 0x130   : > { %p4745_p4 = pneg %p4744_p2 }
 0x132   : > { %p4752_p10 = pnand %p4751_p5, %p4745_p4 }
 0x134   : > { %4755 = shalt.err (!%p4752_p10)
}
 0x135   : > { %s5952_s20 = smov 16   ;;  %s5953_s0 = smov 256  }
 0x136   : > { %4324 = dma.hbm_to_vmem [thread:$0]  (!%p5134_p6), %s5951_s10, 16384, %s501_s24, [#allocation18], %s5953_s0, %s5953_s0, %s5952_s20  }
 0x137   : > { %s4756_s27 = scalar_lea.hbm %s5905_s12, 32 }
 0x138   : > { %p4757_p1 = scmp.ne.s32.totalorder %s5905_s12, %s4756_s27  ;;  %p4763_p12 = scmp.lt.u32.totalorder %s4756_s27, %s5905_s12 }
 0x13a   : > { %p4759_p3 = pnand %p4757_p1, %p5150_p8 }
 0x13c   : > { %p4760_p11 = pneg %p4759_p3 }
 0x13e   : > { %p4765_p13 = pnand %p4763_p12, %p4760_p11 }
 0x140   : > { %4768 = shalt.err (!%p4765_p13)
}
 0x141   : > { %s4769_s30 = scalar_lea.vmem %s526_s16, 32  ;;  %p4777_p7 = scmp.lt.s32.totalorder %s526_s16, %s526_s16 }
 0x142   : > { %p4770_p0 = scmp.ne.s32.totalorder %s526_s16, %s4769_s30  ;;  %p4778_p9 = scmp.lt.s32.totalorder %s4769_s30, %s4769_s30 }
 0x144   : > { %p4772_p2 = pnand %p4770_p0, %p5150_p8  ;;  %p4779_p5 = por %p4778_p9, %p4777_p7 }
 0x146   : > { %p4773_p4 = pneg %p4772_p2 }
 0x148   : > { %p4780_p10 = pnand %p4779_p5, %p4773_p4 }
 0x14a   : > { %4783 = shalt.err (!%p4780_p10)
}
 0x14b   : > { %4330 = dma.hbm_to_vmem [thread:$0]  (!%p5134_p6), %s5905_s12, 32, %s526_s16, [#allocation21]  }
 0x14c   : > { %s5003_s21 = smov [#allocation23]   ;;  %s4784_s28 = scalar_lea.hbm %s5906_s13, 32 }
 0x14d   : > { %s536_s3 = sshll.u32 %s5003_s21, 4  ;;  %p4785_p1 = scmp.ne.s32.totalorder %s5906_s13, %s4784_s28  ;;  %s537_s3 = int_to_ptr.vmem [resolvable:$true] %s536_s3 }
 0x14e   : > { %p4791_p12 = scmp.lt.u32.totalorder %s4784_s28, %s5906_s13 }
 0x14f   : > { %p4787_p3 = pnand %p4785_p1, %p5150_p8 }
 0x151   : > { %p4788_p11 = pneg %p4787_p3 }
 0x153   : > { %p4793_p13 = pnand %p4791_p12, %p4788_p11 }
 0x155   : > { %4796 = shalt.err (!%p4793_p13)
}
 0x156   : > { %s4797_s16 = scalar_lea.vmem %s537_s3, 32  ;;  %p4805_p7 = scmp.lt.s32.totalorder %s537_s3, %s537_s3 }
 0x157   : > { %p4798_p0 = scmp.ne.s32.totalorder %s537_s3, %s4797_s16  ;;  %p4806_p9 = scmp.lt.s32.totalorder %s4797_s16, %s4797_s16 }
 0x159   : > { %p4800_p2 = pnand %p4798_p0, %p5150_p8  ;;  %p4807_p5 = por %p4806_p9, %p4805_p7 }
 0x15b   : > { %p4801_p4 = pneg %p4800_p2 }
 0x15d   : > { %p4808_p10 = pnand %p4807_p5, %p4801_p4 }
 0x15f   : > { %4811 = shalt.err (!%p4808_p10)
}
 0x160   : > { %s5954_s24 = sld [smem:[#allocation37_spill]]  ;;  %s5955_s29 = sld [smem:[#allocation36_spill]] }
 0x161   : > { %s5956_s1 = sld [smem:[#allocation39_spill]]  ;;  %s3598_s21 = sadd.s32 4294967294, %s4986_s18  }
 0x162   : > { %4333 = dma.hbm_to_vmem [thread:$0]  (!%p5134_p6), %s5906_s13, 32, %s537_s3, [#allocation24]  }
 0x163   : > { %s51_s14 = sadd.s32 1, %s4982_s17  ;;  %s60_s23 = sadd.s32 1, %s4974_s15 }
 0x164   : > { %p53_p8 = scmp.ge.s32.totalorder %s51_s14, 2  ;;  %p68_p3 = scmp.eq.s32.totalorder %s4986_s18, 0 }
 0x165   : > { %p383_p7 = scmp.eq.s32.totalorder %s3598_s21, 1  ;;  %p4357_p5 = scmp.lt.s32.totalorder %s4986_s18, 2 }
 0x166   : > { %p67_p1 = scmp.ne.s32.totalorder %s4974_s15, %s5954_s24  ;;  %s5996_s14 = smov (%p53_p8, %s51_s14), 0 }
 0x167   : > { %p73_p12 = scmp.ne.s32.totalorder %s5954_s24, %s5955_s29  ;;  %s55_s3 = ssub.s32 %s4982_s17, %s5996_s14 }
 0x168   : > { %p5398_p11 = por %p68_p3, %p67_p1  ;;  %p377_p6 = scmp.eq.s32.totalorder %s5956_s1, 1 }
 0x169   : > { %p58_p13 = scmp.eq.s32.totalorder %s55_s3, 0  ;;  %p5958_p0 = scmp.eq.s32.totalorder %s5956_s1, 0 }
 0x16a   : > { %p5413_p4 = por %p377_p6, %p67_p1  ;;  %p5420_p9 = por %p383_p7, %p73_p12 }
 0x16b   : > { %p5409_p2 = por %p5958_p0, %p73_p12  ;;  %s547_s22 = sand.u32 1, %s4974_s15  }
 0x16c   : > { %s5960_s27 = scalar_select %p5413_p4, 1, 0 }
 0x16d   : > { %s5418_s2 = scalar_select %p58_p13, %s4974_s15, %s60_s23  }
 0x16e   : > { %s5961_s26 = scalar_select %p5420_p9, 1, 0 }
 0x16f   : > { %s3660_s16 = sshll.u32 %s4982_s17, 9  ;;  %s5427_s25 = sshll.u32 %s547_s22, 5 }
 0x170   : > { %s5962_s29 = sld [smem:[#allocation41_spill]]  ;;  %s551_s21 = scalar_lea.vmem [#allocation2], %s5427_s25 }
 0x171   : > { %s561_s23 = sshll.u32 %s551_s21, 4  ;;  %p5437_p10 = pnand %p4357_p5, %p5398_p11  ;;  %s5441_s23 = int_to_ptr.vmem [resolvable:$true] %s561_s23 }
 0x172   : > { %s5965_s24 = sld [smem:[#allocation42_spill]]  ;;  %s5448_s6 = scalar_lea.sflag [#allocation3], %s547_s22 }
 0x173   : > { %p4814_p1 = pneg %p5437_p10 }
 0x176   : > { %s5963_s1 = smov %s5962_s29  ;;  %s5432_s3 = scalar_lea.hbm %s5962_s29, %s3660_s16 }
 0x177   : > { %s4812_s7 = scalar_lea.hbm %s5432_s3, 512  ;;  %s4817_s8 = scalar_lea.hbm %s5963_s1, 1024 }
 0x178   : > { %s5446_s29 = scalar_lea.hbm %s5965_s24, %s3660_s16  ;;  %p4813_p8 = scmp.ne.s32.totalorder %s5432_s3, %s4812_s7 }
 0x179   : > { %p4818_p12 = scmp.lt.u32.totalorder %s5432_s3, %s5963_s1  ;;  %p4819_p6 = scmp.lt.u32.totalorder %s4817_s8, %s4812_s7 }
 0x17a   : > { %p4815_p3 = pnand %p4814_p1, %p4813_p8  ;;  %p4821_p0 = scmp.lt.u32.totalorder %s4812_s7, %s5432_s3 }
 0x17b   : > { %p4820_p13 = por %p4819_p6, %p4818_p12 }
 0x17c   : > { %p4816_p11 = pneg %p4815_p3 }
 0x17d   : > { %p4822_p7 = por %p4821_p0, %p4820_p13 }
 0x17f   : > { %p4823_p5 = pnand %p4822_p7, %p4816_p11 }
 0x181   : > { %4826 = shalt.err (!%p4823_p5)
}
 0x182   : > { %s4827_s5 = scalar_lea.vmem %s5441_s23, 512  ;;  %s5004_s22 = smov [#allocation2]  }
 0x183   : > { %p4828_p8 = scmp.ne.s32.totalorder %s5441_s23, %s4827_s5  ;;  %s4832_s16 = sshll.u32 %s5004_s22, 4  ;;  %s4833_s16 = int_to_ptr.vmem [resolvable:$false] %s4832_s16 }
 0x184   : > { %s4834_s9 = scalar_lea.vmem %s4833_s16, 1024  ;;  %p4835_p4 = scmp.lt.s32.totalorder %s5441_s23, %s4833_s16 }
 0x185   : > { %p4830_p3 = pnand %p4828_p8, %p4814_p1  ;;  %p4836_p12 = scmp.lt.s32.totalorder %s4834_s9, %s4827_s5 }
 0x187   : > { %p4831_p9 = pneg %p4830_p3  ;;  %p4837_p6 = por %p4836_p12, %p4835_p4 }
 0x189   : > { %p4838_p13 = pnand %p4837_p6, %p4831_p9 }
 0x18b   : > { %4841 = shalt.err (!%p4838_p13)
}
 0x18c   : > { %4337 = dma.hbm_to_vmem [thread:$0]  (!%p5437_p10), %s5432_s3, 512, %s5441_s23, %s5448_s6, %s5953_s0, %s5953_s0, %s5952_s20  }
 0x18d   : > { %s575_s7 = scalar_lea.vmem [#allocation5], %s5427_s25  ;;  %s571_s10 = sand.u32 1, %s4986_s18  }
 0x18e   : > { %s582_s8 = sshll.u32 %s575_s7, 4  ;;  %s5483_s30 = scalar_lea.sflag [#allocation6], %s571_s10  ;;  %s5481_s8 = int_to_ptr.vmem [resolvable:$true] %s582_s8 }
 0x18f   : > { %s4842_s19 = scalar_lea.hbm %s5446_s29, 512  ;;  %s4847_s22 = scalar_lea.hbm %s5965_s24, 1024 }
 0x190   : > { %p4843_p4 = scmp.ne.s32.totalorder %s5446_s29, %s4842_s19  ;;  %p4848_p0 = scmp.lt.u32.totalorder %s5446_s29, %s5965_s24 }
 0x191   : > { %p4849_p7 = scmp.lt.u32.totalorder %s4847_s22, %s4842_s19  ;;  %p4851_p8 = scmp.lt.u32.totalorder %s4842_s19, %s5446_s29 }
 0x192   : > { %p4845_p9 = pnand %p4843_p4, %p4814_p1 }
 0x193   : > { %p4850_p5 = por %p4849_p7, %p4848_p0 }
 0x194   : > { %p4846_p11 = pneg %p4845_p9 }
 0x195   : > { %p4852_p3 = por %p4851_p8, %p4850_p5 }
 0x197   : > { %p4853_p12 = pnand %p4852_p3, %p4846_p11 }
 0x199   : > { %4856 = shalt.err (!%p4853_p12)
}
 0x19a   : > { %s4857_s6 = scalar_lea.vmem %s5481_s8, 512  ;;  %s5005_s25 = smov [#allocation5]  }
 0x19b   : > { %p4858_p6 = scmp.ne.s32.totalorder %s5481_s8, %s4857_s6  ;;  %s4862_s3 = sshll.u32 %s5005_s25, 4  ;;  %s4863_s3 = int_to_ptr.vmem [resolvable:$false] %s4862_s3 }
 0x19c   : > { %s4864_s23 = scalar_lea.vmem %s4863_s3, 1024  ;;  %p4865_p9 = scmp.lt.s32.totalorder %s5481_s8, %s4863_s3 }
 0x19d   : > { %p4860_p13 = pnand %p4858_p6, %p4814_p1  ;;  %p4866_p0 = scmp.lt.s32.totalorder %s4864_s23, %s4857_s6 }
 0x19f   : > { %p4861_p4 = pneg %p4860_p13  ;;  %p4867_p7 = por %p4866_p0, %p4865_p9 }
 0x1a1   : > { %p4868_p5 = pnand %p4867_p7, %p4861_p4 }
 0x1a3   : > { %4871 = shalt.err (!%p4868_p5)
}
 0x1a4   : > { %4340 = dma.hbm_to_vmem [thread:$0]  (!%p5437_p10), %s5446_s29, 512, %s5481_s8, %s5483_s30, %s5953_s0, %s5953_s0, %s5952_s20  }
 0x1a5   : > { %s5966_s7 = sld [smem:[#allocation40_spill]] }
 0x1ab   : > { %p5967_p1 = scmp.ne.s32.totalorder %s5966_s7, 0 }
 0x1ac   : > { %s5968_s10 = sld [smem:[#allocation37_spill]] (!%p5967_p1) }
 0x1ad   : > { %594 = sbr.rel (%p5967_p1) target bundleno = 2721 (0xaa1), region = 76 }
 0x1b2   : > { %s5515_s19 = sand.u32 (!%p5967_p1), 1, %s5968_s10  }
 0x1b3   : > { %s5518_s21 = sshll.u32 (!%p5967_p1), %s5515_s19, 5  ;;  %s597_s4 = scalar_lea.sflag (!%p5967_p1), [#allocation3], %s5515_s19 }
 0x1b4   : > { %s5522_s5 = scalar_lea.vmem [#allocation2], %s5518_s21 }
 0x1b5   : > { %4925 = dma.done.wait (%p5409_p2), %s597_s4, 512  }
 0x1b6   : > { %4927 = vsyncadd (%p5409_p2), %s597_s4, 4294966784  ;;  %s5969_s20 = sld [smem:[#allocation39_spill]]  ;;  %s5530_s8 = scalar_lea.vmem [#allocation5], %s5518_s21 }
 0x1bc   : > { %s605_s0 = sand.u32 1, %s5969_s20  }
 0x1bd   : > { %s606_s29 = scalar_lea.sflag [#allocation6], %s605_s0 }
 0x1be   : > { %4929 = dma.done.wait (%p5409_p2), %s606_s29, 512  }
 0x1bf   : > { %4931 = vsyncadd (%p5409_p2), %s606_s29, 4294966784  ;;  %p5970_p10 = scmp.eq.s32.totalorder %s5969_s20, 0 }
 0x1c1   : > { %4933 = dma.done.wait (%p5970_p10), [#allocation6], 8192   ;;  %p5971_p11 = pmov %p5970_p10 }
 0x1c2   : > { %p5972_p8 = pmov %p5970_p10 }
 0x1c3   : > { %4935 = vsyncadd (%p5971_p11), [#allocation6], 4294959104 }
 0x1c4   : > { %4937 = dma.done.wait (%p5972_p8), [#allocation9], 16384   ;;  %p5973_p3 = pmov %p5972_p8 }
 0x1c6   : > { %4939 = vsyncadd (%p5973_p3), [#allocation9], 4294950912  ;;  %p5974_p12 = pmov %p5973_p3 }
 0x1c7   : > { %p5975_p6 = pmov %p5973_p3 }
 0x1c8   : > { %4941 = dma.done.wait (%p5974_p12), [#allocation12], 8224  }
 0x1c9   : > { %4943 = vsyncadd (%p5975_p6), [#allocation12], 4294959072  ;;  %p5976_p2 = pmov %p5973_p3 }
 0x1cb   : > { %4945 = dma.done.wait (%p5976_p2), [#allocation15], 16416   ;;  %p5977_p13 = pmov %p5976_p2 }
 0x1cc   : > { %p5978_p4 = pmov %p5976_p2 }
 0x1cd   : > { %4947 = vsyncadd (%p5977_p13), [#allocation15], 4294950880 }
 0x1ce   : > { %4949 = dma.done.wait (%p5978_p4), [#allocation18], 16448   ;;  %p5979_p9 = pmov %p5976_p2 }
 0x1cf   : > { %p5980_p0 = pmov %p5976_p2 }
 0x1d0   : > { %4951 = vsyncadd (%p5979_p9), [#allocation18], 4294950848 }
 0x1d1   : > { %4953 = dma.done.wait (%p5980_p0), [#allocation21], 64   ;;  %p5981_p7 = pmov %p5980_p0 }
 0x1d2   : > { %p5982_p5 = pmov %p5980_p0 }
 0x1d3   : > { %4955 = vsyncadd (%p5981_p7), [#allocation21], 4294967232 }
 0x1d4   : > { %4957 = dma.done.wait (%p5982_p5), [#allocation24], 32   ;;  %p5983_p1 = pmov %p5980_p0 }
 0x1d5   : > { %v718_v0 = vld [vmem:[#allocation7 + $0x8] sm:$0xff]  ;;  %v720_v1 = vld [vmem:[#allocation7 + $0x18] sm:$0xff]  ;;  %v717_v2 = vld [vmem:[#allocation7] sm:$0xff]  ;;  %vm1990_vm0 = vcmask 130048   ;;  %s5984_s28 = sld [smem:[#allocation38_spill]]  ;;  %s706_s22 = scalar_lea.vmem [#allocation25], %s5518_s21 }
 0x1d6   : > { %4959 = vsyncadd (%p5983_p1), [#allocation24], 4294967264  ;;  %v3707_v3 = vpack.c.bf16 %v720_v1, %v718_v0  ;;  %v719_v4 = vld [vmem:[#allocation7 + $0x10] sm:$0xff]  ;;  %v722_v5 = vld [vmem:[#allocation7 + $0x28] sm:$0xff]  ;;  %s3373_s16 = sshll.u32 %s706_s22, 4  ;;  %s5985_s25 = sld [smem:[#allocation52_spill]]  ;;  %s5844_s16 = int_to_ptr.vmem [resolvable:$true] %s3373_s16 }
 0x1d7   : > { %v724_v6 = vld [vmem:[#allocation7 + $0x38] sm:$0xff]  ;;  %v3709_v7 = vpack.c.bf16 %v719_v4, %v717_v2  ;;  %v721_v9 = vld [vmem:[#allocation7 + $0x20] sm:$0xff]  ;;  %v723_v10 = vld [vmem:[#allocation7 + $0x30] sm:$0xff]  ;;  %s3357_s23 = scalar_lea.sflag [#allocation4], %s5515_s19  ;;  %s4872_s7 = scalar_lea.vmem %s5844_s16, 512 }
 0x1d8   : > { %v3711_v8 = vpack.c.bf16 %v724_v6, %v722_v5  ;;  %v726_v11 = vld [vmem:[#allocation7 + $0x48] sm:$0xff]  ;;  %3708 = vmatprep.subr.bf16.mxu1 %v3707_v3  ;;  %v728_v12 = vld [vmem:[#allocation7 + $0x58] sm:$0xff]  ;;  %v3713_v13 = vpack.c.bf16 %v723_v10, %v721_v9  ;;  %v725_v15 = vld [vmem:[#allocation7 + $0x40] sm:$0xff]  ;;  %p4873_p10 = scmp.ne.s32.totalorder %s5844_s16, %s4872_s7  ;;  %p5986_p11 = scmp.ne.s32.totalorder %s5960_s27, 0 }
 0x1d9   : > { %3710 = vmatpush1.bf16.msra.mxu1 %v3709_v7  ;;  %v3715_v14 = vpack.c.bf16 %v728_v12, %v726_v11  ;;  %v727_v16 = vld [vmem:[#allocation7 + $0x50] sm:$0xff]  ;;  %v730_v17 = vld [vmem:[#allocation7 + $0x68] sm:$0xff]  ;;  %v732_v18 = vld [vmem:[#allocation7 + $0x78] sm:$0xff]  ;;  %s5009_s10 = smov [#allocation25]  }
 0x1da   : > { %3712 = vmatprep.subr.bf16.mxu1 %v3711_v8  ;;  %v3717_v19 = vpack.c.bf16 %v727_v16, %v725_v15  ;;  %v3719_v20 = vpack.c.bf16 %v732_v18, %v730_v17  ;;  %v729_v21 = vld [vmem:[#allocation7 + $0x60] sm:$0xff]  ;;  %v731_v22 = vld [vmem:[#allocation7 + $0x70] sm:$0xff]  ;;  %v734_v23 = vld [vmem:[#allocation7 + $0x88] sm:$0xff]  ;;  %p4874_p8 = pnand %p4873_p10, %p5986_p11  ;;  %s4876_s21 = sshll.u32 %s5009_s10, 4  ;;  %s4877_s21 = int_to_ptr.vmem [resolvable:$false] %s4876_s21 }
 0x1db   : > { %v736_v24 = vld [vmem:[#allocation7 + $0x98] sm:$0xff]  ;;  %v3721_v25 = vpack.c.bf16 %v731_v22, %v729_v21  ;;  %v733_v27 = vld [vmem:[#allocation7 + $0x80] sm:$0xff]  ;;  %v735_v28 = vld [vmem:[#allocation7 + $0x90] sm:$0xff]  ;;  %s3662_s30 = sshll.u32 %s5984_s28, 9  ;;  %s4878_s4 = scalar_lea.vmem %s4877_s21, 1024 }
 0x1dc   : > { %v3723_v26 = vpack.c.bf16 %v736_v24, %v734_v23  ;;  %v738_v29 = vld [vmem:[#allocation7 + $0xa8] sm:$0xff]  ;;  %v740_v30 = vld [vmem:[#allocation7 + $0xb8] sm:$0xff]  ;;  %v3725_v31 = vpack.c.bf16 %v735_v28, %v733_v27  ;;  %v737_v33 = vld [vmem:[#allocation7 + $0xa0] sm:$0xff]  ;;  %s5842_s3 = scalar_lea.hbm %s5985_s25, %s3662_s30  ;;  %p4875_p3 = pneg %p4874_p8 }
 0x1dd   : > { %3714 = vmatpush1.bf16.msra.mxu1 %v3713_v13  ;;  %v3727_v32 = vpack.c.bf16 %v740_v30, %v738_v29  ;;  %v739_v34 = vld [vmem:[#allocation7 + $0xb0] sm:$0xff]  ;;  %v742_v35 = vld [vmem:[#allocation7 + $0xc8] sm:$0xff]  ;;  %v744_v36 = vld [vmem:[#allocation7 + $0xd8] sm:$0xff]  ;;  %p4879_p12 = scmp.lt.s32.totalorder %s5844_s16, %s4877_s21  ;;  %p4880_p6 = scmp.lt.s32.totalorder %s4878_s4, %s4872_s7 }
 0x1de   : > { %3716 = vmatprep.subr.bf16.mxu1 %v3715_v14  ;;  %v3729_v37 = vpack.c.bf16 %v739_v34, %v737_v33  ;;  %v3731_v38 = vpack.c.bf16 %v744_v36, %v742_v35  ;;  %v741_v39 = vld [vmem:[#allocation7 + $0xc0] sm:$0xff]  ;;  %v743_v40 = vld [vmem:[#allocation7 + $0xd0] sm:$0xff]  ;;  %v710_v41 = vld [vmem:[%s5522_s5 + $0x8] sm:$0xff] }
 0x1df   : > { %v746_v42 = vld [vmem:[#allocation7 + $0xe8] sm:$0xff]  ;;  %v748_v43 = vld [vmem:[#allocation7 + $0xf8] sm:$0xff]  ;;  %845 = vmatprep.mubr.f32.mxu1 %v710_v41  ;;  %v3733_v44 = vpack.c.bf16 %v743_v40, %v741_v39  ;;  %v745_v46 = vld [vmem:[#allocation7 + $0xe0] sm:$0xff]  ;;  %p4881_p2 = por %p4880_p6, %p4879_p12 }
 0x1e0   : > { %v3735_v45 = vpack.c.bf16 %v748_v43, %v746_v42  ;;  %v747_v47 = vld [vmem:[#allocation7 + $0xf0] sm:$0xff]  ;;  %v750_v48 = vld [vmem:[#allocation7 + $0x108] sm:$0xff]  ;;  %v752_v49 = vld [vmem:[#allocation7 + $0x118] sm:$0xff] }
 0x1e1   : > { %3718 = vmatpush1.bf16.msra.mxu1 %v3717_v19  ;;  %v3737_v50 = vpack.c.bf16 %v747_v47, %v745_v46  ;;  %v3739_v51 = vpack.c.bf16 %v752_v49, %v750_v48  ;;  %v749_v52 = vld [vmem:[#allocation7 + $0x100] sm:$0xff]  ;;  %v751_v53 = vld [vmem:[#allocation7 + $0x110] sm:$0xff]  ;;  %v754_v54 = vld [vmem:[#allocation7 + $0x128] sm:$0xff]  ;;  %p4882_p13 = pnand %p4881_p2, %p4875_p3 }
 0x1e2   : > { %3720 = vmatprep.subr.bf16.mxu1 %v3719_v20  ;;  %v756_v55 = vld [vmem:[#allocation7 + $0x138] sm:$0xff]  ;;  %v3741_v56 = vpack.c.bf16 %v751_v53, %v749_v52  ;;  %v753_v58 = vld [vmem:[#allocation7 + $0x120] sm:$0xff]  ;;  %v755_v59 = vld [vmem:[#allocation7 + $0x130] sm:$0xff] }
 0x1e3   : > { %v3743_v57 = vpack.c.bf16 %v756_v55, %v754_v54  ;;  %v758_v60 = vld [vmem:[#allocation7 + $0x148] sm:$0xff]  ;;  %v760_v61 = vld [vmem:[#allocation7 + $0x158] sm:$0xff]  ;;  %v3745_v62 = vpack.c.bf16 %v755_v59, %v753_v58  ;;  %v757_v0 = vld [vmem:[#allocation7 + $0x140] sm:$0xff] }
 0x1e4   : > { %v3747_v63 = vpack.c.bf16 %v760_v61, %v758_v60  ;;  %v759_v1 = vld [vmem:[#allocation7 + $0x150] sm:$0xff]  ;;  %v762_v2 = vld [vmem:[#allocation7 + $0x168] sm:$0xff]  ;;  %v764_v3 = vld [vmem:[#allocation7 + $0x178] sm:$0xff] }
 0x1e5   : > { %3722 = vmatpush1.bf16.msra.mxu1 %v3721_v25  ;;  %v3749_v4 = vpack.c.bf16 %v759_v1, %v757_v0  ;;  %v3751_v5 = vpack.c.bf16 %v764_v3, %v762_v2  ;;  %v761_v6 = vld [vmem:[#allocation7 + $0x160] sm:$0xff]  ;;  %v763_v7 = vld [vmem:[#allocation7 + $0x170] sm:$0xff]  ;;  %v766_v8 = vld [vmem:[#allocation7 + $0x188] sm:$0xff] }
 0x1e6   : > { %3724 = vmatprep.subr.bf16.mxu1 %v3723_v26  ;;  %v768_v9 = vld [vmem:[#allocation7 + $0x198] sm:$0xff]  ;;  %v765_v10 = vld [vmem:[#allocation7 + $0x180] sm:$0xff]  ;;  %v3753_v11 = vpack.c.bf16 %v763_v7, %v761_v6  ;;  %v767_v12 = vld [vmem:[#allocation7 + $0x190] sm:$0xff] }
 0x1e7   : > { %v770_v13 = vld [vmem:[#allocation7 + $0x1a8] sm:$0xff]  ;;  %v3755_v15 = vpack.c.bf16 %v768_v9, %v766_v8  ;;  %v772_v16 = vld [vmem:[#allocation7 + $0x1b8] sm:$0xff]  ;;  %v999_v20 = vld [vmem:[#allocation10] sm:$0xff]  ;;  %v3757_v27 = vpack.c.bf16 %v767_v12, %v765_v10 }
 0x1e8   : > { %v5566_v14 = vld [vmem:[%s5530_s8 + $0x8] sm:$0xff]  ;;  %v1002_v18 = vld [vmem:[#allocation10 + $0x18] sm:$0xff]  ;;  %v1001_v21 = vld [vmem:[#allocation10 + $0x10] sm:$0xff] }
 0x1e9   : > { %3726 = vmatpush1.bf16.msra.mxu1 %v3725_v31  ;;  %v1000_v17 = vld [vmem:[#allocation10 + $0x8] sm:$0xff]  ;;  %1127 = vmatprep.mubr.f32.mxu0 %v5566_v14  ;;  %v3837_v23 = vpack.c.bf16 %v1001_v21, %v999_v20  ;;  %v1006_v24 = vld [vmem:[#allocation10 + $0x38] sm:$0xff]  ;;  %v1003_v25 = vld [vmem:[#allocation10 + $0x20] sm:$0xff]  ;;  %v3759_v31 = vpack.c.bf16 %v772_v16, %v770_v13 }
 0x1ea   : > { %3728 = vmatprep.subr.bf16.mxu1 %v3727_v32  ;;  %v3835_v19 = vpack.c.bf16 %v1002_v18, %v1000_v17  ;;  %v1004_v22 = vld [vmem:[#allocation10 + $0x28] sm:$0xff]  ;;  %v1005_v26 = vld [vmem:[#allocation10 + $0x30] sm:$0xff]  ;;  %v1010_v30 = vld [vmem:[#allocation10 + $0x58] sm:$0xff] }
 0x1eb   : > { %v3839_v28 = vpack.c.bf16 %v1006_v24, %v1004_v22  ;;  %v1008_v29 = vld [vmem:[#allocation10 + $0x48] sm:$0xff]  ;;  %v769_v32 = vld [vmem:[#allocation7 + $0x1a0] sm:$0xff]  ;;  %v771_v33 = vld [vmem:[#allocation7 + $0x1b0] sm:$0xff]  ;;  %v3841_v35 = vpack.c.bf16 %v1005_v26, %v1003_v25 }
 0x1ec   : > { %3836 = vmatprep.subr.bf16.mxu0 %v3835_v19  ;;  %v774_v34 = vld [vmem:[#allocation7 + $0x1c8] sm:$0xff]  ;;  %v776_v36 = vld [vmem:[#allocation7 + $0x1d8] sm:$0xff]  ;;  %v1009_v39 = vld [vmem:[#allocation10 + $0x50] sm:$0xff]  ;;  %v3761_v42 = vpack.c.bf16 %v771_v33, %v769_v32 }
 0x1ed   : > { %3730 = vmatpush1.bf16.msra.mxu1 %v3729_v37  ;;  %3838 = vmatpush1.bf16.msra.mxu0 %v3837_v23  ;;  %v3843_v37 = vpack.c.bf16 %v1010_v30, %v1008_v29  ;;  %v1012_v40 = vld [vmem:[#allocation10 + $0x68] sm:$0xff]  ;;  %v1014_v41 = vld [vmem:[#allocation10 + $0x78] sm:$0xff]  ;;  %v3763_v43 = vpack.c.bf16 %v776_v36, %v774_v34  ;;  %v1019_v10 = vld [vmem:[#allocation10 + $0xa0] sm:$0xff] }
 0x1ee   : > { %3732 = vmatprep.subr.bf16.mxu1 %v3731_v38  ;;  %3840 = vmatprep.subr.bf16.mxu0 %v3839_v28  ;;  %v1007_v38 = vld [vmem:[#allocation10 + $0x40] sm:$0xff]  ;;  %v778_v46 = vld [vmem:[#allocation7 + $0x1e8] sm:$0xff]  ;;  %v780_v48 = vld [vmem:[#allocation7 + $0x1f8] sm:$0xff]  ;;  %v3847_v49 = vpack.c.bf16 %v1014_v41, %v1012_v40 }
 0x1ef   : > { %v3845_v47 = vpack.c.bf16 %v1009_v39, %v1007_v38  ;;  %v1016_v52 = vld [vmem:[#allocation10 + $0x88] sm:$0xff]  ;;  %v1018_v53 = vld [vmem:[#allocation10 + $0x98] sm:$0xff]  ;;  %v3767_v55 = vpack.c.bf16 %v780_v48, %v778_v46  ;;  %v862_v17 = vld [vmem:[#allocation8 + $0x20] sm:$0xff] }
 0x1f0   : > { %v859_v58 = vld [vmem:[#allocation8 + $0x8] sm:$0xff]  ;;  %v861_v60 = vld [vmem:[#allocation8 + $0x18] sm:$0xff]  ;;  %v3851_v61 = vpack.c.bf16 %v1018_v53, %v1016_v52  ;;  %v864_v19 = vld [vmem:[#allocation8 + $0x30] sm:$0xff] }
 0x1f1   : > { %3734 = vmatpush1.bf16.msra.mxu1 %v3733_v44  ;;  %v773_v44 = vld [vmem:[#allocation7 + $0x1c0] sm:$0xff]  ;;  %3842 = vmatpush1.bf16.msra.mxu0 %v3841_v35  ;;  %v1020_v0 = vld [vmem:[#allocation10 + $0xa8] sm:$0xff]  ;;  %v1022_v1 = vld [vmem:[#allocation10 + $0xb8] sm:$0xff]  ;;  %v3771_v3 = vpack.c.bf16 %v861_v60, %v859_v58  ;;  %v3777_v29 = vpack.c.bf16 %v864_v19, %v862_v17 }
 0x1f2   : > { %3736 = vmatprep.subr.bf16.mxu1 %v3735_v45  ;;  %v775_v45 = vld [vmem:[#allocation7 + $0x1d0] sm:$0xff]  ;;  %3844 = vmatprep.subr.bf16.mxu0 %v3843_v37  ;;  %v863_v6 = vld [vmem:[#allocation8 + $0x28] sm:$0xff]  ;;  %v865_v8 = vld [vmem:[#allocation8 + $0x38] sm:$0xff]  ;;  %v3855_v9 = vpack.c.bf16 %v1022_v1, %v1020_v0 }
 0x1f3   : > { %v3765_v54 = vpack.c.bf16 %v775_v45, %v773_v44  ;;  %v1024_v12 = vld [vmem:[#allocation10 + $0xc8] sm:$0xff]  ;;  %v1026_v13 = vld [vmem:[#allocation10 + $0xd8] sm:$0xff]  ;;  %v3775_v18 = vpack.c.bf16 %v865_v8, %v863_v6  ;;  %v1023_v25 = vld [vmem:[#allocation10 + $0xc0] sm:$0xff] }
 0x1f4   : > { %v867_v20 = vld [vmem:[#allocation8 + $0x48] sm:$0xff]  ;;  %v712_v21 = vld [vmem:[%s5522_s5 + $0x18] sm:$0xff]  ;;  %v3859_v24 = vpack.c.bf16 %v1026_v13, %v1024_v12  ;;  %v1025_v26 = vld [vmem:[#allocation10 + $0xd0] sm:$0xff] }
 0x1f5   : > { %3738 = vmatpush1.bf16.msra.mxu1 %v3737_v50  ;;  %v1011_v50 = vld [vmem:[#allocation10 + $0x60] sm:$0xff]  ;;  %3846 = vmatpush1.bf16.msra.mxu0 %v3845_v47  ;;  %v869_v23 = vld [vmem:[#allocation8 + $0x58] sm:$0xff]  ;;  %v711_v30 = vld [vmem:[%s5522_s5 + $0x10] sm:$0xff]  ;;  %v3861_v35 = vpack.c.bf16 %v1025_v26, %v1023_v25 }
 0x1f6   : > { %3740 = vmatprep.subr.bf16.mxu1 %v3739_v51  ;;  %v1013_v51 = vld [vmem:[#allocation10 + $0x70] sm:$0xff]  ;;  %3848 = vmatprep.subr.bf16.mxu0 %v3847_v49  ;;  %v1030_v28 = vld [vmem:[#allocation10 + $0xf8] sm:$0xff]  ;;  %v866_v32 = vld [vmem:[#allocation8 + $0x40] sm:$0xff] }
 0x1f7   : > { %v3849_v59 = vpack.c.bf16 %v1013_v51, %v1011_v50  ;;  %v868_v33 = vld [vmem:[#allocation8 + $0x50] sm:$0xff]  ;;  %v871_v34 = vld [vmem:[#allocation8 + $0x68] sm:$0xff]  ;;  %v873_v36 = vld [vmem:[#allocation8 + $0x78] sm:$0xff] }
 0x1f8   : > { %v1027_v38 = vld [vmem:[#allocation10 + $0xe0] sm:$0xff]  ;;  %v1029_v39 = vld [vmem:[#allocation10 + $0xf0] sm:$0xff]  ;;  %v1032_v40 = vld [vmem:[#allocation10 + $0x108] sm:$0xff] }
 0x1f9   : > { %3742 = vmatpush1.bf16.msra.mxu1 %v3741_v56  ;;  %v777_v56 = vld [vmem:[#allocation7 + $0x1e0] sm:$0xff]  ;;  %3850 = vmatpush1.bf16.msra.mxu0 %v3849_v59  ;;  %v1034_v41 = vld [vmem:[#allocation10 + $0x118] sm:$0xff]  ;;  %v872_v45 = vld [vmem:[#allocation8 + $0x70] sm:$0xff]  ;;  %v3865_v47 = vpack.c.bf16 %v1029_v39, %v1027_v38 }
 0x1fa   : > { %3744 = vmatprep.subr.bf16.mxu1 %v3743_v57  ;;  %v779_v57 = vld [vmem:[#allocation7 + $0x1f0] sm:$0xff]  ;;  %3852 = vmatprep.subr.bf16.mxu0 %v3851_v61  ;;  %v870_v44 = vld [vmem:[#allocation8 + $0x60] sm:$0xff]  ;;  %v875_v46 = vld [vmem:[#allocation8 + $0x88] sm:$0xff]  ;;  %v3867_v49 = vpack.c.bf16 %v1034_v41, %v1032_v40 }
 0x1fb   : > { %v3769_v2 = vpack.c.bf16 %v779_v57, %v777_v56  ;;  %v877_v48 = vld [vmem:[#allocation8 + $0x98] sm:$0xff]  ;;  %v1031_v50 = vld [vmem:[#allocation10 + $0x100] sm:$0xff]  ;;  %v1033_v51 = vld [vmem:[#allocation10 + $0x110] sm:$0xff] }
 0x1fc   : > { %v1036_v52 = vld [vmem:[#allocation10 + $0x128] sm:$0xff]  ;;  %v1038_v53 = vld [vmem:[#allocation10 + $0x138] sm:$0xff]  ;;  %v874_v56 = vld [vmem:[#allocation8 + $0x80] sm:$0xff]  ;;  %v3869_v58 = vpack.c.bf16 %v1033_v51, %v1031_v50 }
 0x1fd   : > { %3746 = vmatpush1.bf16.msra.mxu1 %v3745_v62  ;;  %v1015_v62 = vld [vmem:[#allocation10 + $0x80] sm:$0xff]  ;;  %v879_v57 = vld [vmem:[#allocation8 + $0xa8] sm:$0xff]  ;;  %v881_v59 = vld [vmem:[#allocation8 + $0xb8] sm:$0xff]  ;;  %v3871_v60 = vpack.c.bf16 %v1038_v53, %v1036_v52 }
 0x1fe   : > { %3748 = vmatprep.subr.bf16.mxu1 %v3747_v63  ;;  %v1017_v63 = vld [vmem:[#allocation10 + $0x90] sm:$0xff]  ;;  %v1035_v61 = vld [vmem:[#allocation10 + $0x120] sm:$0xff]  ;;  %v1042_v0 = vld [vmem:[#allocation10 + $0x158] sm:$0xff] }
 0x1ff   : > { %v3853_v7 = vpack.c.bf16 %v1017_v63, %v1015_v62  ;;  %v1037_v62 = vld [vmem:[#allocation10 + $0x130] sm:$0xff]  ;;  %v1040_v63 = vld [vmem:[#allocation10 + $0x148] sm:$0xff]  ;;  %v1046_v12 = vld [vmem:[#allocation10 + $0x178] sm:$0xff] }
 0x200   : > { %v3873_v6 = vpack.c.bf16 %v1037_v62, %v1035_v61  ;;  %v3875_v8 = vpack.c.bf16 %v1042_v0, %v1040_v63  ;;  %v884_v17 = vld [vmem:[#allocation8 + $0xd0] sm:$0xff]  ;;  %v1050_v25 = vld [vmem:[#allocation10 + $0x198] sm:$0xff]  ;;  %v895_v38 = vld [vmem:[#allocation8 + $0x128] sm:$0xff] }
 0x201   : > { %3750 = vmatpush1.bf16.msra.mxu1 %v3749_v4  ;;  %v858_v4 = vld [vmem:[#allocation8] sm:$0xff]  ;;  %3854 = vmatpush1.bf16.msra.mxu0 %v3853_v7  ;;  %v885_v7 = vld [vmem:[#allocation8 + $0xd8] sm:$0xff]  ;;  %v903_v50 = vld [vmem:[#allocation8 + $0x168] sm:$0xff] }
 0x202   : > { %3752 = vmatprep.subr.bf16.mxu1 %v3751_v5  ;;  %v860_v5 = vld [vmem:[#allocation8 + $0x10] sm:$0xff]  ;;  %3856 = vmatprep.subr.bf16.mxu0 %v3855_v9  ;;  %v1039_v9 = vld [vmem:[#allocation10 + $0x140] sm:$0xff]  ;;  %v897_v39 = vld [vmem:[#allocation8 + $0x138] sm:$0xff] }
 0x203   : > { %v3773_v16 = vpack.c.bf16 %v860_v5, %v858_v4  ;;  %v880_v4 = vld [vmem:[#allocation8 + $0xb0] sm:$0xff]  ;;  %v883_v5 = vld [vmem:[#allocation8 + $0xc8] sm:$0xff]  ;;  %v3807_v41 = vpack.c.bf16 %v897_v39, %v895_v38  ;;  %v905_v51 = vld [vmem:[#allocation8 + $0x178] sm:$0xff] }
 0x204   : > { %v3815_v53 = vpack.c.bf16 %v905_v51, %v903_v50  ;;  %v911_v61 = vld [vmem:[#allocation8 + $0x1a8] sm:$0xff]  ;;  %v913_v62 = vld [vmem:[#allocation8 + $0x1b8] sm:$0xff]  ;;  %v1059_v38 = vld [vmem:[#allocation10 + $0x1e0] sm:$0xff]  ;;  %v5008_v51 = vmov 0.0  }
 0x205   : > { %3754 = vmatpush1.bf16.msra.mxu1 %v3753_v11  ;;  %v1021_v11 = vld [vmem:[#allocation10 + $0xb0] sm:$0xff]  ;;  %v3823_v0 = vpack.c.bf16 %v913_v62, %v911_v61 }
 0x206   : > { %3756 = vmatprep.subr.bf16.mxu1 %v3755_v15  ;;  %v709_v15 = vld [vmem:[%s5522_s5] sm:$0xff]  ;;  %v3857_v22 = vpack.c.bf16 %v1021_v11, %v1019_v10  ;;  %v1041_v10 = vld [vmem:[#allocation10 + $0x150] sm:$0xff]  ;;  %v1044_v11 = vld [vmem:[#allocation10 + $0x168] sm:$0xff] }
 0x207   : > { %v3877_v19 = vpack.c.bf16 %v1041_v10, %v1039_v9  ;;  %v919_v9 = vld [vmem:[#allocation8 + $0x1e8] sm:$0xff]  ;;  %v921_v10 = vld [vmem:[#allocation8 + $0x1f8] sm:$0xff]  ;;  %v1061_v39 = vld [vmem:[#allocation10 + $0x1f0] sm:$0xff] }
 0x208   : > { %3858 = vmatpush1.bf16.msra.mxu0 %v3857_v22  ;;  %v1043_v22 = vld [vmem:[#allocation10 + $0x160] sm:$0xff] }
 0x209   : > { %3758 = vmatpush1.bf16.msra.mxu1 %v3757_v27  ;;  %v1028_v27 = vld [vmem:[#allocation10 + $0xe8] sm:$0xff]  ;;  %3860 = vmatprep.subr.bf16.mxu0 %v3859_v24 }
 0x20a   : > { %3760 = vmatprep.subr.bf16.mxu1 %v3759_v31  ;;  %v3779_v31 = vpack.c.bf16 %v869_v23, %v867_v20  ;;  %v3863_v37 = vpack.c.bf16 %v1030_v28, %v1028_v27  ;;  %v889_v20 = vld [vmem:[#allocation8 + $0xf8] sm:$0xff]  ;;  %v1045_v23 = vld [vmem:[#allocation10 + $0x170] sm:$0xff]  ;;  %v1048_v24 = vld [vmem:[#allocation10 + $0x188] sm:$0xff] }
 0x20b   : > { %v886_v28 = vld [vmem:[#allocation8 + $0xe0] sm:$0xff] }
 0x20c   : > { %3862 = vmatpush1.bf16.msra.mxu0 %v3861_v35 }
 0x20d   : > { %3762 = vmatpush1.bf16.msra.mxu1 %v3761_v42  ;;  %v3781_v42 = vpack.c.bf16 %v868_v33, %v866_v32  ;;  %3864 = vmatprep.subr.bf16.mxu0 %v3863_v37  ;;  %v893_v32 = vld [vmem:[#allocation8 + $0x118] sm:$0xff]  ;;  %v3883_v33 = vpack.c.bf16 %v1050_v25, %v1048_v24  ;;  %v892_v37 = vld [vmem:[#allocation8 + $0x110] sm:$0xff] }
 0x20e   : > { %3764 = vmatprep.subr.bf16.mxu1 %v3763_v43  ;;  %v3783_v43 = vpack.c.bf16 %v873_v36, %v871_v34  ;;  %v890_v36 = vld [vmem:[#allocation8 + $0x100] sm:$0xff]  ;;  %v1054_v24 = vld [vmem:[#allocation10 + $0x1b8] sm:$0xff] }
 0x20f   : > { %v3805_v40 = vpack.c.bf16 %v892_v37, %v890_v36  ;;  %v1062_v36 = vld [vmem:[#allocation10 + $0x1f8] sm:$0xff] }
 0x210   : > { %3866 = vmatpush1.bf16.msra.mxu0 %v3865_v47 }
 0x211   : > { %3766 = vmatpush1.bf16.msra.mxu1 %v3765_v54  ;;  %v3785_v54 = vpack.c.bf16 %v872_v45, %v870_v44  ;;  %3868 = vmatprep.subr.bf16.mxu0 %v3867_v49  ;;  %v899_v44 = vld [vmem:[#allocation8 + $0x148] sm:$0xff]  ;;  %v901_v45 = vld [vmem:[#allocation8 + $0x158] sm:$0xff]  ;;  %v900_v49 = vld [vmem:[#allocation8 + $0x150] sm:$0xff] }
 0x212   : > { %3768 = vmatprep.subr.bf16.mxu1 %v3767_v55  ;;  %v3787_v55 = vpack.c.bf16 %v877_v48, %v875_v46  ;;  %v3811_v47 = vpack.c.bf16 %v901_v45, %v899_v44  ;;  %v898_v48 = vld [vmem:[#allocation8 + $0x140] sm:$0xff] }
 0x213   : > { %v3813_v52 = vpack.c.bf16 %v900_v49, %v898_v48 }
 0x214   : > { %3870 = vmatpush1.bf16.msra.mxu0 %v3869_v58 }
 0x215   : > { %3770 = vmatpush1.bf16.msra.mxu1 %v3769_v2  ;;  %v3791_v2 = vpack.c.bf16 %v881_v59, %v879_v57  ;;  %3872 = vmatprep.subr.bf16.mxu0 %v3871_v60  ;;  %v906_v59 = vld [vmem:[#allocation8 + $0x180] sm:$0xff]  ;;  %v908_v60 = vld [vmem:[#allocation8 + $0x190] sm:$0xff] }
 0x216   : > { %3772 = vmatprep.subr.bf16.mxu1 %v3771_v3  ;;  %v878_v3 = vld [vmem:[#allocation8 + $0xa0] sm:$0xff]  ;;  %v3821_v63 = vpack.c.bf16 %v908_v60, %v906_v59 }
 0x217   : > { %v3793_v13 = vpack.c.bf16 %v880_v4, %v878_v3  ;;  %v915_v3 = vld [vmem:[#allocation8 + $0x1c8] sm:$0xff]  ;;  %v917_v4 = vld [vmem:[#allocation8 + $0x1d8] sm:$0xff] }
 0x218   : > { %846 = vmatmul.mubr.f32.vlgmr.msra.gmra.mrb[0].mxu1 %v709_v15  ;;  %v3795_v15 = vpack.c.bf16 %v885_v7, %v883_v5  ;;  %3874 = vmatpush1.bf16.msra.mxu0 %v3873_v6  ;;  %v3827_v6 = vpack.c.bf16 %v917_v4, %v915_v3  ;;  %v914_v7 = vld [vmem:[#allocation8 + $0x1c0] sm:$0xff] }
 0x219   : > { %3774 = vmatpush1.bf16.msra.mxu1 %v3773_v16  ;;  %851 = vmatprep.mubr.f32.mxu1 %v712_v21  ;;  %v882_v16 = vld [vmem:[#allocation8 + $0xc0] sm:$0xff]  ;;  %v3879_v21 = vpack.c.bf16 %v1046_v12, %v1044_v11  ;;  %v3831_v12 = vpack.c.bf16 %v921_v10, %v919_v9 }
 0x21a   : > { %3776 = vmatprep.subr.bf16.mxu1 %v3775_v18  ;;  %v887_v18 = vld [vmem:[#allocation8 + $0xe8] sm:$0xff]  ;;  %3876 = vmatprep.subr.bf16.mxu0 %v3875_v8  ;;  %v3797_v26 = vpack.c.bf16 %v884_v17, %v882_v16  ;;  %v916_v8 = vld [vmem:[#allocation8 + $0x1d0] sm:$0xff]  ;;  %v713_v17 = vld [vmem:[%s5530_s8] sm:$0xff] }
 0x21b   : > { %v3799_v27 = vpack.c.bf16 %v889_v20, %v887_v18  ;;  %v3829_v11 = vpack.c.bf16 %v916_v8, %v914_v7  ;;  %v716_v18 = vld [vmem:[%s5530_s8 + $0x18] sm:$0xff]  ;;  %v1047_v20 = vld [vmem:[#allocation10 + $0x180] sm:$0xff] }
 0x21c   : > { %852 = vmatmul.mubr.f32.gmra.mrb[2].mxu1 %v711_v30  ;;  %3878 = vmatpush1.bf16.msra.mxu0 %v3877_v19  ;;  %v3881_v30 = vpack.c.bf16 %v1045_v23, %v1043_v22  ;;  %v715_v19 = vld [vmem:[%s5530_s8 + $0x10] sm:$0xff]  ;;  %v1052_v23 = vld [vmem:[#allocation10 + $0x1a8] sm:$0xff] }
 0x21d   : > { %3778 = vmatpush1.bf16.msra.mxu1 %v3777_v29  ;;  %986 = vmatprep.mubr.f32.mxu1 %v5566_v14  ;;  %v876_v14 = vld [vmem:[#allocation8 + $0x90] sm:$0xff]  ;;  %v3887_v25 = vpack.c.bf16 %v1054_v24, %v1052_v23 }
 0x21e   : > { %3780 = vmatprep.subr.bf16.mxu1 %v3779_v31  ;;  %v3789_v1 = vpack.c.bf16 %v876_v14, %v874_v56  ;;  %v888_v29 = vld [vmem:[#allocation8 + $0xf0] sm:$0xff]  ;;  %v891_v31 = vld [vmem:[#allocation8 + $0x108] sm:$0xff]  ;;  %3880 = vmatprep.subr.bf16.mxu0 %v3879_v21  ;;  %v909_v14 = vld [vmem:[#allocation8 + $0x198] sm:$0xff] }
 0x21f   : > { %v3801_v34 = vpack.c.bf16 %v888_v29, %v886_v28  ;;  %v3803_v35 = vpack.c.bf16 %v893_v32, %v891_v31  ;;  %v907_v56 = vld [vmem:[#allocation8 + $0x188] sm:$0xff]  ;;  %v1049_v21 = vld [vmem:[#allocation10 + $0x190] sm:$0xff]  ;;  %v1055_v32 = vld [vmem:[#allocation10 + $0x1c0] sm:$0xff] }
 0x220   : > { %3882 = vmatpush1.bf16.msra.mxu0 %v3881_v30  ;;  %v3819_v58 = vpack.c.bf16 %v909_v14, %v907_v56  ;;  %v3885_v22 = vpack.c.bf16 %v1049_v21, %v1047_v20  ;;  %v1056_v29 = vld [vmem:[#allocation10 + $0x1c8] sm:$0xff]  ;;  %v1058_v30 = vld [vmem:[#allocation10 + $0x1d8] sm:$0xff] }
 0x221   : > { %3782 = vmatpush1.bf16.msra.mxu1 %v3781_v42  ;;  %3884 = vmatprep.subr.bf16.mxu0 %v3883_v33  ;;  %v894_v42 = vld [vmem:[#allocation8 + $0x120] sm:$0xff]  ;;  %v3891_v31 = vpack.c.bf16 %v1058_v30, %v1056_v29  ;;  %v1057_v33 = vld [vmem:[#allocation10 + $0x1d0] sm:$0xff] }
 0x222   : > { %3784 = vmatprep.subr.bf16.mxu1 %v3783_v43  ;;  %v896_v43 = vld [vmem:[#allocation8 + $0x130] sm:$0xff] }
 0x223   : > { %v3809_v46 = vpack.c.bf16 %v896_v43, %v894_v42  ;;  %v1144_v43 = vlaneseq }
 0x224   : > { %3886 = vmatpush1.bf16.msra.mxu0 %v3885_v22 }
 0x225   : > { %3786 = vmatpush1.bf16.msra.mxu1 %v3785_v54  ;;  %v902_v54 = vld [vmem:[#allocation8 + $0x160] sm:$0xff]  ;;  %3888 = vmatprep.subr.bf16.mxu0 %v3887_v25  ;;  %v5576_v45 = vshrl.u32 %v1144_v43, 7 }
 0x226   : > { %3788 = vmatprep.subr.bf16.mxu1 %v3787_v55  ;;  %v904_v55 = vld [vmem:[#allocation8 + $0x170] sm:$0xff] }
 0x227   : > { %v3817_v57 = vpack.c.bf16 %v904_v55, %v902_v54 }
 0x229   : > { %3790 = vmatpush1.bf16.msra.mxu1 %v3789_v1  ;;  %v910_v1 = vld [vmem:[#allocation8 + $0x1a0] sm:$0xff] }
 0x22a   : > { %3792 = vmatprep.subr.bf16.mxu1 %v3791_v2  ;;  %v912_v2 = vld [vmem:[#allocation8 + $0x1b0] sm:$0xff] }
 0x22b   : > { %v3825_v5 = vpack.c.bf16 %v912_v2, %v910_v1 }
 0x22d   : > { %3794 = vmatpush1.bf16.msra.mxu1 %v3793_v13  ;;  %v918_v13 = vld [vmem:[#allocation8 + $0x1e0] sm:$0xff] }
 0x22e   : > { %3796 = vmatprep.subr.bf16.mxu1 %v3795_v15  ;;  %v920_v15 = vld [vmem:[#allocation8 + $0x1f0] sm:$0xff] }
 0x22f   : > { %v3833_v16 = vpack.c.bf16 %v920_v15, %v918_v13 }
 0x231   : > { %3798 = vmatpush1.bf16.msra.mxu1 %v3797_v26  ;;  %v1051_v26 = vld [vmem:[#allocation10 + $0x1a0] sm:$0xff] }
 0x232   : > { %3800 = vmatprep.subr.bf16.mxu1 %v3799_v27  ;;  %v1053_v27 = vld [vmem:[#allocation10 + $0x1b0] sm:$0xff] }
 0x233   : > { %v3889_v28 = vpack.c.bf16 %v1053_v27, %v1051_v26 }
 0x235   : > { %3802 = vmatpush1.bf16.msra.mxu1 %v3801_v34  ;;  %3890 = vmatpush1.bf16.msra.mxu0 %v3889_v28  ;;  %v3893_v34 = vpack.c.bf16 %v1057_v33, %v1055_v32 }
 0x236   : > { %3804 = vmatprep.subr.bf16.mxu1 %v3803_v35  ;;  %3892 = vmatprep.subr.bf16.mxu0 %v3891_v31  ;;  %v1060_v35 = vld [vmem:[#allocation10 + $0x1e8] sm:$0xff] }
 0x237   : > { %v3895_v37 = vpack.c.bf16 %v1062_v36, %v1060_v35 }
 0x239   : > { %3806 = vmatpush1.bf16.msra.mxu1 %v3805_v40  ;;  %3894 = vmatpush1.bf16.msra.mxu0 %v3893_v34  ;;  %v3897_v40 = vpack.c.bf16 %v1061_v39, %v1059_v38 }
 0x23a   : > { %3808 = vmatprep.subr.bf16.mxu1 %v3807_v41  ;;  %3896 = vmatprep.subr.bf16.mxu0 %v3895_v37  ;;  %v5006_v41 = vmov 1983009808  }
 0x23b   : > { %v1142_v42 = vunpack.c.l.s4 %v5006_v41 }
 0x23d   : > { %3810 = vmatpush1.bf16.msra.mxu1 %v3809_v46  ;;  %3898 = vmatpush1.bf16.msra.mxu0 %v3897_v40  ;;  %v1143_v44 = vunpack.c.0.s8 %v1142_v42  ;;  %v5007_v46 = vmov 1934713408  }
 0x23e   : > { %3812 = vmatprep.subr.bf16.mxu1 %v3811_v47  ;;  %v1173_v47 = vunpack.c.l.s4 %v5007_v46 }
 0x23f   : > { %v5579_v48 = vsub.s32 %v1143_v44, %v5576_v45 }
 0x240   : > { %1128 = vmatmul.mubr.f32.vlgmr.msra.gmra.mrb[0].mxu0 %v713_v17  ;;  %v1174_v49 = vunpack.c.0.s8 %v1173_v47 }
 0x241   : > { %3814 = vmatpush1.bf16.msra.mxu1 %v3813_v52  ;;  %1133 = vmatprep.mubr.f32.mxu0 %v716_v18 }
 0x242   : > { %3816 = vmatprep.subr.bf16.mxu1 %v3815_v53  ;;  %v5586_v14 = vsub.s32 %v1174_v49, %v5576_v45 }
 0x244   : > { %1134 = vmatmul.mubr.f32.gmra.mrb[2].mxu0 %v715_v19 }
 0x245   : > { %3818 = vmatpush1.bf16.msra.mxu1 %v3817_v57 }
 0x246   : > { %3820 = vmatprep.subr.bf16.mxu1 %v3819_v58 }
 0x249   : > { %3822 = vmatpush1.bf16.msra.mxu1 %v3821_v63 }
 0x24a   : > { %3824 = vmatprep.subr.bf16.mxu1 %v3823_v0 }
 0x24d   : > { %3826 = vmatpush1.bf16.msra.mxu1 %v3825_v5 }
 0x24e   : > { %3828 = vmatprep.subr.bf16.mxu1 %v3827_v6 }
 0x251   : > { %3830 = vmatpush1.bf16.msra.mxu1 %v3829_v11 }
 0x252   : > { %3832 = vmatprep.subr.bf16.mxu1 %v3831_v12 }
 0x255   : > { %3834 = vmatpush1.bf16.msra.mxu1 %v3833_v16 }
 0x258   : > { %987 = vmatmul.mubr.f32.vlgmr.msra.gmra.mrb[4].mxu1 %v713_v17 }
 0x259   : > { %992 = vmatprep.mubr.f32.mxu1 %v716_v18 }
 0x25c   : > { %993 = vmatmul.mubr.f32.gmra.mrb[6].mxu1 %v715_v19 }
 0x2eb   : > { %v847_v50 = vpop.f32.mrb[0].mxu1 }
 0x2ec   : > { %v1140_v52 = vcombine.high %v847_v50, %v5008_v51  ;;  %v1147_v53 = vrot.slane %v847_v50, %v5579_v48  ;;  %v849_v54 = vpop.f32.mrb[1].mxu1 }
 0x2ed   : > { %v1155_v55 = vcombine.high %v849_v54, %v5008_v51  ;;  %v1162_v56 = vrot.slane %v849_v54, %v5579_v48 }
 0x2ee   : > { %v1154_v57 = vrot.slane %v1140_v52, %v5579_v48 }
 0x2ef   : > { %v1169_v58 = vrot.slane %v1155_v55, %v5579_v48  ;;  %v1170_v59 = vcombine.low %v1147_v53, %v1162_v56  ;;  %v1171_v60 = vcombine.high %v1147_v53, %v1162_v56  ;;  %v853_v61 = vpop.f32.mrb[2].mxu1 }
 0x2f0   : > { %v1206_v62 = vcombine.high %v853_v61, %v5008_v51  ;;  %v1213_v63 = vrot.slane %v853_v61, %v5579_v48  ;;  %v855_v0 = vpop.f32.mrb[3].mxu1 }
 0x2f1   : > { %v1178_v1 = vrot.slane %v1170_v59, %v5586_v14  ;;  %v1185_v2 = vrot.slane %v1171_v60, %v5586_v14  ;;  %v1186_v3 = vcombine.low %v1154_v57, %v1169_v58  ;;  %v1187_v4 = vcombine.high %v1154_v57, %v1169_v58 }
 0x2f2   : > { %v1220_v5 = vrot.slane %v1206_v62, %v5579_v48  ;;  %v1221_v6 = vcombine.high %v855_v0, %v5008_v51  ;;  %v1228_v7 = vrot.slane %v855_v0, %v5579_v48 }
 0x2f3   : > { %v1194_v8 = vrot.slane %v1186_v3, %v5586_v14  ;;  %v1201_v9 = vrot.slane %v1187_v4, %v5586_v14  ;;  %v1272_v10 = vcombine.low %v1178_v1, %v1185_v2  ;;  %v3635_v11 = vcombine.high %v1178_v1, %v1185_v2 }
 0x2f4   : > { %v1235_v12 = vrot.slane %v1221_v6, %v5579_v48  ;;  %v1236_v13 = vcombine.low %v1213_v63, %v1228_v7  ;;  %v1237_v15 = vcombine.high %v1213_v63, %v1228_v7 }
 0x2f5   : > { %v1279_v16 = vrot.slane %v1272_v10, %v5579_v48  ;;  %v1287_v17 = vrot.slane %v3635_v11, %v5579_v48  ;;  %v1288_v18 = vcombine.low %v1194_v8, %v1201_v9  ;;  %v3636_v19 = vcombine.high %v1194_v8, %v1201_v9 }
 0x2f6   : > { %v1244_v20 = vrot.slane %v1236_v13, %v5586_v14  ;;  %v1251_v21 = vrot.slane %v1237_v15, %v5586_v14  ;;  %v1252_v22 = vcombine.low %v1220_v5, %v1235_v12  ;;  %v1253_v23 = vcombine.high %v1220_v5, %v1235_v12 }
 0x2f7   : > { %v1295_v24 = vrot.slane %v1288_v18, %v5579_v48  ;;  %v1303_v25 = vrot.slane %v3636_v19, %v5579_v48  ;;  %v1304_v26 = vcombine.low %v1279_v16, %v1287_v17 }
 0x2f8   : > { %v1260_v27 = vrot.slane %v1252_v22, %v5586_v14  ;;  %v1267_v28 = vrot.slane %v1253_v23, %v5586_v14  ;;  %v1322_v29 = vcombine.low %v1244_v20, %v1251_v21  ;;  %v3637_v30 = vcombine.high %v1244_v20, %v1251_v21 }
 0x2f9   : > { %v1312_v31 = vcombine.low %v1295_v24, %v1303_v25  ;;  %v1311_v36 = vrot.slane %v1304_v26, %v5586_v14 }
 0x2fa   : > { %v1329_v32 = vrot.slane %v1322_v29, %v5579_v48  ;;  %v1337_v33 = vrot.slane %v3637_v30, %v5579_v48  ;;  %v1338_v34 = vcombine.low %v1260_v27, %v1267_v28  ;;  %v3638_v35 = vcombine.high %v1260_v27, %v1267_v28 }
 0x2fb   : > { %v1319_v37 = vrot.slane %v1312_v31, %v5586_v14 }
 0x2fc   : > { %v1345_v38 = vrot.slane %v1338_v34, %v5579_v48  ;;  %v1353_v39 = vrot.slane %v3638_v35, %v5579_v48  ;;  %v1354_v40 = vcombine.low %v1329_v32, %v1337_v33 }
 0x2fd   : > { %v1320_v41 = vcombine.low %v1311_v36, %v1319_v37  ;;  %v1321_v42 = vcombine.high %v1311_v36, %v1319_v37 }
 0x2fe   : > { %v5615_v43 = vrot.slane %v1354_v40, %v5586_v14  ;;  %v1362_v44 = vcombine.low %v1345_v38, %v1353_v39 }
 0x2ff   : > { %3683 = vmatprep.mubr.f32.mxu0 %v1320_v41  ;;  %3690 = vmatprep.mubr.f32.mxu1 %v1321_v42 }
 0x300   : > { %v5618_v46 = vrot.slane %v1362_v44, %v5586_v14 }
 0x302   : > { %v1370_v47 = vcombine.low %v5615_v43, %v5618_v46  ;;  %v1371_v49 = vcombine.high %v5615_v43, %v5618_v46 }
 0x32b   : > { %v988_v50 = vpop.f32.mrb[4].mxu1 }
 0x32c   : > { %v1372_v52 = vcombine.high %v988_v50, %v5008_v51  ;;  %v1379_v53 = vrot.slane %v988_v50, %v5579_v48  ;;  %v990_v54 = vpop.f32.mrb[5].mxu1 }
 0x32d   : > { %v1387_v55 = vcombine.high %v990_v54, %v5008_v51  ;;  %v1394_v56 = vrot.slane %v990_v54, %v5579_v48 }
 0x32e   : > { %v1386_v57 = vrot.slane %v1372_v52, %v5579_v48 }
 0x32f   : > { %v1401_v58 = vrot.slane %v1387_v55, %v5579_v48  ;;  %v1402_v59 = vcombine.low %v1379_v53, %v1394_v56  ;;  %v1403_v60 = vcombine.high %v1379_v53, %v1394_v56  ;;  %v994_v61 = vpop.f32.mrb[6].mxu1 }
 0x330   : > { %v1438_v62 = vcombine.high %v994_v61, %v5008_v51  ;;  %v1445_v63 = vrot.slane %v994_v61, %v5579_v48  ;;  %v996_v0 = vpop.f32.mrb[7].mxu1 }
 0x331   : > { %v1410_v1 = vrot.slane %v1402_v59, %v5586_v14  ;;  %v1417_v2 = vrot.slane %v1403_v60, %v5586_v14  ;;  %v1418_v3 = vcombine.low %v1386_v57, %v1401_v58  ;;  %v1419_v4 = vcombine.high %v1386_v57, %v1401_v58  ;;  %v1129_v57 = vpop.f32.mrb[0].mxu0 }
 0x332   : > { %v1452_v5 = vrot.slane %v1438_v62, %v5579_v48  ;;  %v1453_v6 = vcombine.high %v996_v0, %v5008_v51  ;;  %v1460_v7 = vrot.slane %v996_v0, %v5579_v48  ;;  %v1604_v58 = vcombine.high %v1129_v57, %v5008_v51  ;;  %v1131_v60 = vpop.f32.mrb[1].mxu0 }
 0x333   : > { %v1426_v8 = vrot.slane %v1418_v3, %v5586_v14  ;;  %v1433_v9 = vrot.slane %v1419_v4, %v5586_v14  ;;  %v1504_v10 = vcombine.low %v1410_v1, %v1417_v2  ;;  %v3639_v11 = vcombine.high %v1410_v1, %v1417_v2 }
 0x334   : > { %v1467_v12 = vrot.slane %v1453_v6, %v5579_v48  ;;  %v1468_v13 = vcombine.low %v1445_v63, %v1460_v7  ;;  %v1469_v15 = vcombine.high %v1445_v63, %v1460_v7  ;;  %v1611_v59 = vrot.slane %v1129_v57, %v5579_v48 }
 0x335   : > { %v1511_v16 = vrot.slane %v1504_v10, %v5579_v48  ;;  %v1519_v17 = vrot.slane %v3639_v11, %v5579_v48  ;;  %v1520_v18 = vcombine.low %v1426_v8, %v1433_v9  ;;  %v3640_v19 = vcombine.high %v1426_v8, %v1433_v9 }
 0x336   : > { %v1476_v20 = vrot.slane %v1468_v13, %v5586_v14  ;;  %v1483_v21 = vrot.slane %v1469_v15, %v5586_v14  ;;  %v1484_v22 = vcombine.low %v1452_v5, %v1467_v12  ;;  %v1485_v23 = vcombine.high %v1452_v5, %v1467_v12 }
 0x337   : > { %v1527_v24 = vrot.slane %v1520_v18, %v5579_v48  ;;  %v1535_v25 = vrot.slane %v3640_v19, %v5579_v48  ;;  %v1536_v26 = vcombine.low %v1511_v16, %v1519_v17  ;;  %v1619_v61 = vcombine.high %v1131_v60, %v5008_v51 }
 0x338   : > { %v1492_v27 = vrot.slane %v1484_v22, %v5586_v14  ;;  %v1499_v28 = vrot.slane %v1485_v23, %v5586_v14  ;;  %v1554_v29 = vcombine.low %v1476_v20, %v1483_v21  ;;  %v3641_v30 = vcombine.high %v1476_v20, %v1483_v21 }
 0x339   : > { %v1544_v31 = vcombine.low %v1527_v24, %v1535_v25  ;;  %v1543_v36 = vrot.slane %v1536_v26, %v5586_v14  ;;  %v1626_v62 = vrot.slane %v1131_v60, %v5579_v48  ;;  %v1618_v63 = vrot.slane %v1604_v58, %v5579_v48 }
 0x33a   : > { %v1561_v32 = vrot.slane %v1554_v29, %v5579_v48  ;;  %v1569_v33 = vrot.slane %v3641_v30, %v5579_v48  ;;  %v1570_v34 = vcombine.low %v1492_v27, %v1499_v28  ;;  %v3642_v35 = vcombine.high %v1492_v27, %v1499_v28 }
 0x33b   : > { %v1551_v37 = vrot.slane %v1544_v31, %v5586_v14  ;;  %v1633_v0 = vrot.slane %v1619_v61, %v5579_v48  ;;  %v1634_v1 = vcombine.low %v1611_v59, %v1626_v62  ;;  %v1635_v2 = vcombine.high %v1611_v59, %v1626_v62 }
 0x33c   : > { %v1577_v38 = vrot.slane %v1570_v34, %v5579_v48  ;;  %v1585_v39 = vrot.slane %v3642_v35, %v5579_v48  ;;  %v1586_v40 = vcombine.low %v1561_v32, %v1569_v33 }
 0x33d   : > { %v1552_v41 = vcombine.low %v1543_v36, %v1551_v37  ;;  %v1553_v42 = vcombine.high %v1543_v36, %v1551_v37  ;;  %v1649_v4 = vrot.slane %v1635_v2, %v5586_v14  ;;  %v1650_v5 = vcombine.low %v1618_v63, %v1633_v0 }
 0x33e   : > { %v1594_v44 = vcombine.low %v1577_v38, %v1585_v39  ;;  %v1593_v50 = vrot.slane %v1586_v40, %v5586_v14  ;;  %v1651_v6 = vcombine.high %v1618_v63, %v1633_v0 }
 0x33f   : > { %v1658_v10 = vrot.slane %v1650_v5, %v5586_v14 }
 0x340   : > { %v1601_v52 = vrot.slane %v1594_v44, %v5586_v14  ;;  %v1665_v11 = vrot.slane %v1651_v6, %v5586_v14 }
 0x342   : > { %v1602_v53 = vcombine.low %v1593_v50, %v1601_v52  ;;  %v1603_v54 = vcombine.high %v1593_v50, %v1601_v52  ;;  %v1752_v18 = vcombine.low %v1658_v10, %v1665_v11  ;;  %v3644_v19 = vcombine.high %v1658_v10, %v1665_v11 }
 0x344   : > { %v3899_v55 = vpack.c.bf16 %v1602_v53, %v1552_v41  ;;  %v3903_v56 = vpack.c.bf16 %v1603_v54, %v1553_v42  ;;  %v1759_v32 = vrot.slane %v1752_v18, %v5579_v48  ;;  %v1767_v33 = vrot.slane %v3644_v19, %v5579_v48 }
 0x346   : > { %3900 = vmatprep.subr.bf16.mxu0 %v3899_v55  ;;  %3904 = vmatprep.subr.bf16.mxu1 %v3903_v56  ;;  %v1776_v39 = vcombine.low %v1759_v32, %v1767_v33 }
 0x347   : > { %3902 = vmatpush3.bf16.xpose.msra.mxu0 %v3899_v55  ;;  %3906 = vmatpush3.bf16.xpose.msra.mxu1 %v3903_v56 }
 0x348   : > { %v1783_v44 = vrot.slane %v1776_v39, %v5586_v14  ;;  %v2434_v39 = vld [vmem:[#allocation11 + $0x28] sm:$0xff] }
 0x34e   : > { %3684 = vmatmul.mubr.f32.vlgmr.msra.gmra.mrb[4].mxu0 %v1370_v47  ;;  %3691 = vmatmul.mubr.f32.vlgmr.msra.gmra.mrb[8].mxu1 %v1371_v49  ;;  %v1135_v47 = vpop.f32.mrb[2].mxu0  ;;  %v1642_v49 = vrot.slane %v1634_v1, %v5586_v14 }
 0x34f   : > { %v1670_v3 = vcombine.high %v1135_v47, %v5008_v51  ;;  %v1677_v43 = vrot.slane %v1135_v47, %v5579_v48  ;;  %v1137_v46 = vpop.f32.mrb[3].mxu0 }
 0x350   : > { %v1685_v8 = vcombine.high %v1137_v46, %v5008_v51  ;;  %v1692_v9 = vrot.slane %v1137_v46, %v5579_v48  ;;  %v1736_v12 = vcombine.low %v1642_v49, %v1649_v4  ;;  %v3643_v13 = vcombine.high %v1642_v49, %v1649_v4 }
 0x351   : > { %v1684_v7 = vrot.slane %v1670_v3, %v5579_v48 }
 0x352   : > { %v1699_v15 = vrot.slane %v1685_v8, %v5579_v48  ;;  %v1700_v16 = vcombine.low %v1677_v43, %v1692_v9  ;;  %v1701_v17 = vcombine.high %v1677_v43, %v1692_v9  ;;  %v1743_v30 = vrot.slane %v1736_v12, %v5579_v48 }
 0x353   : > { %v1751_v31 = vrot.slane %v3643_v13, %v5579_v48 }
 0x354   : > { %v1708_v20 = vrot.slane %v1700_v16, %v5586_v14  ;;  %v1715_v21 = vrot.slane %v1701_v17, %v5586_v14  ;;  %v1716_v22 = vcombine.low %v1684_v7, %v1699_v15  ;;  %v1717_v23 = vcombine.high %v1684_v7, %v1699_v15 }
 0x355   : > { %v1768_v38 = vcombine.low %v1743_v30, %v1751_v31 }
 0x356   : > { %v1724_v24 = vrot.slane %v1716_v22, %v5586_v14  ;;  %v1731_v25 = vrot.slane %v1717_v23, %v5586_v14  ;;  %v1786_v26 = vcombine.low %v1708_v20, %v1715_v21  ;;  %v3645_v27 = vcombine.high %v1708_v20, %v1715_v21 }
 0x357   : > { %v1775_v42 = vrot.slane %v1768_v38, %v5586_v14 }
 0x358   : > { %v1802_v28 = vcombine.low %v1724_v24, %v1731_v25  ;;  %v3646_v29 = vcombine.high %v1724_v24, %v1731_v25  ;;  %v1793_v34 = vrot.slane %v1786_v26, %v5579_v48  ;;  %v1801_v35 = vrot.slane %v3645_v27, %v5579_v48  ;;  %v2430_v24 = vld [vmem:[#allocation11 + $0x8] sm:$0xff]  ;;  %v2432_v25 = vld [vmem:[#allocation11 + $0x18] sm:$0xff] }
 0x359   : > { %v1784_v53 = vcombine.low %v1775_v42, %v1783_v44  ;;  %v1785_v54 = vcombine.high %v1775_v42, %v1783_v44  ;;  %v3915_v26 = vpack.c.bf16 %v2432_v25, %v2430_v24  ;;  %v2464_v24 = vld [vmem:[#allocation11 + $0x118] sm:$0xff] }
 0x35a   : > { %v1809_v36 = vrot.slane %v1802_v28, %v5579_v48  ;;  %v1817_v37 = vrot.slane %v3646_v29, %v5579_v48  ;;  %v1818_v40 = vcombine.low %v1793_v34, %v1801_v35 }
 0x35c   : > { %v1826_v41 = vcombine.low %v1809_v36, %v1817_v37  ;;  %v1825_v50 = vrot.slane %v1818_v40, %v5586_v14  ;;  %v2429_v36 = vld [vmem:[#allocation11] sm:$0xff]  ;;  %v2431_v37 = vld [vmem:[#allocation11 + $0x10] sm:$0xff]  ;;  %v2436_v40 = vld [vmem:[#allocation11 + $0x38] sm:$0xff] }
 0x35d   : > { %v3917_v42 = vpack.c.bf16 %v2431_v37, %v2429_v36  ;;  %v2470_v36 = vld [vmem:[#allocation11 + $0x148] sm:$0xff]  ;;  %v2472_v37 = vld [vmem:[#allocation11 + $0x158] sm:$0xff] }
 0x35e   : > { %v1833_v52 = vrot.slane %v1826_v41, %v5586_v14 }
 0x360   : > { %v1834_v55 = vcombine.low %v1825_v50, %v1833_v52  ;;  %v1835_v56 = vcombine.high %v1825_v50, %v1833_v52  ;;  %v3919_v50 = vpack.c.bf16 %v2436_v40, %v2434_v39  ;;  %v2433_v52 = vld [vmem:[#allocation11 + $0x20] sm:$0xff]  ;;  %v2471_v40 = vld [vmem:[#allocation11 + $0x150] sm:$0xff] }
 0x361   : > { %v2469_v39 = vld [vmem:[#allocation11 + $0x140] sm:$0xff] }
 0x362   : > { %v3907_v57 = vpack.c.bf16 %v1834_v55, %v1784_v53  ;;  %v3911_v58 = vpack.c.bf16 %v1835_v56, %v1785_v54  ;;  %v2435_v53 = vld [vmem:[#allocation11 + $0x30] sm:$0xff]  ;;  %v2438_v54 = vld [vmem:[#allocation11 + $0x48] sm:$0xff]  ;;  %v2440_v55 = vld [vmem:[#allocation11 + $0x58] sm:$0xff] }
 0x363   : > { %v3921_v56 = vpack.c.bf16 %v2435_v53, %v2433_v52  ;;  %v2473_v52 = vld [vmem:[#allocation11 + $0x160] sm:$0xff]  ;;  %v2475_v53 = vld [vmem:[#allocation11 + $0x170] sm:$0xff] }
 0x364   : > { %3908 = vmatprep.subr.bf16.mxu0 %v3907_v57  ;;  %3912 = vmatprep.subr.bf16.mxu1 %v3911_v58 }
 0x365   : > { %3910 = vmatpush3.bf16.msra.mxu0 %v3907_v57  ;;  %3914 = vmatpush3.bf16.msra.mxu1 %v3911_v58  ;;  %v3923_v57 = vpack.c.bf16 %v2440_v55, %v2438_v54  ;;  %v2437_v58 = vld [vmem:[#allocation11 + $0x40] sm:$0xff]  ;;  %v3961_v54 = vpack.c.bf16 %v2475_v53, %v2473_v52  ;;  %v2478_v55 = vld [vmem:[#allocation11 + $0x188] sm:$0xff] }
 0x366   : > { %3916 = vmatprep.subr.bf16.mxu1 %v3915_v26 }
 0x421   : > { %v3685_v59 = vpop.f32.mrb[4].mxu0  ;;  %v3692_v60 = vpop.f32.mrb[8].mxu1 }
 0x422   : > { %v1987_v61 = vmul.f32 0.0625, %v3685_v59  ;;  %v1902_v62 = vpop.f32.mrb[5].mxu0  ;;  %v1977_v63 = vpop.f32.mrb[9].mxu1  ;;  %v1989_v1 = vmul.f32 0.0625, %v3692_v60  ;;  %v2439_v59 = vld [vmem:[#allocation11 + $0x50] sm:$0xff]  ;;  %v2442_v60 = vld [vmem:[#allocation11 + $0x68] sm:$0xff] }
 0x423   : > { %v1986_v0 = vmul.f32 0.0625, %v1902_v62  ;;  %v1988_v47 = vmul.f32 0.0625, %v1977_v63  ;;  %v3925_v62 = vpack.c.bf16 %v2439_v59, %v2437_v58  ;;  %v2477_v58 = vld [vmem:[#allocation11 + $0x180] sm:$0xff]  ;;  %v2479_v59 = vld [vmem:[#allocation11 + $0x190] sm:$0xff] }
 0x424   : > { %v1994_v2 = vsel %vm1990_vm0, %v1987_v61, -inf  ;;  %v2000_v43 = vsel %vm1990_vm0, %v1989_v1, -inf }
 0x425   : > { %1995 = vmax.xlane.f32.xlu1 %v1994_v2  ;;  %v1991_v3 = vsel %vm1990_vm0, %v1986_v0, -inf  ;;  %v1997_v46 = vsel %vm1990_vm0, %v1988_v47, -inf  ;;  %v2446_v2 = vld [vmem:[#allocation11 + $0x88] sm:$0xff] }
 0x426   : > { %1992 = vmax.xlane.f32.xlu0 %v1991_v3 }
 0x429   : > { %2001 = vmax.xlane.f32.xlu1 %v2000_v43 }
 0x42a   : > { %1998 = vmax.xlane.f32.xlu0 %v1997_v46  ;;  %v2445_v46 = vld [vmem:[#allocation11 + $0x80] sm:$0xff] }
 0x4b2   : > { %v1996_v49 = vpop.xlane.xlu1 %1995 }
 0x4b3   : > { %v2004_v4 = vsub.f32 %v1987_v61, %v1996_v49  ;;  %v1993_v5 = vpop.xlane.xlu0 %1992  ;;  %v2444_v61 = vld [vmem:[#allocation11 + $0x78] sm:$0xff]  ;;  %v2447_v49 = vld [vmem:[#allocation11 + $0x90] sm:$0xff] }
 0x4b4   : > { %v2003_v6 = vsub.f32 %v1986_v0, %v1993_v5  ;;  %v3927_v63 = vpack.c.bf16 %v2444_v61, %v2442_v60  ;;  %v2441_v0 = vld [vmem:[#allocation11 + $0x60] sm:$0xff]  ;;  %v2452_v5 = vld [vmem:[#allocation11 + $0xb8] sm:$0xff]  ;;  %v3965_v60 = vpack.c.bf16 %v2479_v59, %v2477_v58  ;;  %v2482_v61 = vld [vmem:[#allocation11 + $0x1a8] sm:$0xff] }
 0x4b5   : > { %v2009_v7 = vmul.f32 1.442695, %v2004_v4  ;;  %v2450_v4 = vld [vmem:[#allocation11 + $0xa8] sm:$0xff] }
 0x4b6   : > { %v2007_v8 = vmul.f32 1.442695, %v2003_v6  ;;  %v2002_v9 = vpop.xlane.xlu1 %2001  ;;  %v3933_v6 = vpack.c.bf16 %v2447_v49, %v2445_v46  ;;  %v2487_v49 = vld [vmem:[#allocation11 + $0x1d0] sm:$0xff] }
 0x4b7   : > { %v2006_v10 = vsub.f32 %v1989_v1, %v2002_v9  ;;  %v1999_v11 = vpop.xlane.xlu0 %1998  ;;  %v2443_v1 = vld [vmem:[#allocation11 + $0x70] sm:$0xff] }
 0x4b8   : > { %4440 = vpow2.f32 %v2007_v8  ;;  %v2005_v12 = vsub.f32 %v1988_v47, %v1999_v11  ;;  %v2448_v47 = vld [vmem:[#allocation11 + $0x98] sm:$0xff]  ;;  %v3929_v3 = vpack.c.bf16 %v2443_v1, %v2441_v0  ;;  %v2449_v8 = vld [vmem:[#allocation11 + $0xa0] sm:$0xff]  ;;  %v2451_v9 = vld [vmem:[#allocation11 + $0xb0] sm:$0xff] }
 0x4b9   : > { %4442 = vpow2.f32 %v2009_v7  ;;  %v2013_v13 = vmul.f32 1.442695, %v2006_v10  ;;  %v3931_v43 = vpack.c.bf16 %v2448_v47, %v2446_v2  ;;  %v3935_v7 = vpack.c.bf16 %v2452_v5, %v2450_v4  ;;  %v2454_v10 = vld [vmem:[#allocation11 + $0xc8] sm:$0xff]  ;;  %v2456_v11 = vld [vmem:[#allocation11 + $0xd8] sm:$0xff]  ;;  %v2481_v0 = vld [vmem:[#allocation11 + $0x1a0] sm:$0xff] }
 0x4ba   : > { %v2011_v15 = vmul.f32 1.442695, %v2005_v12  ;;  %v3937_v12 = vpack.c.bf16 %v2451_v9, %v2449_v8  ;;  %v2483_v1 = vld [vmem:[#allocation11 + $0x1b0] sm:$0xff]  ;;  %v2486_v47 = vld [vmem:[#allocation11 + $0x1c8] sm:$0xff]  ;;  %v2492_v5 = vld [vmem:[#allocation11 + $0x1f8] sm:$0xff] }
 0x4bb   : > { %v3969_v2 = vpack.c.bf16 %v2483_v1, %v2481_v0  ;;  %v2490_v4 = vld [vmem:[#allocation11 + $0x1e8] sm:$0xff]  ;;  %v2489_v8 = vld [vmem:[#allocation11 + $0x1e0] sm:$0xff]  ;;  %v2491_v9 = vld [vmem:[#allocation11 + $0x1f0] sm:$0xff] }
 0x4bc   : > { %4444 = vpow2.f32 %v2011_v15  ;;  %v2453_v15 = vld [vmem:[#allocation11 + $0xc0] sm:$0xff] }
 0x4bd   : > { %4446 = vpow2.f32 %v2013_v13  ;;  %v3939_v13 = vpack.c.bf16 %v2456_v11, %v2454_v10  ;;  %v3977_v10 = vpack.c.bf16 %v2491_v9, %v2489_v8 }
 0x4c2   : > { %v4441_v16 = vpop.eup %4440 }
 0x4c3   : > { %v2015_v17 = vsel %vm1990_vm0, %v4441_v16, 0.0  ;;  %v4443_v18 = vpop.eup %4442 }
 0x4c4   : > { %2016 = vadd.xlane.f32.xlu0 %v2015_v17  ;;  %v2018_v20 = vsel %vm1990_vm0, %v4443_v18, 0.0  ;;  %v2458_v17 = vld [vmem:[#allocation11 + $0xe8] sm:$0xff] }
 0x4c6   : > { %v4445_v19 = vpop.eup %4444 }
 0x4c7   : > { %v2021_v21 = vsel %vm1990_vm0, %v4445_v19, 0.0  ;;  %v4447_v22 = vpop.eup %4446 }
 0x4c8   : > { %2019 = vadd.xlane.f32.xlu0 %v2018_v20  ;;  %2022 = vadd.xlane.f32.xlu1 %v2021_v21  ;;  %v2024_v23 = vsel %vm1990_vm0, %v4447_v22, 0.0  ;;  %v2457_v21 = vld [vmem:[#allocation11 + $0xe0] sm:$0xff] }
 0x4cc   : > { %2025 = vadd.xlane.f32.xlu1 %v2024_v23  ;;  %v2462_v23 = vld [vmem:[#allocation11 + $0x108] sm:$0xff] }
 0x4cd   : > { %v3947_v26 = vpack.c.bf16 %v2464_v24, %v2462_v23 }
 0x551   : > { %v2017_v27 = vpop.xlane.xlu0 %2016 }
 0x552   : > { %4448 = vrcp.f32 %v2017_v27  ;;  %v2461_v27 = vld [vmem:[#allocation11 + $0x100] sm:$0xff] }
 0x555   : > { %v2023_v28 = vpop.xlane.xlu1 %2022  ;;  %v2020_v29 = vpop.xlane.xlu0 %2019 }
 0x556   : > { %4450 = vrcp.f32 %v2023_v28  ;;  %v2463_v28 = vld [vmem:[#allocation11 + $0x110] sm:$0xff] }
 0x557   : > { %4452 = vrcp.f32 %v2020_v29  ;;  %v2466_v29 = vld [vmem:[#allocation11 + $0x128] sm:$0xff] }
 0x559   : > { %v2026_v30 = vpop.xlane.xlu1 %2025 }
 0x55a   : > { %4454 = vrcp.f32 %v2026_v30  ;;  %v2468_v30 = vld [vmem:[#allocation11 + $0x138] sm:$0xff] }
 0x55c   : > { %v4449_v31 = vpop.eup %4448 }
 0x55d   : > { %v2031_v32 = vmul.f32 %v4449_v31, %v4441_v16  ;;  %v2455_v16 = vld [vmem:[#allocation11 + $0xd0] sm:$0xff]  ;;  %v3949_v31 = vpack.c.bf16 %v2463_v28, %v2461_v27 }
 0x55f   : > { %3697 = vmatprep.mubr.msk.f32.mxu0 %vm1990_vm0, %v2031_v32  ;;  %v3951_v32 = vpack.c.bf16 %v2468_v30, %v2466_v29 }
 0x560   : > { %v4451_v33 = vpop.eup %4450 }
 0x561   : > { %v4453_v34 = vpop.eup %4452  ;;  %v2033_v35 = vmul.f32 %v4451_v33, %v4445_v19  ;;  %v3941_v19 = vpack.c.bf16 %v2455_v16, %v2453_v15  ;;  %v2465_v33 = vld [vmem:[#allocation11 + $0x120] sm:$0xff] }
 0x562   : > { %v2032_v38 = vmul.f32 %v4453_v34, %v4443_v18  ;;  %v2460_v18 = vld [vmem:[#allocation11 + $0xf8] sm:$0xff]  ;;  %v2467_v34 = vld [vmem:[#allocation11 + $0x130] sm:$0xff] }
 0x563   : > { %3704 = vmatprep.mubr.msk.f32.mxu1 %vm1990_vm0, %v2033_v35  ;;  %v3943_v20 = vpack.c.bf16 %v2460_v18, %v2458_v17  ;;  %v3953_v35 = vpack.c.bf16 %v2467_v34, %v2465_v33 }
 0x564   : > { %v4455_v41 = vpop.eup %4454  ;;  %3698 = vmatmul.mubr.msk.f32.vlgmr.msra.gmra.mrb[6].mxu0 %vm1990_vm0, %v2032_v38  ;;  %v3955_v38 = vpack.c.bf16 %v2472_v37, %v2470_v36 }
 0x565   : > { %v2034_v44 = vmul.f32 %v4455_v41, %v4447_v22  ;;  %v2459_v22 = vld [vmem:[#allocation11 + $0xf0] sm:$0xff]  ;;  %v3957_v41 = vpack.c.bf16 %v2471_v40, %v2469_v39 }
 0x566   : > { %v3945_v25 = vpack.c.bf16 %v2459_v22, %v2457_v21 }
 0x567   : > { %3705 = vmatmul.mubr.msk.f32.vlgmr.msra.gmra.mrb[10].mxu1 %vm1990_vm0, %v2034_v44  ;;  %v2476_v44 = vld [vmem:[#allocation11 + $0x178] sm:$0xff] }
 0x568   : > { %3918 = vmatpush1.bf16.msra.mxu1 %v3917_v42  ;;  %v2474_v42 = vld [vmem:[#allocation11 + $0x168] sm:$0xff] }
 0x569   : > { %3920 = vmatprep.subr.bf16.mxu1 %v3919_v50  ;;  %v3959_v50 = vpack.c.bf16 %v2476_v44, %v2474_v42 }
 0x56c   : > { %3922 = vmatpush1.bf16.msra.mxu1 %v3921_v56  ;;  %v2480_v56 = vld [vmem:[#allocation11 + $0x198] sm:$0xff] }
 0x56d   : > { %3924 = vmatprep.subr.bf16.mxu1 %v3923_v57  ;;  %v3963_v57 = vpack.c.bf16 %v2480_v56, %v2478_v55 }
 0x570   : > { %3926 = vmatpush1.bf16.msra.mxu1 %v3925_v62  ;;  %v2484_v62 = vld [vmem:[#allocation11 + $0x1b8] sm:$0xff] }
 0x571   : > { %3928 = vmatprep.subr.bf16.mxu1 %v3927_v63  ;;  %v3967_v63 = vpack.c.bf16 %v2484_v62, %v2482_v61 }
 0x574   : > { %3930 = vmatpush1.bf16.msra.mxu1 %v3929_v3  ;;  %v2488_v3 = vld [vmem:[#allocation11 + $0x1d8] sm:$0xff] }
 0x575   : > { %3932 = vmatprep.subr.bf16.mxu1 %v3931_v43  ;;  %v2485_v43 = vld [vmem:[#allocation11 + $0x1c0] sm:$0xff]  ;;  %v3971_v46 = vpack.c.bf16 %v2488_v3, %v2486_v47 }
 0x578   : > { %3934 = vmatpush1.bf16.msra.mxu1 %v3933_v6  ;;  %v3973_v6 = vpack.c.bf16 %v2487_v49, %v2485_v43 }
 0x579   : > { %3936 = vmatprep.subr.bf16.mxu1 %v3935_v7  ;;  %v3975_v7 = vpack.c.bf16 %v2492_v5, %v2490_v4 }
 0x57c   : > { %3938 = vmatpush1.bf16.msra.mxu1 %v3937_v12 }
 0x57d   : > { %3940 = vmatprep.subr.bf16.mxu1 %v3939_v13 }
 0x580   : > { %3942 = vmatpush1.bf16.msra.mxu1 %v3941_v19 }
 0x581   : > { %3944 = vmatprep.subr.bf16.mxu1 %v3943_v20 }
 0x584   : > { %3946 = vmatpush1.bf16.msra.mxu1 %v3945_v25 }
 0x585   : > { %3948 = vmatprep.subr.bf16.mxu1 %v3947_v26 }
 0x588   : > { %3950 = vmatpush1.bf16.msra.mxu1 %v3949_v31 }
 0x589   : > { %3952 = vmatprep.subr.bf16.mxu1 %v3951_v32 }
 0x58c   : > { %3954 = vmatpush1.bf16.msra.mxu1 %v3953_v35 }
 0x58d   : > { %3956 = vmatprep.subr.bf16.mxu1 %v3955_v38 }
 0x590   : > { %3958 = vmatpush1.bf16.msra.mxu1 %v3957_v41 }
 0x591   : > { %3960 = vmatprep.subr.bf16.mxu1 %v3959_v50 }
 0x594   : > { %3962 = vmatpush1.bf16.msra.mxu1 %v3961_v54 }
 0x595   : > { %3964 = vmatprep.subr.bf16.mxu1 %v3963_v57 }
 0x598   : > { %3966 = vmatpush1.bf16.msra.mxu1 %v3965_v60 }
 0x599   : > { %3968 = vmatprep.subr.bf16.mxu1 %v3967_v63 }
 0x59c   : > { %3970 = vmatpush1.bf16.msra.mxu1 %v3969_v2 }
 0x59d   : > { %3972 = vmatprep.subr.bf16.mxu1 %v3971_v46 }
 0x5a0   : > { %3974 = vmatpush1.bf16.msra.mxu1 %v3973_v6 }
 0x5a1   : > { %3976 = vmatprep.subr.bf16.mxu1 %v3975_v7 }
 0x5a4   : > { %3978 = vmatpush1.bf16.msra.mxu1 %v3977_v10  ;;  %v2663_v10 = vld [vmem:[#allocation16 + $0x28] sm:$0xff] }
 0x637   : > { %v3699_v11 = vpop.f32.mrb[6].mxu0 }
 0x638   : > { %v2107_v12 = vpop.f32.mrb[7].mxu0  ;;  %v2263_v13 = vcombine.high %v3699_v11, %v5008_v51  ;;  %v2270_v17 = vrot.slane %v3699_v11, %v5579_v48  ;;  %v2661_v11 = vld [vmem:[#allocation16 + $0x18] sm:$0xff] }
 0x639   : > { %v2197_v15 = vcombine.high %v2107_v12, %v5008_v51  ;;  %v2204_v21 = vrot.slane %v2107_v12, %v5579_v48 }
 0x63a   : > { %v3706_v16 = vpop.f32.mrb[10].mxu1  ;;  %v2277_v24 = vrot.slane %v2263_v13, %v5579_v48  ;;  %v2665_v13 = vld [vmem:[#allocation16 + $0x38] sm:$0xff] }
 0x63b   : > { %v2278_v18 = vcombine.high %v3706_v16, %v5008_v51  ;;  %v2285_v19 = vrot.slane %v3706_v16, %v5579_v48  ;;  %v2188_v20 = vpop.f32.mrb[11].mxu1  ;;  %v2211_v28 = vrot.slane %v2197_v15, %v5579_v48  ;;  %v2658_v15 = vld [vmem:[#allocation16] sm:$0xff] }
 0x63c   : > { %v2212_v22 = vcombine.high %v2188_v20, %v5008_v51  ;;  %v2219_v23 = vrot.slane %v2188_v20, %v5579_v48  ;;  %v2662_v16 = vld [vmem:[#allocation16 + $0x20] sm:$0xff]  ;;  %v2664_v20 = vld [vmem:[#allocation16 + $0x30] sm:$0xff] }
 0x63d   : > { %v2292_v25 = vrot.slane %v2278_v18, %v5579_v48  ;;  %v2293_v26 = vcombine.low %v2270_v17, %v2285_v19  ;;  %v2294_v27 = vcombine.high %v2270_v17, %v2285_v19  ;;  %v4043_v17 = vpack.c.bf16 %v2665_v13, %v2661_v11  ;;  %v2660_v19 = vld [vmem:[#allocation16 + $0x10] sm:$0xff]  ;;  %v4472_v13 = vld [vmem:[%s5522_s5] sm:$0xff] }
 0x63e   : > { %v2226_v29 = vrot.slane %v2212_v22, %v5579_v48  ;;  %v2227_v30 = vcombine.low %v2204_v21, %v2219_v23  ;;  %v2228_v31 = vcombine.high %v2204_v21, %v2219_v23  ;;  %v3981_v18 = vpack.c.bf16 %v2662_v16, %v2658_v15  ;;  %v2671_v22 = vld [vmem:[#allocation16 + $0x68] sm:$0xff]  ;;  %v2669_v23 = vld [vmem:[#allocation16 + $0x58] sm:$0xff] }
 0x63f   : > { %v2301_v32 = vrot.slane %v2293_v26, %v5586_v14  ;;  %v2308_v33 = vrot.slane %v2294_v27, %v5586_v14  ;;  %v2309_v34 = vcombine.low %v2277_v24, %v2292_v25  ;;  %v2310_v51 = vcombine.high %v2277_v24, %v2292_v25  ;;  %v2673_v24 = vld [vmem:[#allocation16 + $0x78] sm:$0xff]  ;;  %4044 = vmatprep.subr.bf16.mxu1 %v4043_v17  ;;  %v2666_v27 = vld [vmem:[#allocation16 + $0x40] sm:$0xff] }
 0x640   : > { %v2235_v35 = vrot.slane %v2227_v30, %v5586_v14  ;;  %v2242_v36 = vrot.slane %v2228_v31, %v5586_v14  ;;  %v2243_v37 = vcombine.low %v2211_v28, %v2226_v29  ;;  %v2244_v38 = vcombine.high %v2211_v28, %v2226_v29  ;;  %v2670_v28 = vld [vmem:[#allocation16 + $0x60] sm:$0xff]  ;;  %v2668_v29 = vld [vmem:[#allocation16 + $0x50] sm:$0xff] }
 0x641   : > { %v2317_v39 = vrot.slane %v2309_v34, %v5586_v14  ;;  %v2324_v40 = vrot.slane %v2310_v51, %v5586_v14  ;;  %v2379_v41 = vcombine.low %v2301_v32, %v2308_v33  ;;  %v3653_v42 = vcombine.high %v2301_v32, %v2308_v33  ;;  %v2672_v31 = vld [vmem:[#allocation16 + $0x70] sm:$0xff]  ;;  %v2675_v32 = vld [vmem:[#allocation16 + $0x88] sm:$0xff] }
 0x642   : > { %v2251_v44 = vrot.slane %v2243_v37, %v5586_v14  ;;  %v2258_v50 = vrot.slane %v2244_v38, %v5586_v14  ;;  %v2329_v52 = vcombine.low %v2235_v35, %v2242_v36  ;;  %v3651_v53 = vcombine.high %v2235_v35, %v2242_v36  ;;  %v2679_v33 = vld [vmem:[#allocation16 + $0xa8] sm:$0xff]  ;;  %v2677_v35 = vld [vmem:[#allocation16 + $0x98] sm:$0xff]  ;;  %v2674_v37 = vld [vmem:[#allocation16 + $0x80] sm:$0xff] }
 0x643   : > { %v2386_v54 = vrot.slane %v2379_v41, %v5579_v48  ;;  %v2394_v55 = vrot.slane %v3653_v42, %v5579_v48  ;;  %v2395_v56 = vcombine.low %v2317_v39, %v2324_v40  ;;  %v3654_v57 = vcombine.high %v2317_v39, %v2324_v40  ;;  %v2681_v36 = vld [vmem:[#allocation16 + $0xb8] sm:$0xff]  ;;  %v2678_v39 = vld [vmem:[#allocation16 + $0xa0] sm:$0xff]  ;;  %v2676_v40 = vld [vmem:[#allocation16 + $0x90] sm:$0xff] }
 0x644   : > { %v2336_v58 = vrot.slane %v2329_v52, %v5579_v48  ;;  %v2344_v59 = vrot.slane %v3651_v53, %v5579_v48  ;;  %v2345_v60 = vcombine.low %v2251_v44, %v2258_v50  ;;  %v3652_v61 = vcombine.high %v2251_v44, %v2258_v50  ;;  %v2680_v41 = vld [vmem:[#allocation16 + $0xb0] sm:$0xff]  ;;  %v2683_v44 = vld [vmem:[#allocation16 + $0xc8] sm:$0xff]  ;;  %v2685_v52 = vld [vmem:[#allocation16 + $0xd8] sm:$0xff] }
 0x645   : > { %v2402_v62 = vrot.slane %v2395_v56, %v5579_v48  ;;  %v2410_v63 = vrot.slane %v3654_v57, %v5579_v48  ;;  %v2411_v0 = vcombine.low %v2386_v54, %v2394_v55  ;;  %v4045_v21 = vpack.c.bf16 %v2664_v20, %v2660_v19  ;;  %v2687_v50 = vld [vmem:[#allocation16 + $0xe8] sm:$0xff]  ;;  %v2689_v55 = vld [vmem:[#allocation16 + $0xf8] sm:$0xff]  ;;  %v2682_v56 = vld [vmem:[#allocation16 + $0xc0] sm:$0xff] }
 0x646   : > { %v2352_v1 = vrot.slane %v2345_v60, %v5579_v48  ;;  %v2360_v2 = vrot.slane %v3652_v61, %v5579_v48  ;;  %v2361_v47 = vcombine.low %v2336_v58, %v2344_v59  ;;  %v2659_v48 = vld [vmem:[#allocation16 + $0x8] sm:$0xff]  ;;  %v4047_v26 = vpack.c.bf16 %v2673_v24, %v2669_v23  ;;  %v2686_v57 = vld [vmem:[#allocation16 + $0xe0] sm:$0xff]  ;;  %v2684_v59 = vld [vmem:[#allocation16 + $0xd0] sm:$0xff] }
 0x647   : > { %v2419_v3 = vcombine.low %v2402_v62, %v2410_v63  ;;  %v2418_v46 = vrot.slane %v2411_v0, %v5586_v14  ;;  %v3979_v12 = vpack.c.bf16 %v2663_v10, %v2659_v48  ;;  %v3985_v30 = vpack.c.bf16 %v2670_v28, %v2666_v27  ;;  %v2688_v60 = vld [vmem:[#allocation16 + $0xf0] sm:$0xff]  ;;  %v2691_v61 = vld [vmem:[#allocation16 + $0x108] sm:$0xff]  ;;  %v2693_v63 = vld [vmem:[#allocation16 + $0x118] sm:$0xff] }
 0x648   : > { %v2369_v43 = vcombine.low %v2352_v1, %v2360_v2  ;;  %v2368_v4 = vrot.slane %v2361_v47, %v5586_v14  ;;  %v4049_v34 = vpack.c.bf16 %v2672_v31, %v2668_v29  ;;  %v3987_v51 = vpack.c.bf16 %v2679_v33, %v2675_v32  ;;  %v2695_v62 = vld [vmem:[#allocation16 + $0x128] sm:$0xff]  ;;  %v2697_v0 = vld [vmem:[#allocation16 + $0x138] sm:$0xff]  ;;  %v2698_v32 = vld [vmem:[#allocation16 + $0x140] sm:$0xff] }
 0x649   : > { %v2426_v49 = vrot.slane %v2419_v3, %v5586_v14  ;;  %3980 = vmatprep.subr.bf16.mxu0 %v3979_v12  ;;  %v4051_v38 = vpack.c.bf16 %v2681_v36, %v2677_v35  ;;  %v3989_v42 = vpack.c.bf16 %v2678_v39, %v2674_v37  ;;  %v4053_v53 = vpack.c.bf16 %v2680_v41, %v2676_v40  ;;  %v2690_v3 = vld [vmem:[#allocation16 + $0x100] sm:$0xff]  ;;  %v2704_v35 = vld [vmem:[#allocation16 + $0x170] sm:$0xff]  ;;  %v2707_v37 = vld [vmem:[#allocation16 + $0x188] sm:$0xff] }
 0x64a   : > { %v2376_v5 = vrot.slane %v2369_v43, %v5586_v14  ;;  %v2667_v14 = vld [vmem:[#allocation16 + $0x48] sm:$0xff]  ;;  %3982 = vmatpush1.bf16.msra.mxu0 %v3981_v18  ;;  %v3991_v54 = vpack.c.bf16 %v2687_v50, %v2683_v44  ;;  %v4055_v58 = vpack.c.bf16 %v2689_v55, %v2685_v52  ;;  %v3993_v1 = vpack.c.bf16 %v2686_v57, %v2682_v56  ;;  %v2694_v43 = vld [vmem:[#allocation16 + $0x120] sm:$0xff]  ;;  %v2709_v39 = vld [vmem:[#allocation16 + $0x198] sm:$0xff] }
 0x64b   : > { %v2428_v6 = vcombine.high %v2418_v46, %v2426_v49  ;;  %v2427_v7 = vcombine.low %v2418_v46, %v2426_v49  ;;  %v3983_v25 = vpack.c.bf16 %v2671_v22, %v2667_v14  ;;  %v4057_v2 = vpack.c.bf16 %v2688_v60, %v2684_v59  ;;  %v2692_v46 = vld [vmem:[#allocation16 + $0x110] sm:$0xff]  ;;  %v4473_v17 = vld [vmem:[%s5522_s5 + $0x8] sm:$0xff]  ;;  %v2713_v41 = vld [vmem:[#allocation16 + $0x1b8] sm:$0xff] }
 0x64c   : > { %v2378_v8 = vcombine.high %v2368_v4, %v2376_v5  ;;  %v2377_v9 = vcombine.low %v2368_v4, %v2376_v5  ;;  %v3995_v47 = vpack.c.bf16 %v2695_v62, %v2691_v61  ;;  %v4059_v49 = vpack.c.bf16 %v2697_v0, %v2693_v63  ;;  %v2696_v4 = vld [vmem:[#allocation16 + $0x130] sm:$0xff]  ;;  %v2699_v5 = vld [vmem:[#allocation16 + $0x148] sm:$0xff]  ;;  %v2702_v33 = vld [vmem:[#allocation16 + $0x160] sm:$0xff] }
 0x64d   : > { %3984 = vmatprep.subr.bf16.mxu0 %v3983_v25  ;;  %v4061_v48 = vpack.c.bf16 %v2696_v4, %v2692_v46  ;;  %v4474_v22 = vld [vmem:[%s5522_s5 + $0x10] sm:$0xff]  ;;  %v4475_v25 = vld [vmem:[%s5522_s5 + $0x18] sm:$0xff]  ;;  %v2710_v44 = vld [vmem:[#allocation16 + $0x1a0] sm:$0xff]  ;;  %v4067_v50 = vpack.c.bf16 %v2713_v41, %v2709_v39 }
 0x64e   : > { %2557 = vmatprep.mubr.f32.mxu1 %v2378_v8  ;;  %3986 = vmatpush1.bf16.msra.mxu0 %v3985_v30  ;;  %v2705_v8 = vld [vmem:[#allocation16 + $0x178] sm:$0xff]  ;;  %v2715_v56 = vld [vmem:[#allocation16 + $0x1c8] sm:$0xff]  ;;  %v2714_v61 = vld [vmem:[#allocation16 + $0x1c0] sm:$0xff] }
 0x64f   : > { %2558 = vmatmul.mubr.f32.vlgmr.msra.gmra.mrb[12].mxu1 %v2377_v9  ;;  %3988 = vmatprep.subr.bf16.mxu0 %v3987_v51  ;;  %v3997_v9 = vpack.c.bf16 %v2694_v43, %v2690_v3  ;;  %v4001_v51 = vpack.c.bf16 %v2702_v33, %v2698_v32  ;;  %v2719_v57 = vld [vmem:[#allocation16 + $0x1e8] sm:$0xff]  ;;  %v2721_v60 = vld [vmem:[#allocation16 + $0x1f8] sm:$0xff]  ;;  %v2718_v62 = vld [vmem:[#allocation16 + $0x1e0] sm:$0xff] }
 0x650   : > { %2563 = vmatprep.mubr.f32.mxu1 %v2428_v6  ;;  %4046 = vmatpush1.bf16.msra.mxu1 %v4045_v21  ;;  %v2703_v6 = vld [vmem:[#allocation16 + $0x168] sm:$0xff]  ;;  %v4007_v59 = vpack.c.bf16 %v2719_v57, %v2715_v56  ;;  %v4009_v0 = vpack.c.bf16 %v2718_v62, %v2714_v61  ;;  %v2725_v46 = vld [vmem:[#allocation16 + $0x218] sm:$0xff]  ;;  %v2738_v32 = vld [vmem:[#allocation16 + $0x280] sm:$0xff] }
 0x651   : > { %4048 = vmatprep.subr.bf16.mxu1 %v4047_v26  ;;  %v3999_v10 = vpack.c.bf16 %v2703_v6, %v2699_v5  ;;  %v2723_v3 = vld [vmem:[#allocation16 + $0x208] sm:$0xff]  ;;  %v2729_v4 = vld [vmem:[#allocation16 + $0x238] sm:$0xff]  ;;  %v2722_v5 = vld [vmem:[#allocation16 + $0x200] sm:$0xff] }
 0x652   : > { %3990 = vmatpush1.bf16.msra.mxu0 %v3989_v42  ;;  %v2706_v42 = vld [vmem:[#allocation16 + $0x180] sm:$0xff]  ;;  %v2727_v43 = vld [vmem:[#allocation16 + $0x228] sm:$0xff]  ;;  %v2761_v61 = vld [vmem:[#allocation16 + $0x338] sm:$0xff] }
 0x653   : > { %2564 = vmatmul.mubr.f32.gmra.mrb[14].mxu1 %v2427_v7  ;;  %3992 = vmatprep.subr.bf16.mxu0 %v3991_v54  ;;  %v2701_v7 = vld [vmem:[#allocation16 + $0x158] sm:$0xff]  ;;  %v4005_v52 = vpack.c.bf16 %v2710_v44, %v2706_v42  ;;  %v2712_v54 = vld [vmem:[#allocation16 + $0x1b0] sm:$0xff]  ;;  %v2726_v6 = vld [vmem:[#allocation16 + $0x220] sm:$0xff] }
 0x654   : > { %4050 = vmatpush1.bf16.msra.mxu1 %v4049_v34  ;;  %v4063_v11 = vpack.c.bf16 %v2705_v8, %v2701_v7  ;;  %v2700_v34 = vld [vmem:[#allocation16 + $0x150] sm:$0xff]  ;;  %v4075_v7 = vpack.c.bf16 %v2729_v4, %v2725_v46  ;;  %v4013_v8 = vpack.c.bf16 %v2726_v6, %v2722_v5  ;;  %v2742_v33 = vld [vmem:[#allocation16 + $0x2a0] sm:$0xff]  ;;  %v2751_v39 = vld [vmem:[#allocation16 + $0x2e8] sm:$0xff] }
 0x655   : > { %4052 = vmatprep.subr.bf16.mxu1 %v4051_v38  ;;  %v4065_v36 = vpack.c.bf16 %v2704_v35, %v2700_v34  ;;  %v2711_v38 = vld [vmem:[#allocation16 + $0x1a8] sm:$0xff]  ;;  %v2740_v35 = vld [vmem:[#allocation16 + $0x290] sm:$0xff]  ;;  %v2753_v42 = vld [vmem:[#allocation16 + $0x2f8] sm:$0xff] }
 0x656   : > { %3994 = vmatpush1.bf16.msra.mxu0 %v3993_v1  ;;  %v4003_v40 = vpack.c.bf16 %v2711_v38, %v2707_v37  ;;  %v2716_v1 = vld [vmem:[#allocation16 + $0x1d0] sm:$0xff]  ;;  %v2747_v38 = vld [vmem:[#allocation16 + $0x2c8] sm:$0xff]  ;;  %v2746_v44 = vld [vmem:[#allocation16 + $0x2c0] sm:$0xff] }
 0x657   : > { %3996 = vmatprep.subr.bf16.mxu0 %v3995_v47  ;;  %v4023_v41 = vpack.c.bf16 %v2751_v39, %v2747_v38  ;;  %v2755_v57 = vld [vmem:[#allocation16 + $0x308] sm:$0xff]  ;;  %v2754_v62 = vld [vmem:[#allocation16 + $0x300] sm:$0xff]  ;;  %v2769_v5 = vld [vmem:[#allocation16 + $0x378] sm:$0xff] }
 0x658   : > { %4054 = vmatpush1.bf16.msra.mxu1 %v4053_v53  ;;  %v2708_v53 = vld [vmem:[#allocation16 + $0x190] sm:$0xff]  ;;  %v2767_v46 = vld [vmem:[#allocation16 + $0x368] sm:$0xff]  ;;  %v2762_v6 = vld [vmem:[#allocation16 + $0x340] sm:$0xff] }
 0x659   : > { %4056 = vmatprep.subr.bf16.mxu1 %v4055_v58  ;;  %v4069_v55 = vpack.c.bf16 %v2712_v54, %v2708_v53  ;;  %v2717_v58 = vld [vmem:[#allocation16 + $0x1d8] sm:$0xff]  ;;  %v2748_v54 = vld [vmem:[#allocation16 + $0x2d0] sm:$0xff] }
 0x65a   : > { %3998 = vmatpush1.bf16.msra.mxu0 %v3997_v9  ;;  %v4071_v63 = vpack.c.bf16 %v2721_v60, %v2717_v58  ;;  %v2724_v9 = vld [vmem:[#allocation16 + $0x210] sm:$0xff]  ;;  %v2759_v58 = vld [vmem:[#allocation16 + $0x328] sm:$0xff] }
 0x65b   : > { %4000 = vmatprep.subr.bf16.mxu0 %v3999_v10  ;;  %v4027_v60 = vpack.c.bf16 %v2759_v58, %v2755_v57  ;;  %v2971_v39 = vld [vmem:[#allocation19 + $0x8] sm:$0xff] }
 0x65c   : > { %4058 = vmatpush1.bf16.msra.mxu1 %v4057_v2  ;;  %v2720_v2 = vld [vmem:[#allocation16 + $0x1f0] sm:$0xff] }
 0x65d   : > { %4060 = vmatprep.subr.bf16.mxu1 %v4059_v49  ;;  %v4073_v47 = vpack.c.bf16 %v2720_v2, %v2716_v1  ;;  %v4011_v49 = vpack.c.bf16 %v2727_v43, %v2723_v3  ;;  %v2756_v2 = vld [vmem:[#allocation16 + $0x310] sm:$0xff]  ;;  %v2763_v43 = vld [vmem:[#allocation16 + $0x348] sm:$0xff] }
 0x65e   : > { %4002 = vmatpush1.bf16.msra.mxu0 %v4001_v51  ;;  %v4021_v51 = vpack.c.bf16 %v2742_v33, %v2738_v32  ;;  %v4031_v4 = vpack.c.bf16 %v2767_v46, %v2763_v43  ;;  %v2785_v32 = vld [vmem:[#allocation16 + $0x3f8] sm:$0xff]  ;;  %v2778_v33 = vld [vmem:[#allocation16 + $0x3c0] sm:$0xff] }
 0x65f   : > { %4004 = vmatprep.subr.bf16.mxu0 %v4003_v40  ;;  %v2749_v40 = vld [vmem:[#allocation16 + $0x2d8] sm:$0xff] }
 0x660   : > { %4062 = vmatpush1.bf16.msra.mxu1 %v4061_v48  ;;  %v2728_v48 = vld [vmem:[#allocation16 + $0x230] sm:$0xff] }
 0x661   : > { %4064 = vmatprep.subr.bf16.mxu1 %v4063_v11  ;;  %v4077_v10 = vpack.c.bf16 %v2728_v48, %v2724_v9  ;;  %v2731_v11 = vld [vmem:[#allocation16 + $0x248] sm:$0xff]  ;;  %v2764_v48 = vld [vmem:[#allocation16 + $0x350] sm:$0xff] }
 0x662   : > { %4006 = vmatpush1.bf16.msra.mxu0 %v4005_v52  ;;  %v4087_v52 = vpack.c.bf16 %v2753_v42, %v2749_v40  ;;  %v2973_v40 = vld [vmem:[#allocation19 + $0x18] sm:$0xff] }
 0x663   : > { %4008 = vmatprep.subr.bf16.mxu0 %v4007_v59  ;;  %v2757_v59 = vld [vmem:[#allocation16 + $0x318] sm:$0xff] }
 0x664   : > { %4066 = vmatpush1.bf16.msra.mxu1 %v4065_v36  ;;  %v2744_v36 = vld [vmem:[#allocation16 + $0x2b0] sm:$0xff] }
 0x665   : > { %4068 = vmatprep.subr.bf16.mxu1 %v4067_v50  ;;  %v4085_v37 = vpack.c.bf16 %v2744_v36, %v2740_v35  ;;  %v2750_v50 = vld [vmem:[#allocation16 + $0x2e0] sm:$0xff]  ;;  %v2780_v35 = vld [vmem:[#allocation16 + $0x3d0] sm:$0xff] }
 0x666   : > { %4010 = vmatpush1.bf16.msra.mxu0 %v4009_v0  ;;  %v4025_v53 = vpack.c.bf16 %v2750_v50, %v2746_v44  ;;  %v4091_v0 = vpack.c.bf16 %v2761_v61, %v2757_v59  ;;  %v2784_v36 = vld [vmem:[#allocation16 + $0x3f0] sm:$0xff] }
 0x667   : > { %4012 = vmatprep.subr.bf16.mxu0 %v4011_v49  ;;  %v2765_v49 = vld [vmem:[#allocation16 + $0x358] sm:$0xff]  ;;  %v4105_v38 = vpack.c.bf16 %v2784_v36, %v2780_v35 }
 0x668   : > { %4070 = vmatpush1.bf16.msra.mxu1 %v4069_v55  ;;  %v2752_v55 = vld [vmem:[#allocation16 + $0x2f0] sm:$0xff] }
 0x669   : > { %4072 = vmatprep.subr.bf16.mxu1 %v4071_v63  ;;  %v4089_v56 = vpack.c.bf16 %v2752_v55, %v2748_v54  ;;  %v2758_v63 = vld [vmem:[#allocation16 + $0x320] sm:$0xff] }
 0x66a   : > { %4014 = vmatpush1.bf16.msra.mxu0 %v4013_v8  ;;  %v4029_v1 = vpack.c.bf16 %v2758_v63, %v2754_v62  ;;  %v4095_v8 = vpack.c.bf16 %v2769_v5, %v2765_v49  ;;  %v5763_v49 = vsub.s32 0, %v5576_v45  ;;  %v2574_v5 = vld [vmem:[#allocation13] sm:$0x3] }
 0x66c   : > { %4074 = vmatpush1.bf16.msra.mxu1 %v4073_v47  ;;  %v2760_v47 = vld [vmem:[#allocation16 + $0x330] sm:$0xff] }
 0x66d   : > { %4076 = vmatprep.subr.bf16.mxu1 %v4075_v7  ;;  %v4093_v3 = vpack.c.bf16 %v2760_v47, %v2756_v2  ;;  %v2766_v7 = vld [vmem:[#allocation16 + $0x360] sm:$0xff] }
 0x66e   : > { %v4033_v9 = vpack.c.bf16 %v2766_v7, %v2762_v6  ;;  %v5766_v7 = vsub.s32 1, %v5576_v45 }
 0x670   : > { %4078 = vmatpush1.bf16.msra.mxu1 %v4077_v10  ;;  %v2768_v10 = vld [vmem:[#allocation16 + $0x370] sm:$0xff] }
 0x722   : > { %v2559_v12 = vpop.f32.mrb[12].mxu1 }
 0x723   : > { %v5739_v15 = vadd.f32 %v4472_v13, %v2559_v12  ;;  %v2561_v16 = vpop.f32.mrb[13].mxu1  ;;  %v2735_v12 = vld [vmem:[#allocation16 + $0x268] sm:$0xff]  ;;  %v2733_v13 = vld [vmem:[#allocation16 + $0x258] sm:$0xff] }
 0x724   : > { %v5742_v18 = vadd.f32 %v4473_v17, %v2561_v16  ;;  %v4015_v16 = vpack.c.bf16 %v2735_v12, %v2731_v11  ;;  %v2737_v17 = vld [vmem:[#allocation16 + $0x278] sm:$0xff]  ;;  %v2771_v11 = vld [vmem:[#allocation16 + $0x388] sm:$0xff]  ;;  %v4097_v12 = vpack.c.bf16 %v2768_v10, %v2764_v48  ;;  %v2628_v48 = vrot.slane %v2574_v5, %v5763_v49 }
 0x725   : > { %v2582_v19 = vmul.f32 %v5739_v15, %v5739_v15 }
 0x726   : > { %v2565_v20 = vpop.f32.mrb[14].mxu1  ;;  %v2576_v14 = vadd.f32 %v5742_v18, %v5739_v15  ;;  %v2583_v21 = vmul.f32 %v5742_v18, %v5742_v18  ;;  %4016 = vmatprep.subr.bf16.mxu0 %v4015_v16  ;;  %v2773_v16 = vld [vmem:[#allocation16 + $0x398] sm:$0xff] }
 0x727   : > { %v5751_v23 = vadd.f32 %v4474_v22, %v2565_v20  ;;  %v2567_v24 = vpop.f32.mrb[15].mxu1  ;;  %v2734_v20 = vld [vmem:[#allocation16 + $0x260] sm:$0xff]  ;;  %v2732_v22 = vld [vmem:[#allocation16 + $0x250] sm:$0xff] }
 0x728   : > { %v5754_v26 = vadd.f32 %v4475_v25, %v2567_v24  ;;  %2577 = vadd.xlane.f32.xlu0 %v2576_v14  ;;  %v2586_v27 = vadd.f32 %v2583_v21, %v2582_v19  ;;  %v2730_v19 = vld [vmem:[#allocation16 + $0x240] sm:$0xff]  ;;  %v4079_v14 = vpack.c.bf16 %v2737_v17, %v2733_v13  ;;  %v2736_v24 = vld [vmem:[#allocation16 + $0x270] sm:$0xff]  ;;  %v2775_v13 = vld [vmem:[#allocation16 + $0x3a8] sm:$0xff] }
 0x729   : > { %v2584_v28 = vmul.f32 %v5751_v23, %v5751_v23  ;;  %v4017_v21 = vpack.c.bf16 %v2734_v20, %v2730_v19  ;;  %v4081_v25 = vpack.c.bf16 %v2736_v24, %v2732_v22  ;;  %v2777_v17 = vld [vmem:[#allocation16 + $0x3b8] sm:$0xff]  ;;  %v4035_v19 = vpack.c.bf16 %v2775_v13, %v2771_v11  ;;  %v2772_v22 = vld [vmem:[#allocation16 + $0x390] sm:$0xff] }
 0x72a   : > { %2587 = vadd.xlane.f32.xlu1 %v2586_v27  ;;  %v2579_v29 = vadd.f32 %v5754_v26, %v5751_v23  ;;  %v2585_v30 = vmul.f32 %v5754_v26, %v5754_v26  ;;  %4080 = vmatprep.subr.bf16.mxu1 %v4079_v14  ;;  %v2739_v27 = vld [vmem:[#allocation16 + $0x288] sm:$0xff]  ;;  %v4099_v20 = vpack.c.bf16 %v2777_v17, %v2773_v16  ;;  %v2770_v14 = vld [vmem:[#allocation16 + $0x380] sm:$0xff]  ;;  %v2575_v13 = vld [vmem:[#allocation14] sm:$0x3] }
 0x72b   : > { %4018 = vmatpush1.bf16.msra.mxu0 %v4017_v21  ;;  %4082 = vmatpush1.bf16.msra.mxu1 %v4081_v25  ;;  %v2774_v21 = vld [vmem:[#allocation16 + $0x3a0] sm:$0xff]  ;;  %v2776_v25 = vld [vmem:[#allocation16 + $0x3b0] sm:$0xff] }
 0x72c   : > { %2580 = vadd.xlane.f32.xlu0 %v2579_v29  ;;  %v2589_v31 = vadd.f32 %v2585_v30, %v2584_v28  ;;  %v2743_v28 = vld [vmem:[#allocation16 + $0x2a8] sm:$0xff]  ;;  %v2741_v29 = vld [vmem:[#allocation16 + $0x298] sm:$0xff]  ;;  %v4037_v24 = vpack.c.bf16 %v2774_v21, %v2770_v14 }
 0x72d   : > { %v4019_v30 = vpack.c.bf16 %v2743_v28, %v2739_v27  ;;  %v2779_v27 = vld [vmem:[#allocation16 + $0x3c8] sm:$0xff] }
 0x72e   : > { %2590 = vadd.xlane.f32.xlu1 %v2589_v31  ;;  %v2745_v31 = vld [vmem:[#allocation16 + $0x2b8] sm:$0xff]  ;;  %v2783_v28 = vld [vmem:[#allocation16 + $0x3e8] sm:$0xff] }
 0x72f   : > { %v4083_v34 = vpack.c.bf16 %v2745_v31, %v2741_v29  ;;  %4020 = vmatprep.subr.bf16.mxu0 %v4019_v30  ;;  %v4101_v29 = vpack.c.bf16 %v2776_v25, %v2772_v22  ;;  %v4039_v30 = vpack.c.bf16 %v2783_v28, %v2779_v27  ;;  %v2781_v31 = vld [vmem:[#allocation16 + $0x3d8] sm:$0xff] }
 0x730   : > { %4022 = vmatpush1.bf16.msra.mxu0 %v4021_v51  ;;  %v2782_v51 = vld [vmem:[#allocation16 + $0x3e0] sm:$0xff]  ;;  %v2972_v25 = vld [vmem:[#allocation19 + $0x10] sm:$0xff] }
 0x731   : > { %4084 = vmatprep.subr.bf16.mxu1 %v4083_v34  ;;  %4024 = vmatprep.subr.bf16.mxu0 %v4023_v41  ;;  %v4103_v34 = vpack.c.bf16 %v2785_v32, %v2781_v31  ;;  %v4107_v41 = vpack.c.bf16 %v2973_v40, %v2971_v39  ;;  %v2977_v28 = vld [vmem:[#allocation19 + $0x38] sm:$0xff] }
 0x732   : > { %4086 = vmatpush1.bf16.msra.mxu1 %v4085_v37  ;;  %v4041_v37 = vpack.c.bf16 %v2782_v51, %v2778_v33 }
 0x733   : > { %4088 = vmatprep.subr.bf16.mxu1 %v4087_v52 }
 0x734   : > { %4026 = vmatpush1.bf16.msra.mxu0 %v4025_v53 }
 0x735   : > { %4028 = vmatprep.subr.bf16.mxu0 %v4027_v60 }
 0x736   : > { %4090 = vmatpush1.bf16.msra.mxu1 %v4089_v56 }
 0x737   : > { %4092 = vmatprep.subr.bf16.mxu1 %v4091_v0 }
 0x738   : > { %4030 = vmatpush1.bf16.msra.mxu0 %v4029_v1 }
 0x739   : > { %4032 = vmatprep.subr.bf16.mxu0 %v4031_v4 }
 0x73a   : > { %4094 = vmatpush1.bf16.msra.mxu1 %v4093_v3 }
 0x73b   : > { %4096 = vmatprep.subr.bf16.mxu1 %v4095_v8 }
 0x73c   : > { %4034 = vmatpush1.bf16.msra.mxu0 %v4033_v9 }
 0x73d   : > { %4036 = vmatprep.subr.bf16.mxu0 %v4035_v19  ;;  %v2647_v19 = vrot.slane %v2575_v13, %v5763_v49 }
 0x73e   : > { %4098 = vmatpush1.bf16.msra.mxu1 %v4097_v12  ;;  %v2632_v12 = vrot.slane %v2574_v5, %v5766_v7 }
 0x73f   : > { %4100 = vmatprep.subr.bf16.mxu1 %v4099_v20  ;;  %v2651_v20 = vrot.slane %v2575_v13, %v5766_v7  ;;  %v2998_v13 = vld [vmem:[#allocation19 + $0xe0] sm:$0xff] }
 0x740   : > { %4038 = vmatpush1.bf16.msra.mxu0 %v4037_v24  ;;  %v2970_v24 = vld [vmem:[#allocation19] sm:$0xff] }
 0x741   : > { %4040 = vmatprep.subr.bf16.mxu0 %v4039_v30  ;;  %v4109_v31 = vpack.c.bf16 %v2972_v25, %v2970_v24  ;;  %v3007_v24 = vld [vmem:[#allocation19 + $0x128] sm:$0xff]  ;;  %v3009_v25 = vld [vmem:[#allocation19 + $0x138] sm:$0xff] }
 0x742   : > { %4102 = vmatpush1.bf16.msra.mxu1 %v4101_v29 }
 0x743   : > { %4104 = vmatprep.subr.bf16.mxu1 %v4103_v34 }
 0x744   : > { %4042 = vmatpush1.bf16.msra.mxu0 %v4041_v37  ;;  %v2979_v37 = vld [vmem:[#allocation19 + $0x48] sm:$0xff] }
 0x745   : > { %4108 = vmatprep.subr.bf16.mxu0 %v4107_v41 }
 0x746   : > { %4106 = vmatpush1.bf16.msra.mxu1 %v4105_v38  ;;  %v2981_v38 = vld [vmem:[#allocation19 + $0x58] sm:$0xff] }
 0x7b5   : > { %v2578_v42 = vpop.xlane.xlu0 %2577 }
 0x7b6   : > { %v2592_v44 = vmul.f32 0.00390625, %v2578_v42 }
 0x7b7   : > { %v2588_v50 = vpop.xlane.xlu1 %2587 }
 0x7b8   : > { %v2594_v52 = vmul.f32 %v2592_v44, %v2578_v42  ;;  %v2620_v10 = vsub.f32 %v5739_v15, %v2592_v44  ;;  %v2621_v11 = vsub.f32 %v5742_v18, %v2592_v44  ;;  %v2975_v18 = vld [vmem:[#allocation19 + $0x28] sm:$0xff]  ;;  %v4115_v42 = vpack.c.bf16 %v2981_v38, %v2979_v37  ;;  %v2978_v44 = vld [vmem:[#allocation19 + $0x40] sm:$0xff] }
 0x7b9   : > { %v2581_v53 = vpop.xlane.xlu0 %2580  ;;  %v4111_v34 = vpack.c.bf16 %v2977_v28, %v2975_v18  ;;  %v3006_v18 = vld [vmem:[#allocation19 + $0x120] sm:$0xff]  ;;  %v3008_v28 = vld [vmem:[#allocation19 + $0x130] sm:$0xff] }
 0x7ba   : > { %v2596_v54 = vsub.f32 %v2588_v50, %v2594_v52  ;;  %v2593_v55 = vmul.f32 0.00390625, %v2581_v53  ;;  %v2635_v16 = vmul.f32 %v2628_v48, %v2620_v10  ;;  %v2636_v17 = vmul.f32 %v2632_v12, %v2621_v11  ;;  %v2980_v50 = vld [vmem:[#allocation19 + $0x50] sm:$0xff]  ;;  %v2983_v52 = vld [vmem:[#allocation19 + $0x68] sm:$0xff]  ;;  %v3001_v10 = vld [vmem:[#allocation19 + $0xf8] sm:$0xff] }
 0x7bb   : > { %v2591_v58 = vpop.xlane.xlu1 %2590  ;;  %v3014_v38 = vld [vmem:[#allocation19 + $0x160] sm:$0xff] }
 0x7bc   : > { %v2598_v56 = vmul.f32 0.003921569, %v2596_v54  ;;  %v2595_v57 = vmul.f32 %v2593_v55, %v2581_v53  ;;  %v2622_v21 = vsub.f32 %v5751_v23, %v2593_v55  ;;  %v2623_v22 = vsub.f32 %v5754_v26, %v2593_v55  ;;  %v2974_v23 = vld [vmem:[#allocation19 + $0x20] sm:$0xff]  ;;  %v2976_v26 = vld [vmem:[#allocation19 + $0x30] sm:$0xff]  ;;  %v2985_v53 = vld [vmem:[#allocation19 + $0x78] sm:$0xff] }
 0x7bd   : > { %v4113_v41 = vpack.c.bf16 %v2976_v26, %v2974_v23  ;;  %v4117_v54 = vpack.c.bf16 %v2980_v50, %v2978_v44  ;;  %v4119_v55 = vpack.c.bf16 %v2985_v53, %v2983_v52  ;;  %v3012_v23 = vld [vmem:[#allocation19 + $0x150] sm:$0xff]  ;;  %v3015_v26 = vld [vmem:[#allocation19 + $0x168] sm:$0xff]  ;;  %v3021_v44 = vld [vmem:[#allocation19 + $0x198] sm:$0xff] }
 0x7be   : > { %v2600_v59 = vmax.f32 %v2598_v56, 0.0  ;;  %v2597_v60 = vsub.f32 %v2591_v58, %v2595_v57  ;;  %v2638_v32 = vmul.f32 %v2632_v12, %v2623_v22  ;;  %v2637_v33 = vmul.f32 %v2628_v48, %v2622_v21  ;;  %v2982_v56 = vld [vmem:[#allocation19 + $0x60] sm:$0xff]  ;;  %v2984_v57 = vld [vmem:[#allocation19 + $0x70] sm:$0xff]  ;;  %v2987_v58 = vld [vmem:[#allocation19 + $0x88] sm:$0xff] }
 0x7bf   : > { %v2999_v48 = vld [vmem:[#allocation19 + $0xe8] sm:$0xff]  ;;  %v3002_v21 = vld [vmem:[#allocation19 + $0x100] sm:$0xff]  ;;  %v3004_v22 = vld [vmem:[#allocation19 + $0x110] sm:$0xff] }
 0x7c0   : > { %4456 = vrsqrt.f32 %v2600_v59  ;;  %v2599_v61 = vmul.f32 0.003921569, %v2597_v60  ;;  %vm2604_vm1 = vcmp.eq.f32.partialorder %v2600_v59, inf  ;;  %v2607_v1 = vand.u32 2147483648, %v2600_v59  ;;  %v3018_v53 = vld [vmem:[#allocation19 + $0x180] sm:$0xff] }
 0x7c1   : > { %vm2606_vm2 = vcmp.eq.f32.partialorder %v2600_v59, 0.0  ;;  %v4121_v60 = vpack.c.bf16 %v2984_v57, %v2982_v56  ;;  %v4135_v12 = vpack.c.bf16 %v3001_v10, %v2999_v48  ;;  %v3025_v56 = vld [vmem:[#allocation19 + $0x1b8] sm:$0xff] }
 0x7c2   : > { %v2601_v62 = vmax.f32 %v2599_v61, 0.0  ;;  %v5792_v10 = vld [vmem:[#allocation17] sm:$0xf] }
 0x7c4   : > { %4458 = vrsqrt.f32 %v2601_v62  ;;  %vm2611_vm3 = vcmp.eq.f32.partialorder %v2601_v62, inf  ;;  %v2614_v4 = vand.u32 2147483648, %v2601_v62  ;;  %vm2613_vm4 = vcmp.eq.f32.partialorder %v2601_v62, 0.0 }
 0x7ca   : > { %v4457_v63 = vpop.eup %4456 }
 0x7cb   : > { %v2603_v0 = vmul.f32 %v4457_v63, %v2600_v59  ;;  %v2988_v63 = vld [vmem:[#allocation19 + $0x90] sm:$0xff] }
 0x7cd   : > { %v2605_v2 = vsel %vm2604_vm1, %v2600_v59, %v2603_v0  ;;  %v2989_v59 = vld [vmem:[#allocation19 + $0x98] sm:$0xff]  ;;  %v2991_v0 = vld [vmem:[#allocation19 + $0xa8] sm:$0xff] }
 0x7ce   : > { %v2608_v47 = vsel %vm2606_vm2, %v2607_v1, %v2605_v2  ;;  %v4459_v3 = vpop.eup %4458  ;;  %v4123_v61 = vpack.c.bf16 %v2989_v59, %v2987_v58  ;;  %v2993_v1 = vld [vmem:[#allocation19 + $0xb8] sm:$0xff]  ;;  %v3022_v59 = vld [vmem:[#allocation19 + $0x1a0] sm:$0xff] }
 0x7cf   : > { %v2616_v43 = vadd.f32 1e-06, %v2608_v47  ;;  %v2610_v46 = vmul.f32 %v4459_v3, %v2601_v62  ;;  %v4127_v47 = vpack.c.bf16 %v2993_v1, %v2991_v0  ;;  %v2990_v3 = vld [vmem:[#allocation19 + $0xa0] sm:$0xff] }
 0x7d0   : > { %v3026_v1 = vld [vmem:[#allocation19 + $0x1c0] sm:$0xff] }
 0x7d1   : > { %4460 = vrcp.f32 %v2616_v43  ;;  %v2612_v6 = vsel %vm2611_vm3, %v2601_v62, %v2610_v46  ;;  %v2986_v62 = vld [vmem:[#allocation19 + $0x80] sm:$0xff]  ;;  %v2992_v43 = vld [vmem:[#allocation19 + $0xb0] sm:$0xff]  ;;  %v2995_v46 = vld [vmem:[#allocation19 + $0xc8] sm:$0xff] }
 0x7d2   : > { %v2615_v8 = vsel %vm2613_vm4, %v2614_v4, %v2612_v6  ;;  %v4125_v2 = vpack.c.bf16 %v2988_v63, %v2986_v62  ;;  %v2997_v4 = vld [vmem:[#allocation19 + $0xd8] sm:$0xff]  ;;  %v4129_v5 = vpack.c.bf16 %v2992_v43, %v2990_v3  ;;  %v3031_v3 = vld [vmem:[#allocation19 + $0x1e8] sm:$0xff] }
 0x7d3   : > { %v2617_v9 = vadd.f32 1e-06, %v2615_v8  ;;  %v4131_v6 = vpack.c.bf16 %v2997_v4, %v2995_v46  ;;  %v2994_v8 = vld [vmem:[#allocation19 + $0xc0] sm:$0xff]  ;;  %v3029_v62 = vld [vmem:[#allocation19 + $0x1d8] sm:$0xff] }
 0x7d4   : > { %v3033_v43 = vld [vmem:[#allocation19 + $0x1f8] sm:$0xff]  ;;  %v3030_v4 = vld [vmem:[#allocation19 + $0x1e0] sm:$0xff] }
 0x7d5   : > { %4462 = vrcp.f32 %v2617_v9  ;;  %v2996_v9 = vld [vmem:[#allocation19 + $0xd0] sm:$0xff]  ;;  %v4167_v46 = vpack.c.bf16 %v3033_v43, %v3031_v3  ;;  %v3055_v43 = vld [vmem:[#allocation19 + $0x2a8] sm:$0xff] }
 0x7d6   : > { %v4133_v11 = vpack.c.bf16 %v2996_v9, %v2994_v8  ;;  %v3035_v8 = vld [vmem:[#allocation19 + $0x208] sm:$0xff]  ;;  %v3037_v9 = vld [vmem:[#allocation19 + $0x218] sm:$0xff]  ;;  %v3052_v3 = vld [vmem:[#allocation19 + $0x290] sm:$0xff] }
 0x7d7   : > { %v4171_v48 = vpack.c.bf16 %v3037_v9, %v3035_v8  ;;  %v3056_v8 = vld [vmem:[#allocation19 + $0x2b0] sm:$0xff]  ;;  %v3059_v9 = vld [vmem:[#allocation19 + $0x2c8] sm:$0xff] }
 0x7db   : > { %v4461_v14 = vpop.eup %4460 }
 0x7dc   : > { %v2640_v15 = vmul.f32 %v4461_v14, %v2636_v17  ;;  %v2639_v27 = vmul.f32 %v4461_v14, %v2635_v16  ;;  %v3000_v16 = vld [vmem:[#allocation19 + $0xf0] sm:$0xff]  ;;  %v3003_v17 = vld [vmem:[#allocation19 + $0x108] sm:$0xff] }
 0x7de   : > { %v5776_v29 = vadd.f32 %v2651_v20, %v2640_v15  ;;  %v5778_v30 = vadd.f32 %v2647_v19, %v2639_v27  ;;  %v4141_v15 = vpack.c.bf16 %v3004_v22, %v3002_v21  ;;  %v4143_v27 = vpack.c.bf16 %v3009_v25, %v3007_v24  ;;  %v3034_v21 = vld [vmem:[#allocation19 + $0x200] sm:$0xff]  ;;  %v3036_v22 = vld [vmem:[#allocation19 + $0x210] sm:$0xff]  ;;  %v3039_v25 = vld [vmem:[#allocation19 + $0x228] sm:$0xff] }
 0x7df   : > { %v4463_v51 = vpop.eup %4462 }
 0x7e0   : > { %2872 = vmatprep.mubr.f32.mxu0 %v5776_v29  ;;  %2949 = vmatprep.mubr.f32.mxu1 %v5776_v29  ;;  %v2642_v35 = vmul.f32 %v4463_v51, %v2638_v32  ;;  %v2641_v36 = vmul.f32 %v4463_v51, %v2637_v33  ;;  %v3013_v32 = vld [vmem:[#allocation19 + $0x158] sm:$0xff]  ;;  %v4145_v33 = vpack.c.bf16 %v3008_v28, %v3006_v18  ;;  %v3010_v51 = vld [vmem:[#allocation19 + $0x140] sm:$0xff] }
 0x7e1   : > { %2873 = vmatmul.mubr.f32.vlgmr.msra.gmra.mrb[8].mxu0 %v5778_v30  ;;  %2950 = vmatmul.mubr.f32.vlgmr.msra.gmra.mrb[16].mxu1 %v5778_v30  ;;  %v4173_v28 = vpack.c.bf16 %v3036_v22, %v3034_v21  ;;  %v3062_v22 = vld [vmem:[#allocation19 + $0x2e0] sm:$0xff] }
 0x7e2   : > { %4110 = vmatpush1.bf16.msra.mxu0 %v4109_v31  ;;  %v5784_v39 = vadd.f32 %v2651_v20, %v2642_v35  ;;  %v5786_v40 = vadd.f32 %v2647_v19, %v2641_v36  ;;  %v3005_v19 = vld [vmem:[#allocation19 + $0x118] sm:$0xff]  ;;  %v4137_v20 = vpack.c.bf16 %v3000_v16, %v2998_v13  ;;  %v3011_v31 = vld [vmem:[#allocation19 + $0x148] sm:$0xff]  ;;  %v4149_v36 = vpack.c.bf16 %v3012_v23, %v3010_v51 }
 0x7e3   : > { %4112 = vmatprep.subr.bf16.mxu0 %v4111_v34  ;;  %v4139_v14 = vpack.c.bf16 %v3005_v19, %v3003_v17  ;;  %v4147_v34 = vpack.c.bf16 %v3013_v32, %v3011_v31  ;;  %v3017_v35 = vld [vmem:[#allocation19 + $0x178] sm:$0xff]  ;;  %v2802_v13 = vsub.s32 3, %v5576_v45 }
 0x7e4   : > { %2878 = vmatprep.mubr.f32.mxu0 %v5784_v39  ;;  %2955 = vmatprep.mubr.f32.mxu1 %v5784_v39  ;;  %v4151_v37 = vpack.c.bf16 %v3017_v35, %v3015_v26  ;;  %v3038_v35 = vld [vmem:[#allocation19 + $0x220] sm:$0xff] }
 0x7e5   : > { %2879 = vmatmul.mubr.f32.gmra.mrb[10].mxu0 %v5786_v40  ;;  %2956 = vmatmul.mubr.f32.gmra.mrb[18].mxu1 %v5786_v40 }
 0x7e6   : > { %4114 = vmatpush1.bf16.msra.mxu0 %v4113_v41  ;;  %v3016_v41 = vld [vmem:[#allocation19 + $0x170] sm:$0xff] }
 0x7e7   : > { %4116 = vmatprep.subr.bf16.mxu0 %v4115_v42  ;;  %v3019_v42 = vld [vmem:[#allocation19 + $0x188] sm:$0xff]  ;;  %v4153_v50 = vpack.c.bf16 %v3016_v41, %v3014_v38 }
 0x7e8   : > { %v4155_v52 = vpack.c.bf16 %v3021_v44, %v3019_v42  ;;  %v3043_v41 = vld [vmem:[#allocation19 + $0x248] sm:$0xff]  ;;  %v3045_v42 = vld [vmem:[#allocation19 + $0x258] sm:$0xff] }
 0x7ea   : > { %4118 = vmatpush1.bf16.msra.mxu0 %v4117_v54  ;;  %v3020_v54 = vld [vmem:[#allocation19 + $0x190] sm:$0xff] }
 0x7eb   : > { %4120 = vmatprep.subr.bf16.mxu0 %v4119_v55  ;;  %v3023_v55 = vld [vmem:[#allocation19 + $0x1a8] sm:$0xff]  ;;  %v4157_v57 = vpack.c.bf16 %v3020_v54, %v3018_v53  ;;  %v4179_v53 = vpack.c.bf16 %v3045_v42, %v3043_v41  ;;  %v3042_v54 = vld [vmem:[#allocation19 + $0x240] sm:$0xff]  ;;  %v3077_v41 = vld [vmem:[#allocation19 + $0x358] sm:$0xff] }
 0x7ec   : > { %v4159_v58 = vpack.c.bf16 %v3025_v56, %v3023_v55  ;;  %v3044_v55 = vld [vmem:[#allocation19 + $0x250] sm:$0xff] }
 0x7ee   : > { %4122 = vmatpush1.bf16.msra.mxu0 %v4121_v60  ;;  %v3024_v60 = vld [vmem:[#allocation19 + $0x1b0] sm:$0xff] }
 0x7ef   : > { %4124 = vmatprep.subr.bf16.mxu0 %v4123_v61  ;;  %v3027_v61 = vld [vmem:[#allocation19 + $0x1c8] sm:$0xff]  ;;  %v4161_v63 = vpack.c.bf16 %v3024_v60, %v3022_v59  ;;  %v4181_v59 = vpack.c.bf16 %v3044_v55, %v3042_v54  ;;  %v3081_v54 = vld [vmem:[#allocation19 + $0x378] sm:$0xff] }
 0x7f0   : > { %v4163_v0 = vpack.c.bf16 %v3029_v62, %v3027_v61  ;;  %v3046_v61 = vld [vmem:[#allocation19 + $0x260] sm:$0xff]  ;;  %v3048_v62 = vld [vmem:[#allocation19 + $0x270] sm:$0xff] }
 0x7f2   : > { %4126 = vmatpush1.bf16.msra.mxu0 %v4125_v2  ;;  %v3028_v2 = vld [vmem:[#allocation19 + $0x1d0] sm:$0xff] }
 0x7f3   : > { %4128 = vmatprep.subr.bf16.mxu0 %v4127_v47  ;;  %v4165_v47 = vpack.c.bf16 %v3028_v2, %v3026_v1  ;;  %v4185_v1 = vpack.c.bf16 %v3048_v62, %v3046_v61 }
 0x7f6   : > { %4130 = vmatpush1.bf16.msra.mxu0 %v4129_v5  ;;  %v3032_v5 = vld [vmem:[#allocation19 + $0x1f0] sm:$0xff] }
 0x7f7   : > { %4132 = vmatprep.subr.bf16.mxu0 %v4131_v6  ;;  %v4169_v6 = vpack.c.bf16 %v3032_v5, %v3030_v4 }
 0x7fa   : > { %4134 = vmatpush1.bf16.msra.mxu0 %v4133_v11  ;;  %v2791_v11 = vrot.slane %v5792_v10, %v5763_v49 }
 0x7fb   : > { %4136 = vmatprep.subr.bf16.mxu0 %v4135_v12  ;;  %v2795_v12 = vrot.slane %v5792_v10, %v5766_v7 }
 0x7fe   : > { %4138 = vmatpush1.bf16.msra.mxu0 %v4137_v20 }
 0x7ff   : > { %4140 = vmatprep.subr.bf16.mxu0 %v4139_v14 }
 0x802   : > { %4142 = vmatpush1.bf16.msra.mxu0 %v4141_v15  ;;  %v3041_v15 = vld [vmem:[#allocation19 + $0x238] sm:$0xff] }
 0x803   : > { %4144 = vmatprep.subr.bf16.mxu0 %v4143_v27  ;;  %v5802_v27 = vrot.slane %v5792_v10, %v2802_v13  ;;  %v3058_v13 = vld [vmem:[#allocation19 + $0x2c0] sm:$0xff] }
 0x806   : > { %4146 = vmatpush1.bf16.msra.mxu0 %v4145_v33 }
 0x807   : > { %4148 = vmatprep.subr.bf16.mxu0 %v4147_v34  ;;  %v4175_v34 = vpack.c.bf16 %v3041_v15, %v3039_v25  ;;  %v3067_v25 = vld [vmem:[#allocation19 + $0x308] sm:$0xff]  ;;  %v3069_v15 = vld [vmem:[#allocation19 + $0x318] sm:$0xff] }
 0x80a   : > { %4150 = vmatpush1.bf16.msra.mxu0 %v4149_v36  ;;  %v3040_v36 = vld [vmem:[#allocation19 + $0x230] sm:$0xff] }
 0x80b   : > { %4152 = vmatprep.subr.bf16.mxu0 %v4151_v37 }
 0x80e   : > { %4154 = vmatpush1.bf16.msra.mxu0 %v4153_v50  ;;  %v4177_v50 = vpack.c.bf16 %v3040_v36, %v3038_v35  ;;  %v3070_v36 = vld [vmem:[#allocation19 + $0x320] sm:$0xff] }
 0x80f   : > { %4156 = vmatprep.subr.bf16.mxu0 %v4155_v52 }
 0x812   : > { %4158 = vmatpush1.bf16.msra.mxu0 %v4157_v57  ;;  %v3047_v57 = vld [vmem:[#allocation19 + $0x268] sm:$0xff] }
 0x813   : > { %4160 = vmatprep.subr.bf16.mxu0 %v4159_v58  ;;  %v3049_v58 = vld [vmem:[#allocation19 + $0x278] sm:$0xff] }
 0x814   : > { %v4183_v60 = vpack.c.bf16 %v3049_v58, %v3047_v57  ;;  %v3078_v57 = vld [vmem:[#allocation19 + $0x360] sm:$0xff]  ;;  %v3080_v58 = vld [vmem:[#allocation19 + $0x370] sm:$0xff] }
 0x815   : > { %v4217_v61 = vpack.c.bf16 %v3080_v58, %v3078_v57 }
 0x816   : > { %4162 = vmatpush1.bf16.msra.mxu0 %v4161_v63  ;;  %v3051_v63 = vld [vmem:[#allocation19 + $0x288] sm:$0xff] }
 0x817   : > { %4164 = vmatprep.subr.bf16.mxu0 %v4163_v0  ;;  %v3053_v0 = vld [vmem:[#allocation19 + $0x298] sm:$0xff] }
 0x818   : > { %v4187_v2 = vpack.c.bf16 %v3053_v0, %v3051_v63  ;;  %v3082_v63 = vld [vmem:[#allocation19 + $0x380] sm:$0xff]  ;;  %v3084_v0 = vld [vmem:[#allocation19 + $0x390] sm:$0xff] }
 0x81a   : > { %4166 = vmatpush1.bf16.msra.mxu0 %v4165_v47  ;;  %v3050_v47 = vld [vmem:[#allocation19 + $0x280] sm:$0xff] }
 0x81b   : > { %4168 = vmatprep.subr.bf16.mxu0 %v4167_v46  ;;  %v3057_v46 = vld [vmem:[#allocation19 + $0x2b8] sm:$0xff]  ;;  %v4189_v4 = vpack.c.bf16 %v3052_v3, %v3050_v47  ;;  %v4221_v47 = vpack.c.bf16 %v3084_v0, %v3082_v63 }
 0x81c   : > { %v4191_v5 = vpack.c.bf16 %v3057_v46, %v3055_v43  ;;  %v3086_v43 = vld [vmem:[#allocation19 + $0x3a0] sm:$0xff]  ;;  %v3088_v46 = vld [vmem:[#allocation19 + $0x3b0] sm:$0xff] }
 0x81e   : > { %4170 = vmatpush1.bf16.msra.mxu0 %v4169_v6  ;;  %v3054_v6 = vld [vmem:[#allocation19 + $0x2a0] sm:$0xff] }
 0x81f   : > { %4172 = vmatprep.subr.bf16.mxu0 %v4171_v48  ;;  %v3061_v48 = vld [vmem:[#allocation19 + $0x2d8] sm:$0xff] }
 0x8b4   : > { %v2874_v16 = vpop.f32.mrb[8].mxu0  ;;  %v5799_v17 = vpop.f32.mrb[16].mxu1 }
 0x8b5   : > { %v2875_v19 = vadd.f32 %v2874_v16, %v2791_v11  ;;  %v2876_v20 = vpop.f32.mrb[9].mxu0  ;;  %v2953_v14 = vpop.f32.mrb[17].mxu1  ;;  %v3060_v16 = vld [vmem:[#allocation19 + $0x2d0] sm:$0xff] }
 0x8b6   : > { %v2877_v24 = vadd.f32 %v2876_v20, %v2795_v12  ;;  %v2954_v37 = vadd.f32 %v2953_v14, %v5802_v27  ;;  %v3065_v20 = vld [vmem:[#allocation19 + $0x2f8] sm:$0xff]  ;;  %v4197_v14 = vpack.c.bf16 %v3060_v16, %v3058_v13 }
 0x8b7   : > { %v2962_v31 = vmax.f32 %v2875_v19, 0.0  ;;  %v3063_v19 = vld [vmem:[#allocation19 + $0x2e8] sm:$0xff]  ;;  %v3097_v13 = vld [vmem:[#allocation19 + $0x3f8] sm:$0xff] }
 0x8b8   : > { %v2963_v18 = vmax.f32 %v2877_v24, 0.0  ;;  %v2880_v32 = vpop.f32.mrb[10].mxu0  ;;  %v5804_v33 = vpop.f32.mrb[18].mxu1  ;;  %v2965_v56 = vmax.f32 %v2954_v37, 0.0  ;;  %v4199_v21 = vpack.c.bf16 %v3065_v20, %v3063_v19  ;;  %v3064_v24 = vld [vmem:[#allocation19 + $0x2f0] sm:$0xff] }
 0x8b9   : > { %v2881_v51 = vadd.f32 %v2880_v32, %v2791_v11  ;;  %v2882_v23 = vpop.f32.mrb[11].mxu0  ;;  %v5806_v26 = vpop.f32.mrb[19].mxu1  ;;  %v4193_v11 = vpack.c.bf16 %v3056_v8, %v3054_v6  ;;  %v3068_v32 = vld [vmem:[#allocation19 + $0x310] sm:$0xff]  ;;  %v4225_v6 = vpack.c.bf16 %v3088_v46, %v3086_v43  ;;  %v2798_v8 = vsub.s32 2, %v5576_v45 }
 0x8ba   : > { %3174 = vmatprep.mubr.f32.mxu0 %v2963_v18  ;;  %v2883_v38 = vadd.f32 %v2882_v23, %v2795_v12  ;;  %v4195_v12 = vpack.c.bf16 %v3061_v48, %v3059_v9  ;;  %v4201_v18 = vpack.c.bf16 %v3064_v24, %v3062_v22  ;;  %v3072_v37 = vld [vmem:[#allocation19 + $0x330] sm:$0xff]  ;;  %v3090_v48 = vld [vmem:[#allocation19 + $0x3c0] sm:$0xff]  ;;  %v2960_v45 = vadd.f32 %v5806_v26, %v5802_v27 }
 0x8bb   : > { %3175 = vmatmul.mubr.f32.vlgmr.msra.gmra.mrb[12].mxu0 %v2962_v31  ;;  %v2966_v52 = vmax.f32 %v2881_v51, 0.0  ;;  %v3066_v31 = vld [vmem:[#allocation19 + $0x300] sm:$0xff]  ;;  %v3073_v51 = vld [vmem:[#allocation19 + $0x338] sm:$0xff]  ;;  %v4209_v42 = vpack.c.bf16 %v3072_v37, %v3070_v36  ;;  %v2799_v19 = vrot.slane %v5792_v10, %v2798_v8 }
 0x8bc   : > { %4174 = vmatpush1.bf16.msra.mxu0 %v4173_v28  ;;  %v2967_v44 = vmax.f32 %v2883_v38, 0.0  ;;  %v4203_v28 = vpack.c.bf16 %v3069_v15, %v3067_v25  ;;  %v4205_v23 = vpack.c.bf16 %v3068_v32, %v3066_v31  ;;  %v3075_v38 = vld [vmem:[#allocation19 + $0x348] sm:$0xff] }
 0x8bd   : > { %4176 = vmatprep.subr.bf16.mxu0 %v4175_v34  ;;  %v3071_v34 = vld [vmem:[#allocation19 + $0x328] sm:$0xff]  ;;  %v2952_v24 = vadd.f32 %v5799_v17, %v2799_v19  ;;  %v2958_v15 = vadd.f32 %v5804_v33, %v2799_v19 }
 0x8be   : > { %3180 = vmatprep.mubr.f32.mxu0 %v2967_v44  ;;  %v4207_v35 = vpack.c.bf16 %v3073_v51, %v3071_v34  ;;  %v4211_v44 = vpack.c.bf16 %v3077_v41, %v3075_v38 }
 0x8bf   : > { %3181 = vmatmul.mubr.f32.gmra.mrb[14].mxu0 %v2966_v52  ;;  %v3076_v52 = vld [vmem:[#allocation19 + $0x350] sm:$0xff]  ;;  %v2964_v25 = vmax.f32 %v2952_v24, 0.0  ;;  %v2968_v10 = vmax.f32 %v2958_v15, 0.0 }
 0x8c0   : > { %4178 = vmatpush1.bf16.msra.mxu0 %v4177_v50  ;;  %3251 = vmatprep.mubr.f32.mxu0 %v2965_v56  ;;  %v3074_v50 = vld [vmem:[#allocation19 + $0x340] sm:$0xff] }
 0x8c1   : > { %4180 = vmatprep.subr.bf16.mxu0 %v4179_v53  ;;  %v3079_v53 = vld [vmem:[#allocation19 + $0x368] sm:$0xff]  ;;  %v4213_v55 = vpack.c.bf16 %v3076_v52, %v3074_v50 }
 0x8c2   : > { %v4215_v56 = vpack.c.bf16 %v3081_v54, %v3079_v53 }
 0x8c4   : > { %4182 = vmatpush1.bf16.msra.mxu0 %v4181_v59  ;;  %v3083_v59 = vld [vmem:[#allocation19 + $0x388] sm:$0xff] }
 0x8c5   : > { %4184 = vmatprep.subr.bf16.mxu0 %v4183_v60  ;;  %v3085_v60 = vld [vmem:[#allocation19 + $0x398] sm:$0xff] }
 0x8c6   : > { %v4219_v62 = vpack.c.bf16 %v3085_v60, %v3083_v59 }
 0x8c8   : > { %4186 = vmatpush1.bf16.msra.mxu0 %v4185_v1  ;;  %v3087_v1 = vld [vmem:[#allocation19 + $0x3a8] sm:$0xff] }
 0x8c9   : > { %4188 = vmatprep.subr.bf16.mxu0 %v4187_v2  ;;  %v3089_v2 = vld [vmem:[#allocation19 + $0x3b8] sm:$0xff] }
 0x8ca   : > { %v4223_v3 = vpack.c.bf16 %v3089_v2, %v3087_v1 }
 0x8cc   : > { %4190 = vmatpush1.bf16.msra.mxu0 %v4189_v4  ;;  %v3091_v4 = vld [vmem:[#allocation19 + $0x3c8] sm:$0xff] }
 0x8cd   : > { %4192 = vmatprep.subr.bf16.mxu0 %v4191_v5  ;;  %v3093_v5 = vld [vmem:[#allocation19 + $0x3d8] sm:$0xff] }
 0x8ce   : > { %v4227_v9 = vpack.c.bf16 %v3093_v5, %v3091_v4 }
 0x8d0   : > { %4194 = vmatpush1.bf16.msra.mxu0 %v4193_v11  ;;  %v3092_v11 = vld [vmem:[#allocation19 + $0x3d0] sm:$0xff] }
 0x8d1   : > { %4196 = vmatprep.subr.bf16.mxu0 %v4195_v12  ;;  %v3095_v12 = vld [vmem:[#allocation19 + $0x3e8] sm:$0xff]  ;;  %v4229_v16 = vpack.c.bf16 %v3092_v11, %v3090_v48  ;;  %v3268_v48 = vld [vmem:[#allocation22] sm:$0x3] }
 0x8d2   : > { %v4231_v20 = vpack.c.bf16 %v3097_v13, %v3095_v12  ;;  %v3326_v19 = vrot.slane %v3268_v48, %v5766_v7 }
 0x8d4   : > { %4198 = vmatpush1.bf16.msra.mxu0 %v4197_v14  ;;  %v3094_v14 = vld [vmem:[#allocation19 + $0x3e0] sm:$0xff] }
 0x8d5   : > { %4200 = vmatprep.subr.bf16.mxu0 %v4199_v21  ;;  %v3096_v21 = vld [vmem:[#allocation19 + $0x3f0] sm:$0xff] }
 0x8d6   : > { %v4233_v22 = vpack.c.bf16 %v3096_v21, %v3094_v14  ;;  %v3269_v21 = vld [vmem:[#allocation23] sm:$0x3] }
 0x8d8   : > { %4202 = vmatpush1.bf16.msra.mxu0 %v4201_v18  ;;  %v2969_v18 = vmax.f32 %v2960_v45, 0.0  ;;  %v3341_v45 = vrot.slane %v3269_v21, %v5763_v49 }
 0x8d9   : > { %4204 = vmatprep.subr.bf16.mxu0 %v4203_v28  ;;  %v3098_v28 = vld [vmem:[#allocation20] sm:$0x3] }
 0x8da   : > { %v3103_v31 = vrot.slane %v3098_v28, %v5763_v49  ;;  %v3107_v32 = vrot.slane %v3098_v28, %v5766_v7 }
 0x8dc   : > { %4206 = vmatpush1.bf16.msra.mxu0 %v4205_v23 }
 0x8dd   : > { %4208 = vmatprep.subr.bf16.mxu0 %v4207_v35 }
 0x8e0   : > { %4210 = vmatpush1.bf16.msra.mxu0 %v4209_v42 }
 0x8e1   : > { %4212 = vmatprep.subr.bf16.mxu0 %v4211_v44 }
 0x8e4   : > { %4214 = vmatpush1.bf16.msra.mxu0 %v4213_v55 }
 0x8e5   : > { %4216 = vmatprep.subr.bf16.mxu0 %v4215_v56 }
 0x8e8   : > { %4218 = vmatpush1.bf16.msra.mxu0 %v4217_v61 }
 0x8e9   : > { %4220 = vmatprep.subr.bf16.mxu0 %v4219_v62 }
 0x8ec   : > { %4222 = vmatpush1.bf16.msra.mxu0 %v4221_v47 }
 0x8ed   : > { %4224 = vmatprep.subr.bf16.mxu0 %v4223_v3 }
 0x8f0   : > { %4226 = vmatpush1.bf16.msra.mxu0 %v4225_v6 }
 0x8f1   : > { %4228 = vmatprep.subr.bf16.mxu0 %v4227_v9 }
 0x8f4   : > { %4230 = vmatpush1.bf16.msra.mxu0 %v4229_v16  ;;  %v3322_v16 = vrot.slane %v3268_v48, %v5763_v49 }
 0x8f5   : > { %4232 = vmatprep.subr.bf16.mxu0 %v4231_v20 }
 0x8f8   : > { %4234 = vmatpush1.bf16.msra.mxu0 %v4233_v22 }
 0x8fb   : > { %3252 = vmatmul.mubr.f32.vlgmr.msra.gmra.mrb[12].mxu0 %v2964_v25  ;;  %v3345_v25 = vrot.slane %v3269_v21, %v5766_v7 }
 0x8fc   : > { %3257 = vmatprep.mubr.f32.mxu0 %v2969_v18 }
 0x8ff   : > { %3258 = vmatmul.mubr.f32.gmra.mrb[14].mxu0 %v2968_v10 }
 0x9ce   : > { %v3253_v34 = vpop.f32.mrb[12].mxu0 }
 0x9cf   : > { %v4235_v17 = vadd.f32 %v3253_v34, %v3103_v31  ;;  %v3255_v51 = vpop.f32.mrb[13].mxu0 }
 0x9d0   : > { %v4236_v23 = vadd.f32 %v3255_v51, %v3107_v32 }
 0x9d1   : > { %v3264_v27 = vadd.f32 %v4235_v17, %v5778_v30 }
 0x9d2   : > { %v3265_v26 = vadd.f32 %v4236_v23, %v5776_v29  ;;  %v3259_v35 = vpop.f32.mrb[14].mxu0 }
 0x9d3   : > { %v4237_v33 = vadd.f32 %v3259_v35, %v3103_v31  ;;  %v3261_v36 = vpop.f32.mrb[15].mxu0  ;;  %v3276_v41 = vmul.f32 %v3264_v27, %v3264_v27 }
 0x9d4   : > { %v4238_v37 = vadd.f32 %v3261_v36, %v3107_v32  ;;  %v3270_v38 = vadd.f32 %v3265_v26, %v3264_v27  ;;  %v3277_v42 = vmul.f32 %v3265_v26, %v3265_v26 }
 0x9d5   : > { %v5820_v44 = vadd.f32 %v4237_v33, %v5786_v40 }
 0x9d6   : > { %v5823_v50 = vadd.f32 %v4238_v37, %v5784_v39  ;;  %3271 = vadd.xlane.f32.xlu0 %v3270_v38  ;;  %v3280_v30 = vadd.f32 %v3277_v42, %v3276_v41 }
 0x9d7   : > { %v3278_v29 = vmul.f32 %v5820_v44, %v5820_v44 }
 0x9d8   : > { %v3273_v52 = vadd.f32 %v5823_v50, %v5820_v44  ;;  %v3279_v53 = vmul.f32 %v5823_v50, %v5823_v50 }
 0x9da   : > { %3274 = vadd.xlane.f32.xlu1 %v3273_v52  ;;  %3281 = vadd.xlane.f32.xlu0 %v3280_v30  ;;  %v3283_v54 = vadd.f32 %v3279_v53, %v3278_v29 }
 0x9de   : > { %3284 = vadd.xlane.f32.xlu1 %v3283_v54 }
 0xa63   : > { %v3272_v40 = vpop.xlane.xlu0 %3271 }
 0xa64   : > { %v3286_v55 = vmul.f32 0.00390625, %v3272_v40 }
 0xa66   : > { %v3288_v56 = vmul.f32 %v3286_v55, %v3272_v40  ;;  %v3314_v20 = vsub.f32 %v3264_v27, %v3286_v55  ;;  %v3315_v14 = vsub.f32 %v3265_v26, %v3286_v55 }
 0xa67   : > { %v3275_v39 = vpop.xlane.xlu1 %3274  ;;  %v3282_v57 = vpop.xlane.xlu0 %3281 }
 0xa68   : > { %v3287_v58 = vmul.f32 0.00390625, %v3275_v39  ;;  %v3290_v59 = vsub.f32 %v3282_v57, %v3288_v56  ;;  %v3329_v22 = vmul.f32 %v3322_v16, %v3314_v20  ;;  %v3330_v24 = vmul.f32 %v3326_v19, %v3315_v14 }
 0xa6a   : > { %v3289_v60 = vmul.f32 %v3287_v58, %v3275_v39  ;;  %v3292_v61 = vmul.f32 0.003921569, %v3290_v59  ;;  %v3316_v18 = vsub.f32 %v5820_v44, %v3287_v58  ;;  %v3317_v10 = vsub.f32 %v5823_v50, %v3287_v58 }
 0xa6b   : > { %v3285_v62 = vpop.xlane.xlu1 %3284 }
 0xa6c   : > { %v3294_v63 = vmax.f32 %v3292_v61, 0.0  ;;  %v3291_v0 = vsub.f32 %v3285_v62, %v3289_v60  ;;  %v3331_v17 = vmul.f32 %v3322_v16, %v3316_v18  ;;  %v3332_v51 = vmul.f32 %v3326_v19, %v3317_v10 }
 0xa6e   : > { %4464 = vrsqrt.f32 %v3294_v63  ;;  %v3293_v1 = vmul.f32 0.003921569, %v3291_v0  ;;  %vm3298_vm5 = vcmp.eq.f32.partialorder %v3294_v63, inf  ;;  %v3301_v43 = vand.u32 2147483648, %v3294_v63 }
 0xa6f   : > { %vm3300_vm6 = vcmp.eq.f32.partialorder %v3294_v63, 0.0 }
 0xa70   : > { %v3295_v2 = vmax.f32 %v3293_v1, 0.0 }
 0xa72   : > { %4466 = vrsqrt.f32 %v3295_v2  ;;  %vm3305_vm7 = vcmp.eq.f32.partialorder %v3295_v2, inf  ;;  %v3308_v9 = vand.u32 2147483648, %v3295_v2  ;;  %vm3307_vm8 = vcmp.eq.f32.partialorder %v3295_v2, 0.0 }
 0xa78   : > { %v4465_v47 = vpop.eup %4464 }
 0xa79   : > { %v3297_v3 = vmul.f32 %v4465_v47, %v3294_v63 }
 0xa7b   : > { %v3299_v46 = vsel %vm3298_vm5, %v3294_v63, %v3297_v3 }
 0xa7c   : > { %v3302_v4 = vsel %vm3300_vm6, %v3301_v43, %v3299_v46  ;;  %v4467_v5 = vpop.eup %4466 }
 0xa7d   : > { %v3310_v6 = vadd.f32 1e-06, %v3302_v4  ;;  %v3304_v8 = vmul.f32 %v4467_v5, %v3295_v2 }
 0xa7f   : > { %4468 = vrcp.f32 %v3310_v6  ;;  %v3306_v11 = vsel %vm3305_vm7, %v3295_v2, %v3304_v8 }
 0xa80   : > { %v3309_v12 = vsel %vm3307_vm8, %v3308_v9, %v3306_v11 }
 0xa81   : > { %v3311_v13 = vadd.f32 1e-06, %v3309_v12 }
 0xa83   : > { %4470 = vrcp.f32 %v3311_v13 }
 0xa89   : > { %v4469_v15 = vpop.eup %4468 }
 0xa8a   : > { %v3333_v28 = vmul.f32 %v4469_v15, %v3329_v22  ;;  %v3334_v31 = vmul.f32 %v4469_v15, %v3330_v24 }
 0xa8c   : > { %v3348_v32 = vadd.f32 %v3341_v45, %v3333_v28  ;;  %v3349_v34 = vadd.f32 %v3345_v25, %v3334_v31 }
 0xa8d   : > { %v4471_v23 = vpop.eup %4470 }
 0xa8e   : > { %3352 = vst [vmem:[%s706_s22] sm:$0xff] %v3348_v32  ;;  %3353 = vst [vmem:[%s706_s22 + $0x8] sm:$0xff] %v3349_v34  ;;  %v3335_v49 = vmul.f32 %v4471_v23, %v3331_v17  ;;  %v3336_v7 = vmul.f32 %v4471_v23, %v3332_v51 }
 0xa90   : > { %v3350_v27 = vadd.f32 %v3341_v45, %v3335_v49  ;;  %v3351_v26 = vadd.f32 %v3345_v25, %v3336_v7 }
 0xa92   : > { %3354 = vst [vmem:[%s706_s22 + $0x10] sm:$0xff] %v3350_v27  ;;  %3355 = vst [vmem:[%s706_s22 + $0x18] sm:$0xff] %v3351_v26 }
 0xa93   : > { %4885 = shalt.err (!%p4882_p13)
}
 0xa94   : > { %s4886_s5 = scalar_lea.hbm %s5842_s3, 512  ;;  %s4890_s29 = scalar_lea.hbm %s5985_s25, 1024 }
 0xa95   : > { %p4887_p4 = scmp.ne.s32.totalorder %s5842_s3, %s4886_s5  ;;  %p4891_p7 = scmp.lt.u32.totalorder %s5842_s3, %s5985_s25 }
 0xa96   : > { %p4892_p5 = scmp.lt.u32.totalorder %s4890_s29, %s4886_s5  ;;  %p4894_p10 = scmp.lt.u32.totalorder %s4886_s5, %s5842_s3 }
 0xa97   : > { %p4888_p9 = pnand %p4887_p4, %p5986_p11 }
 0xa98   : > { %p4893_p1 = por %p4892_p5, %p4891_p7 }
 0xa99   : > { %p4889_p0 = pneg %p4888_p9 }
 0xa9a   : > { %p4895_p8 = por %p4894_p10, %p4893_p1 }
 0xa9c   : > { %p4896_p3 = pnand %p4895_p8, %p4889_p0 }
 0xa9e   : > { %4899 = shalt.err (!%p4896_p3)
}
 0xa9f   : > { %s5010_s30 = smov 256   ;;  %s5011_s22 = smov 16  }
 0xaa0   : > { %4295 = dma.vmem_to_hbm [thread:$0]  (%p5986_p11), %s5844_s16, 512, %s5842_s3, %s3357_s23, %s5010_s30, %s5010_s30, %s5011_s22  }
 0xaa1 PF: > { %s5987_s9 = sld [smem:[#allocation36_spill]]  ;;  %p5988_p12 = scmp.ne.s32.totalorder %s5961_s26, 0 }
 0xaa2   : > { %p5989_p6 = scmp.ge.s32.totalorder %s4986_s18, 2 }
 0xaa4   : > { %p4342_p2 = pnand %p5989_p6, %p5988_p12 }
 0xaa7   : > { %s3388_s6 = sand.u32 1, %s5987_s9  }
 0xaa8   : > { %s3389_s7 = scalar_lea.sflag [#allocation4], %s3388_s6 }
 0xaa9   : > { %4961 = dma.done.wait (!%p4342_p2), %s3389_s7, 512  }
 0xaaa   : > { %4963 = vsyncadd (!%p4342_p2), %s3389_s7, 4294966784  ;;  %s39_s18 = sadd.s32 1, %s4986_s18   ;;  %s5990_s29 = sld [smem:[#allocation37_spill]] }
 0xaab   : > { %p36_p13 = scmp.ge.s32.totalorder %s39_s18, 4   ;;  %s5991_s30 = smov %s4974_s15 }
 0xaac   : > { %s5992_s15 = smov %s5418_s2  ;;  %s5993_s16 = smov %s4982_s17 }
 0xaad   : > { %s5994_s17 = smov %s5996_s14  ;;  %38 = sbr.rel (!%p36_p13) target bundleno = 27 (0x1b), region = 182 }
 0xab4   :  { %3394 = vsyncpa [#allocation3], 1 }
 0xab5   :  { %3396 = vsyncpa [#allocation3 + $0x1], 1 }
 0xab6   :  { %3397 = vsyncpa [#allocation6], 1 }
 0xab7   :  { %3399 = vsyncpa [#allocation6 + $0x1], 1 }
 0xab8   :  { %3400 = vsyncpa [#allocation9], 1 }
 0xab9   :  { %3401 = vsyncpa [#allocation12], 1 }
 0xaba   :  { %3402 = vsyncpa [#allocation15], 1 }
 0xabb   :  { %3403 = vsyncpa [#allocation18], 1 }
 0xabc   :  { %3404 = vsyncpa [#allocation21], 1 }
 0xabd   :  { %3405 = vsyncpa [#allocation24], 1 }
 0xabe   :  { %3406 = vsyncpa [#allocation4], 1 }
 0xabf   :  { %3408 = vsyncpa [#allocation4 + $0x1], 1 }

</bundles_post_ra>
